<compile_context>
chip_gen: v7x
topology: tpu7x:2x2x1
jax: 0.10.0
libtpu: 0.0.40
codegen_flags: <defaults>
</compile_context>

<pallas_src>
import jax
import jax.numpy as jnp
from jax.experimental import pallas as pl
from jax.experimental.pallas import tpu as pltpu

IN_F, HID, OUT = 784, 800, 10           # logical (PyTorch) feature sizes
IN_P, HID_P, OUT_P = 896, 896, 128      # lane-padded (multiples of 128)


def _round_up(n, m):
    return ((n + m - 1) // m) * m


def mlp_kernel(x_ref, w1_ref, b1_ref, w2_ref, b2_ref, w3_ref, b3_ref, o_ref):
    # ---- fc1 + ReLU (bf16 MXU, f32 accumulation) ----
    x = x_ref[...]                                               # (TB, IN_P) bf16
    h1 = jnp.dot(x, w1_ref[...], preferred_element_type=jnp.float32) + b1_ref[...]
    h1 = jnp.maximum(h1, 0.0).astype(jnp.bfloat16)
    # dropout1: identity at inference

    # ---- fc2 + ReLU ----
    h2 = jnp.dot(h1, w2_ref[...], preferred_element_type=jnp.float32) + b2_ref[...]
    h2 = jnp.maximum(h2, 0.0).astype(jnp.bfloat16)
    # dropout2: identity at inference

    # ---- fc3 ----
    logits = jnp.dot(h2, w3_ref[...], preferred_element_type=jnp.float32) + b3_ref[...]

    # Mask padded class columns (>= OUT) so they get ~zero probability.
    col = jax.lax.broadcasted_iota(jnp.int32, logits.shape, 1)
    logits = jnp.where(col < OUT, logits, -1e30)

    # ---- numerically stable log_softmax over dim=1 (all f32) ----
    m = jnp.max(logits, axis=-1, keepdims=True)
    shifted = logits - m
    lse = jnp.log(jnp.sum(jnp.exp(shifted), axis=-1, keepdims=True))
    o_ref[...] = shifted - lse                                   # (TB, OUT_P) f32, lane-dense store


def pack_params(params):
    """Pad weights/biases to lane-aligned shapes; weights -> bf16 (done once, not per call)."""
    w1, b1, w2, b2, w3, b3 = params

    def pad2(a, r, c):
        return jnp.zeros((r, c), a.dtype).at[: a.shape[0], : a.shape[1]].set(a)

    return (
        pad2(w1, IN_P, HID_P).astype(jnp.bfloat16),
        pad2(b1, 1, HID_P).astype(jnp.float32),
        pad2(w2, HID_P, HID_P).astype(jnp.bfloat16),
        pad2(b2, 1, HID_P).astype(jnp.float32),
        pad2(w3, HID_P, OUT_P).astype(jnp.bfloat16),
        pad2(b3, 1, OUT_P).astype(jnp.float32),
    )


def mnist_mlp_forward(x, packed_params):
    """x: (B, 1, 28, 28) or (B, 784). Returns (B, 10) float32 log-probs."""
    w1, b1, w2, b2, w3, b3 = packed_params
    x2d = x.reshape(-1, IN_F)
    B = x2d.shape[0]

    # Batch tile: multiple of 8 (f32/bf16 sublane friendly), capped at 256.
    TB = min(256, _round_up(B, 8))
    B_pad = _round_up(B, TB)

    # Pad batch rows and feature columns with zeros; cast activations to bf16 once.
    x_p = (
        jnp.zeros((B_pad, IN_P), jnp.bfloat16)
        .at[:B, :IN_F]
        .set(x2d.astype(jnp.bfloat16))
    )

    const = lambda shape: pl.BlockSpec(shape, lambda i: tuple(0 for _ in shape))

    out = pl.pallas_call(
        mlp_kernel,
        out_shape=jax.ShapeDtypeStruct((B_pad, OUT_P), jnp.float32),
        grid=(B_pad // TB,),
        in_specs=[
            pl.BlockSpec((TB, IN_P), lambda i: (i, 0)),   # x: tiled over batch
            const((IN_P, HID_P)), const((1, HID_P)),      # w1, b1: VMEM-resident
            const((HID_P, HID_P)), const((1, HID_P)),     # w2, b2
            const((HID_P, OUT_P)), const((1, OUT_P)),     # w3, b3
        ],
        out_specs=pl.BlockSpec((TB, OUT_P), lambda i: (i, 0)),
        compiler_params=pltpu.CompilerParams(
            dimension_semantics=("parallel",),            # megacore on v7x
            vmem_limit_bytes=32 << 20,
        ),
    )(x_p, w1, b1, w2, b2, w3, b3)

    return out[:B, :OUT]


def init_params(key):
    """nn.Linear-style init (uniform +/- 1/sqrt(fan_in)); weights stored as (in, out)."""

    def linear(k, fan_in, fan_out):
        kw, kb = jax.random.split(k)
        bound = 1.0 / jnp.sqrt(fan_in)
        w_t = jax.random.uniform(kw, (fan_in, fan_out), jnp.float32, -bound, bound)
        b = jax.random.uniform(kb, (1, fan_out), jnp.float32, -bound, bound)
        return w_t, b

    k1, k2, k3 = jax.random.split(key, 3)
    w1, b1 = linear(k1, IN_F, HID)
    w2, b2 = linear(k2, HID, HID)
    w3, b3 = linear(k3, HID, OUT)
    return (w1, b1, w2, b2, w3, b3)


def reference_forward(x, params):
    """Pure-JAX f32 reference of the PyTorch forward (eval mode)."""
    w1, b1, w2, b2, w3, b3 = params
    x2d = x.reshape(-1, IN_F)
    h1 = jnp.maximum(x2d @ w1 + b1, 0.0)
    h2 = jnp.maximum(h1 @ w2 + b2, 0.0)
    logits = h2 @ w3 + b3
    return jax.nn.log_softmax(logits, axis=1)


if __name__ == "__main__":
    key = jax.random.PRNGKey(0)
    kp, kx = jax.random.split(key)
    params = init_params(kp)
    packed = pack_params(params)

    # Small batch of MNIST-shaped inputs (B, 1, 28, 28) -> flattened to (B, 784).
    x = jax.random.normal(kx, (8, 1, 28, 28), jnp.float32)

    out = mnist_mlp_forward(x, packed)
    out = jax.block_until_ready(out)

    assert out.shape == (8, 10)
    # log-probs: exp-sum per row should be ~1
    assert bool(jnp.all(jnp.abs(jnp.sum(jnp.exp(out), axis=1) - 1.0) < 1e-3))
    # loose check vs f32 reference (kernel uses bf16 matmuls)
    ref = reference_forward(x, params)
    assert bool(jnp.all(jnp.abs(out - ref) < 0.15))
    print("KERNEL_OK")
</pallas_src>

<mosaic_0001>
module attributes {stable_mosaic.version = 11 : i64} {
  func.func @mlp_kernel(%arg0: i32, %arg1: memref<8x896xbf16, #tpu.memory_space<vmem>>, %arg2: memref<896x896xbf16, #tpu.memory_space<vmem>>, %arg3: memref<1x896xf32, #tpu.memory_space<vmem>>, %arg4: memref<896x896xbf16, #tpu.memory_space<vmem>>, %arg5: memref<1x896xf32, #tpu.memory_space<vmem>>, %arg6: memref<896x128xbf16, #tpu.memory_space<vmem>>, %arg7: memref<1x128xf32, #tpu.memory_space<vmem>>, %arg8: memref<8x128xf32, #tpu.memory_space<vmem>>) attributes {dimension_semantics = [#tpu.dimension_semantics<parallel>], iteration_bounds = array<i64: 1>, scalar_prefetch = 0 : i64, scratch_operands = 0 : i64, tpu.core_type = #tpu.core_type<tc>, window_params = [{transform_indices = @transform_0, window_bounds = array<i64: 8, 896>}, {pipeline_mode = #tpu.pipeline_mode<synchronous>, transform_indices = @transform_1, window_bounds = array<i64: 896, 896>}, {pipeline_mode = #tpu.pipeline_mode<synchronous>, transform_indices = @transform_2, window_bounds = array<i64: 1, 896>}, {pipeline_mode = #tpu.pipeline_mode<synchronous>, transform_indices = @transform_3, window_bounds = array<i64: 896, 896>}, {pipeline_mode = #tpu.pipeline_mode<synchronous>, transform_indices = @transform_4, window_bounds = array<i64: 1, 896>}, {pipeline_mode = #tpu.pipeline_mode<synchronous>, transform_indices = @transform_5, window_bounds = array<i64: 896, 128>}, {pipeline_mode = #tpu.pipeline_mode<synchronous>, transform_indices = @transform_6, window_bounds = array<i64: 1, 128>}, {transform_indices = @transform_7, window_bounds = array<i64: 8, 128>}]} {
    %c0 = arith.constant 0 : index
    %c0_0 = arith.constant 0 : index
    %0 = vector.load %arg1[%c0, %c0_0] : memref<8x896xbf16, #tpu.memory_space<vmem>>, vector<8x896xbf16>
    %c0_1 = arith.constant 0 : index
    %c0_2 = arith.constant 0 : index
    %1 = vector.load %arg2[%c0_1, %c0_2] : memref<896x896xbf16, #tpu.memory_space<vmem>>, vector<896x896xbf16>
    %cst = arith.constant dense<0.000000e+00> : vector<8x896xf32>
    %2 = tpu.matmul %0, %1, %cst {dimension_numbers = #tpu.dot_dimension_numbers<[1], [0], [0], [1], [0, 0, 1, 1], [], []>} : vector<8x896xbf16>, vector<896x896xbf16>, vector<8x896xf32> -> vector<8x896xf32>
    %c0_3 = arith.constant 0 : index
    %c0_4 = arith.constant 0 : index
    %3 = vector.load %arg3[%c0_3, %c0_4] : memref<1x896xf32, #tpu.memory_space<vmem>>, vector<1x896xf32>
    %4 = vector.broadcast %3 : vector<1x896xf32> to vector<8x896xf32>
    %5 = arith.addf %2, %4 : vector<8x896xf32>
    %cst_5 = arith.constant 0.000000e+00 : f32
    %6 = vector.broadcast %cst_5 : f32 to vector<8x896xf32>
    %7 = arith.maximumf %5, %6 : vector<8x896xf32>
    %8 = arith.truncf %7 : vector<8x896xf32> to vector<8x896xbf16>
    %c0_6 = arith.constant 0 : index
    %c0_7 = arith.constant 0 : index
    %9 = vector.load %arg4[%c0_6, %c0_7] : memref<896x896xbf16, #tpu.memory_space<vmem>>, vector<896x896xbf16>
    %cst_8 = arith.constant dense<0.000000e+00> : vector<8x896xf32>
    %10 = tpu.matmul %8, %9, %cst_8 {dimension_numbers = #tpu.dot_dimension_numbers<[1], [0], [0], [1], [0, 0, 1, 1], [], []>} : vector<8x896xbf16>, vector<896x896xbf16>, vector<8x896xf32> -> vector<8x896xf32>
    %c0_9 = arith.constant 0 : index
    %c0_10 = arith.constant 0 : index
    %11 = vector.load %arg5[%c0_9, %c0_10] : memref<1x896xf32, #tpu.memory_space<vmem>>, vector<1x896xf32>
    %12 = vector.broadcast %11 : vector<1x896xf32> to vector<8x896xf32>
    %13 = arith.addf %10, %12 : vector<8x896xf32>
    %cst_11 = arith.constant 0.000000e+00 : f32
    %14 = vector.broadcast %cst_11 : f32 to vector<8x896xf32>
    %15 = arith.maximumf %13, %14 : vector<8x896xf32>
    %16 = arith.truncf %15 : vector<8x896xf32> to vector<8x896xbf16>
    %c0_12 = arith.constant 0 : index
    %c0_13 = arith.constant 0 : index
    %17 = vector.load %arg6[%c0_12, %c0_13] : memref<896x128xbf16, #tpu.memory_space<vmem>>, vector<896x128xbf16>
    %cst_14 = arith.constant dense<0.000000e+00> : vector<8x128xf32>
    %18 = tpu.matmul %16, %17, %cst_14 {dimension_numbers = #tpu.dot_dimension_numbers<[1], [0], [0], [1], [0, 0, 1, 1], [], []>} : vector<8x896xbf16>, vector<896x128xbf16>, vector<8x128xf32> -> vector<8x128xf32>
    %c0_15 = arith.constant 0 : index
    %c0_16 = arith.constant 0 : index
    %19 = vector.load %arg7[%c0_15, %c0_16] : memref<1x128xf32, #tpu.memory_space<vmem>>, vector<1x128xf32>
    %20 = vector.broadcast %19 : vector<1x128xf32> to vector<8x128xf32>
    %21 = arith.addf %18, %20 : vector<8x128xf32>
    %22 = tpu.iota {dimensions = array<i32: 1>} : vector<8x128xi32>
    %c10_i32 = arith.constant 10 : i32
    %23 = vector.broadcast %c10_i32 : i32 to vector<8x128xi32>
    %24 = arith.cmpi slt, %22, %23 : vector<8x128xi32>
    %cst_17 = arith.constant -1.000000e+30 : f32
    %25 = vector.broadcast %cst_17 : f32 to vector<8x128xf32>
    %26 = arith.select %24, %21, %25 : vector<8x128xi1>, vector<8x128xf32>
    %cst_18 = arith.constant dense<0xFF800000> : vector<8xf32>
    %27 = vector.multi_reduction <maximumf>, %26, %cst_18 [1] : vector<8x128xf32> to vector<8xf32>
    %28 = vector.shape_cast %27 : vector<8xf32> to vector<8x1xf32>
    %29 = vector.broadcast %28 : vector<8x1xf32> to vector<8x128xf32>
    %30 = arith.subf %26, %29 : vector<8x128xf32>
    %31 = math.exp %30 : vector<8x128xf32>
    %cst_19 = arith.constant dense<0.000000e+00> : vector<8xf32>
    %32 = vector.multi_reduction <add>, %31, %cst_19 [1] : vector<8x128xf32> to vector<8xf32>
    %33 = vector.shape_cast %32 : vector<8xf32> to vector<8x1xf32>
    %34 = math.log %33 : vector<8x1xf32>
    %35 = vector.broadcast %34 : vector<8x1xf32> to vector<8x128xf32>
    %36 = arith.subf %30, %35 : vector<8x128xf32>
    %c0_20 = arith.constant 0 : index
    %c0_21 = arith.constant 0 : index
    %37 = vector.load %arg8[%c0_20, %c0_21] : memref<8x128xf32, #tpu.memory_space<vmem>>, vector<8x128xf32>
    tpu.vector_store %arg8[%c0_20, %c0_21], %36 {strides = array<i32>} : memref<8x128xf32, #tpu.memory_space<vmem>>, vector<8x128xf32>,
    return
  }
  func.func @transform_0(%arg0: i32) -> (i32, i32) {
    %c0_i32 = arith.constant 0 : i32
    %c0_i32_0 = arith.constant 0 : i32
    return %arg0, %c0_i32 : i32, i32
  }
  func.func @transform_1(%arg0: i32) -> (i32, i32) {
    %c0_i32 = arith.constant 0 : i32
    %c0_i32_0 = arith.constant 0 : i32
    %c0_i32_1 = arith.constant 0 : i32
    return %c0_i32, %c0_i32_0 : i32, i32
  }
  func.func @transform_2(%arg0: i32) -> (i32, i32) {
    %c0_i32 = arith.constant 0 : i32
    %c0_i32_0 = arith.constant 0 : i32
    %c0_i32_1 = arith.constant 0 : i32
    return %c0_i32, %c0_i32_0 : i32, i32
  }
  func.func @transform_3(%arg0: i32) -> (i32, i32) {
    %c0_i32 = arith.constant 0 : i32
    %c0_i32_0 = arith.constant 0 : i32
    %c0_i32_1 = arith.constant 0 : i32
    return %c0_i32, %c0_i32_0 : i32, i32
  }
  func.func @transform_4(%arg0: i32) -> (i32, i32) {
    %c0_i32 = arith.constant 0 : i32
    %c0_i32_0 = arith.constant 0 : i32
    %c0_i32_1 = arith.constant 0 : i32
    return %c0_i32, %c0_i32_0 : i32, i32
  }
  func.func @transform_5(%arg0: i32) -> (i32, i32) {
    %c0_i32 = arith.constant 0 : i32
    %c0_i32_0 = arith.constant 0 : i32
    %c0_i32_1 = arith.constant 0 : i32
    return %c0_i32, %c0_i32_0 : i32, i32
  }
  func.func @transform_6(%arg0: i32) -> (i32, i32) {
    %c0_i32 = arith.constant 0 : i32
    %c0_i32_0 = arith.constant 0 : i32
    %c0_i32_1 = arith.constant 0 : i32
    return %c0_i32, %c0_i32_0 : i32, i32
  }
  func.func @transform_7(%arg0: i32) -> (i32, i32) {
    %c0_i32 = arith.constant 0 : i32
    %c0_i32_0 = arith.constant 0 : i32
    return %arg0, %c0_i32 : i32, i32
  }
}

</mosaic_0001>

<bundles_post_ra>
// kernel: tpu_custom_call.1
= control target key start
LH: loop header
LB: loop body
LE: loop exit
PB: predicated region body
PF: predicated region fallthrough
CT: control target
= control target key end

     0   :  { %12 = vsyncpa [#allocation3], 0  ;;  %s10084_s0 = inlined_call_operand.hbm [shape: bf16[8,896], index: 0, kind: input, shape index: {}]   ;;  %s10085_s1 = inlined_call_operand.hbm [shape: bf16[896,896], index: 1, kind: input, shape index: {}]   ;;  %s10086_s2 = inlined_call_operand.hbm [shape: f32[1,896], index: 2, kind: input, shape index: {}]   ;;  %s10087_s3 = inlined_call_operand.hbm [shape: bf16[896,896], index: 3, kind: input, shape index: {}]   ;;  %s10088_s4 = inlined_call_operand.hbm [shape: f32[1,896], index: 4, kind: input, shape index: {}]   ;;  %s10089_s5 = inlined_call_operand.hbm [shape: bf16[896,128], index: 5, kind: input, shape index: {}]   ;;  %s10090_s6 = inlined_call_operand.hbm [shape: f32[1,128], index: 6, kind: input, shape index: {}]   ;;  %s10091_s7 = inlined_call_operand.hbm [shape: f32[8,128], index: 7, kind: output, shape index: {}]  }
   0x1   :  { %13 = vsyncpa [#allocation6], 0 }
   0x2   :  { %14 = vsyncpa [#allocation9], 0 }
   0x3   :  { %15 = vsyncpa [#allocation12], 0 }
   0x4   :  { %16 = vsyncpa [#allocation4], 0  ;;  %s9733_s24 = smov [#allocation5]   ;;  %s9547_s28 = scalar_lea.hbm %s10085_s1, 50176 }
   0x5   :  { %s32_s25 = sshll.u32 %s9733_s24, 4  ;;  %p9548_p0 = scmp.ne.s32.totalorder %s10085_s1, %s9547_s28  ;;  %s33_s25 = int_to_ptr.vmem [resolvable:$true] %s32_s25 }
   0x6   :  { %p9551_p1 = scmp.lt.u32.totalorder %s9547_s28, %s10085_s1 }
   0x8   :  { %p9553_p2 = pnand %p9551_p1, %p9548_p0 }
   0xa   :  { %9556 = shalt.err (!%p9553_p2)
}
   0xb   :  { %s9557_s10 = scalar_lea.vmem %s33_s25, 50176  ;;  %p9562_p4 = scmp.lt.s32.totalorder %s33_s25, %s33_s25 }
   0xc   :  { %p9558_p3 = scmp.ne.s32.totalorder %s33_s25, %s9557_s10  ;;  %p9563_p5 = scmp.lt.s32.totalorder %s9557_s10, %s9557_s10 }
   0xe   :  { %p9564_p6 = por %p9563_p5, %p9562_p4 }
  0x10   :  { %p9565_p7 = pnand %p9564_p6, %p9558_p3 }
  0x12   :  { %9568 = shalt.err (!%p9565_p7)
}
  0x13   :  { %s9734_s11 = smov 448   ;;  %s9735_s12 = smov 28  }
  0x14   :  { %38 = dma.hbm_to_vmem [thread:$0]  %s10085_s1, 50176, %s33_s25, [#allocation6], %s9734_s11, %s9734_s11, %s9735_s12  }
  0x15   :  { %s9736_s15 = smov [#allocation8]   ;;  %s9737_s17 = smov [#allocation11]  }
  0x16   :  { %s54_s16 = sshll.u32 %s9736_s15, 4  ;;  %s76_s18 = sshll.u32 %s9737_s17, 4  ;;  %s55_s16 = int_to_ptr.vmem [resolvable:$true] %s54_s16  ;;  %s77_s18 = int_to_ptr.vmem [resolvable:$true] %s76_s18 }
  0x17   :  { %s9569_s21 = scalar_lea.hbm %s10087_s3, 50176 }
  0x18   :  { %p9570_p8 = scmp.ne.s32.totalorder %s10087_s3, %s9569_s21  ;;  %p9573_p9 = scmp.lt.u32.totalorder %s9569_s21, %s10087_s3 }
  0x1a   :  { %p9575_p10 = pnand %p9573_p9, %p9570_p8 }
  0x1c   :  { %9578 = shalt.err (!%p9575_p10)
}
  0x1d   :  { %s9579_s1 = scalar_lea.vmem %s55_s16, 50176  ;;  %p9584_p12 = scmp.lt.s32.totalorder %s55_s16, %s55_s16 }
  0x1e   :  { %p9580_p11 = scmp.ne.s32.totalorder %s55_s16, %s9579_s1  ;;  %p9585_p13 = scmp.lt.s32.totalorder %s9579_s1, %s9579_s1 }
  0x20   :  { %p9586_p0 = por %p9585_p13, %p9584_p12 }
  0x22   :  { %p9587_p1 = pnand %p9586_p0, %p9580_p11 }
  0x24   :  { %9590 = shalt.err (!%p9587_p1)
}
  0x25   :  { %60 = dma.hbm_to_vmem [thread:$0]  %s10087_s3, 50176, %s55_s16, [#allocation9], %s9734_s11, %s9734_s11, %s9735_s12  }
  0x26   :  { %s9591_s30 = scalar_lea.hbm %s10089_s5, 7168 }
  0x27   :  { %p9592_p2 = scmp.ne.s32.totalorder %s10089_s5, %s9591_s30  ;;  %p9595_p3 = scmp.lt.u32.totalorder %s9591_s30, %s10089_s5 }
  0x29   :  { %p9597_p4 = pnand %p9595_p3, %p9592_p2 }
  0x2b   :  { %9600 = shalt.err (!%p9597_p4)
}
  0x2c   :  { %s9601_s14 = scalar_lea.vmem %s77_s18, 7168  ;;  %p9606_p6 = scmp.lt.s32.totalorder %s77_s18, %s77_s18 }
  0x2d   :  { %p9602_p5 = scmp.ne.s32.totalorder %s77_s18, %s9601_s14  ;;  %p9607_p7 = scmp.lt.s32.totalorder %s9601_s14, %s9601_s14 }
  0x2f   :  { %p9608_p8 = por %p9607_p7, %p9606_p6 }
  0x31   :  { %p9609_p9 = pnand %p9608_p8, %p9602_p5 }
  0x33   :  { %9612 = shalt.err (!%p9609_p9)
}
  0x34   :  { %s9738_s3 = smov 64   ;;  %s9739_s11 = smov 4  }
  0x35   :  { %82 = dma.hbm_to_vmem [thread:$0]  %s10089_s5, 7168, %s77_s18, [#allocation12], %s9738_s3, %s9738_s3, %s9739_s11  }
  0x36   :  { %s9740_s16 = smov [#allocation2]   ;;  %s9741_s19 = smov [#allocation7]  }
  0x37   :  { %s23_s17 = sshll.u32 %s9740_s16, 4  ;;  %s45_s20 = sshll.u32 %s9741_s19, 4  ;;  %s24_s17 = int_to_ptr.vmem [resolvable:$true] %s23_s17  ;;  %s46_s20 = int_to_ptr.vmem [resolvable:$true] %s45_s20 }
  0x38   :  { %s9613_s23 = scalar_lea.hbm %s10084_s0, 448 }
  0x39   :  { %p9614_p10 = scmp.ne.s32.totalorder %s10084_s0, %s9613_s23  ;;  %p9617_p11 = scmp.lt.u32.totalorder %s9613_s23, %s10084_s0 }
  0x3b   :  { %p9619_p12 = pnand %p9617_p11, %p9614_p10 }
  0x3d   :  { %9622 = shalt.err (!%p9619_p12)
}
  0x3e   :  { %s9623_s5 = scalar_lea.vmem %s24_s17, 448  ;;  %p9628_p0 = scmp.lt.s32.totalorder %s24_s17, %s24_s17 }
  0x3f   :  { %p9624_p13 = scmp.ne.s32.totalorder %s24_s17, %s9623_s5  ;;  %p9629_p1 = scmp.lt.s32.totalorder %s9623_s5, %s9623_s5 }
  0x41   :  { %p9630_p2 = por %p9629_p1, %p9628_p0 }
  0x43   :  { %p9631_p3 = pnand %p9630_p2, %p9624_p13 }
  0x45   :  { %9634 = shalt.err (!%p9631_p3)
}
  0x46   :  { %26 = dma.hbm_to_vmem [thread:$0]  %s10084_s0, 448, %s24_s17, [#allocation3]  }
  0x47   :  { %s9635_s30 = scalar_lea.hbm %s10086_s2, 112 }
  0x48   :  { %p9636_p4 = scmp.ne.s32.totalorder %s10086_s2, %s9635_s30  ;;  %p9639_p5 = scmp.lt.u32.totalorder %s9635_s30, %s10086_s2 }
  0x4a   :  { %p9641_p6 = pnand %p9639_p5, %p9636_p4 }
  0x4c   :  { %9644 = shalt.err (!%p9641_p6)
}
  0x4d   :  { %s9645_s14 = scalar_lea.vmem %s46_s20, 112  ;;  %s9649_s3 = scalar_lea.vmem %s46_s20, 128 }
  0x4e   :  { %p9646_p7 = scmp.ne.s32.totalorder %s46_s20, %s9645_s14  ;;  %p9650_p8 = scmp.lt.s32.totalorder %s46_s20, %s46_s20 }
  0x4f   :  { %p9651_p9 = scmp.lt.s32.totalorder %s9649_s3, %s9645_s14 }
  0x51   :  { %p9652_p10 = por %p9651_p9, %p9650_p8 }
  0x53   :  { %p9653_p11 = pnand %p9652_p10, %p9646_p7 }
  0x55   :  { %9656 = shalt.err (!%p9653_p11)
}
  0x56   :  { %48 = dma.hbm_to_vmem [thread:$0]  %s10086_s2, 112, %s46_s20, [#allocation6]  }
  0x57   :  { %s9742_s12 = smov [#allocation10]   ;;  %s9743_s16 = smov [#allocation13]  }
  0x58   :  { %s67_s15 = sshll.u32 %s9742_s12, 4  ;;  %s89_s17 = sshll.u32 %s9743_s16, 4  ;;  %s68_s15 = int_to_ptr.vmem [resolvable:$true] %s67_s15  ;;  %s90_s17 = int_to_ptr.vmem [resolvable:$true] %s89_s17 }
  0x59   :  { %s9657_s22 = scalar_lea.hbm %s10088_s4, 112 }
  0x5a   :  { %p9658_p12 = scmp.ne.s32.totalorder %s10088_s4, %s9657_s22  ;;  %p9661_p13 = scmp.lt.u32.totalorder %s9657_s22, %s10088_s4 }
  0x5c   :  { %p9663_p0 = pnand %p9661_p13, %p9658_p12 }
  0x5e   :  { %9666 = shalt.err (!%p9663_p0)
}
  0x5f   :  { %s9667_s2 = scalar_lea.vmem %s68_s15, 112  ;;  %s9671_s20 = scalar_lea.vmem %s68_s15, 128 }
  0x60   :  { %p9668_p1 = scmp.ne.s32.totalorder %s68_s15, %s9667_s2  ;;  %p9672_p2 = scmp.lt.s32.totalorder %s68_s15, %s68_s15 }
  0x61   :  { %p9673_p3 = scmp.lt.s32.totalorder %s9671_s20, %s9667_s2 }
  0x63   :  { %p9674_p4 = por %p9673_p3, %p9672_p2 }
  0x65   :  { %p9675_p5 = pnand %p9674_p4, %p9668_p1 }
  0x67   :  { %9678 = shalt.err (!%p9675_p5)
}
  0x68   :  { %70 = dma.hbm_to_vmem [thread:$0]  %s10088_s4, 112, %s68_s15, [#allocation9]  }
  0x69   :  { %s9679_s28 = scalar_lea.hbm %s10090_s6, 16 }
  0x6a   :  { %p9680_p6 = scmp.ne.s32.totalorder %s10090_s6, %s9679_s28  ;;  %p9683_p7 = scmp.lt.u32.totalorder %s9679_s28, %s10090_s6 }
  0x6c   :  { %p9685_p8 = pnand %p9683_p7, %p9680_p6 }
  0x6e   :  { %9688 = shalt.err (!%p9685_p8)
}
  0x6f   :  { %s9689_s10 = scalar_lea.vmem %s90_s17, 16  ;;  %s9693_s13 = scalar_lea.vmem %s90_s17, 32 }
  0x70   :  { %p9690_p9 = scmp.ne.s32.totalorder %s90_s17, %s9689_s10  ;;  %p9694_p10 = scmp.lt.s32.totalorder %s90_s17, %s90_s17 }
  0x71   :  { %p9695_p11 = scmp.lt.s32.totalorder %s9693_s13, %s9689_s10 }
  0x73   :  { %p9696_p12 = por %p9695_p11, %p9694_p10 }
  0x75   :  { %p9697_p13 = pnand %p9696_p12, %p9690_p9 }
  0x77   :  { %9700 = shalt.err (!%p9697_p13)
}
  0x78   :  { %92 = dma.hbm_to_vmem [thread:$0]  %s10090_s6, 16, %s90_s17, [#allocation12]  }
  0x79   :  { %9723 = dma.done.wait [#allocation3], 448  }
  0x7a   :  { %9724 = vsyncadd [#allocation3], 4294966848 }
  0x7b   :  { %9725 = dma.done.wait [#allocation6], 50288  }
  0x7c   :  { %9726 = vsyncadd [#allocation6], 4294917008 }
  0x7d   :  { %9727 = dma.done.wait [#allocation9], 50288  }
  0x7e   :  { %9728 = vsyncadd [#allocation9], 4294917008 }
  0x7f   :  { %9729 = dma.done.wait [#allocation12], 7184  }
  0x80   :  { %9730 = vsyncadd [#allocation12], 4294960112  ;;  %v8358_v0 = vld [vmem:[#allocation5 + $0x4] ss:$28 sps:$4 sm:$0xff]   ;;  %v8360_v1 = vld [vmem:[#allocation5 + $0xc] ss:$28 sps:$4 sm:$0xff]  }
  0x81   :  { %2645 = vmatprep.subr.bf16.mxu0 %v8358_v0  ;;  %v8362_v2 = vld [vmem:[#allocation5] ss:$28 sps:$4 sm:$0xff]   ;;  %v8363_v3 = vld [vmem:[#allocation5 + $0x8] ss:$28 sps:$4 sm:$0xff]   ;;  %2809 = vmatprep.subr.bf16.mxu1 %v8360_v1  ;;  %v8368_v6 = vld [vmem:[#allocation5 + $0x38] ss:$28 sps:$4 sm:$0xff]  }
  0x82   :  { %v8364_v4 = vld [vmem:[#allocation5 + $0x3c] ss:$28 sps:$4 sm:$0xff]   ;;  %2646 = vmatpush1.bf16.msra.mxu0 %v8362_v2  ;;  %2810 = vmatpush1.bf16.msra.mxu1 %v8363_v3  ;;  %v8366_v5 = vld [vmem:[#allocation5 + $0x44] ss:$28 sps:$4 sm:$0xff]   ;;  %v8370_v8 = vld [vmem:[#allocation5 + $0x74] ss:$28 sps:$4 sm:$0xff]  }
  0x83   :  { %2647 = vmatprep.subr.bf16.mxu0 %v8364_v4  ;;  %v8369_v7 = vld [vmem:[#allocation5 + $0x40] ss:$28 sps:$4 sm:$0xff]   ;;  %2811 = vmatprep.subr.bf16.mxu1 %v8366_v5  ;;  %v8374_v10 = vld [vmem:[#allocation5 + $0x70] ss:$28 sps:$4 sm:$0xff]   ;;  %v8375_v11 = vld [vmem:[#allocation5 + $0x78] ss:$28 sps:$4 sm:$0xff]  }
  0x84   :  { %v8372_v9 = vld [vmem:[#allocation5 + $0x7c] ss:$28 sps:$4 sm:$0xff]   ;;  %v8376_v12 = vld [vmem:[#allocation5 + $0xac] ss:$28 sps:$4 sm:$0xff]   ;;  %v8378_v13 = vld [vmem:[#allocation5 + $0xb4] ss:$28 sps:$4 sm:$0xff]  }
  0x85   :  { %v8380_v14 = vld [vmem:[#allocation5 + $0xa8] ss:$28 sps:$4 sm:$0xff]   ;;  %v8381_v15 = vld [vmem:[#allocation5 + $0xb0] ss:$28 sps:$4 sm:$0xff]   ;;  %v8386_v18 = vld [vmem:[#allocation5 + $0xe0] ss:$28 sps:$4 sm:$0xff]  }
  0x86   :  { %2648 = vmatpush1.bf16.msra.mxu0 %v8368_v6  ;;  %2812 = vmatpush1.bf16.msra.mxu1 %v8369_v7  ;;  %v8382_v16 = vld [vmem:[#allocation5 + $0xe4] ss:$28 sps:$4 sm:$0xff]   ;;  %v8384_v17 = vld [vmem:[#allocation5 + $0xec] ss:$28 sps:$4 sm:$0xff]   ;;  %v8388_v20 = vld [vmem:[#allocation5 + $0x11c] ss:$28 sps:$4 sm:$0xff]  }
  0x87   :  { %2649 = vmatprep.subr.bf16.mxu0 %v8370_v8  ;;  %2813 = vmatprep.subr.bf16.mxu1 %v8372_v9  ;;  %v8387_v19 = vld [vmem:[#allocation5 + $0xe8] ss:$28 sps:$4 sm:$0xff]   ;;  %v8392_v22 = vld [vmem:[#allocation5 + $0x118] ss:$28 sps:$4 sm:$0xff]   ;;  %v8393_v23 = vld [vmem:[#allocation5 + $0x120] ss:$28 sps:$4 sm:$0xff]  }
  0x88   :  { %v8390_v21 = vld [vmem:[#allocation5 + $0x124] ss:$28 sps:$4 sm:$0xff]   ;;  %v8394_v24 = vld [vmem:[#allocation5 + $0x154] ss:$28 sps:$4 sm:$0xff]   ;;  %v8396_v25 = vld [vmem:[#allocation5 + $0x15c] ss:$28 sps:$4 sm:$0xff]  }
  0x89   :  { %v8398_v26 = vld [vmem:[#allocation5 + $0x150] ss:$28 sps:$4 sm:$0xff]   ;;  %v8399_v27 = vld [vmem:[#allocation5 + $0x158] ss:$28 sps:$4 sm:$0xff]   ;;  %v8404_v30 = vld [vmem:[#allocation5 + $0x188] ss:$28 sps:$4 sm:$0xff]  }
  0x8a   :  { %2650 = vmatpush1.bf16.msra.mxu0 %v8374_v10  ;;  %2814 = vmatpush1.bf16.msra.mxu1 %v8375_v11  ;;  %v8400_v28 = vld [vmem:[#allocation5 + $0x18c] ss:$28 sps:$4 sm:$0xff]   ;;  %v8402_v29 = vld [vmem:[#allocation5 + $0x194] ss:$28 sps:$4 sm:$0xff]   ;;  %v8406_v32 = vld [vmem:[#allocation5 + $0x1c4] ss:$28 sps:$4 sm:$0xff]  }
  0x8b   :  { %2651 = vmatprep.subr.bf16.mxu0 %v8376_v12  ;;  %2815 = vmatprep.subr.bf16.mxu1 %v8378_v13  ;;  %v8405_v31 = vld [vmem:[#allocation5 + $0x190] ss:$28 sps:$4 sm:$0xff]   ;;  %v8410_v34 = vld [vmem:[#allocation5 + $0x1c0] ss:$28 sps:$4 sm:$0xff]   ;;  %v8411_v35 = vld [vmem:[#allocation5 + $0x1c8] ss:$28 sps:$4 sm:$0xff]  }
  0x8c   :  { %v8408_v33 = vld [vmem:[#allocation5 + $0x1cc] ss:$28 sps:$4 sm:$0xff]   ;;  %v8412_v36 = vld [vmem:[#allocation5 + $0x1fc] ss:$28 sps:$4 sm:$0xff]   ;;  %v8414_v37 = vld [vmem:[#allocation5 + $0x204] ss:$28 sps:$4 sm:$0xff]  }
  0x8d   :  { %v8416_v38 = vld [vmem:[#allocation5 + $0x1f8] ss:$28 sps:$4 sm:$0xff]   ;;  %v8417_v39 = vld [vmem:[#allocation5 + $0x200] ss:$28 sps:$4 sm:$0xff]   ;;  %v8422_v42 = vld [vmem:[#allocation5 + $0x230] ss:$28 sps:$4 sm:$0xff]  }
  0x8e   :  { %2652 = vmatpush1.bf16.msra.mxu0 %v8380_v14  ;;  %2816 = vmatpush1.bf16.msra.mxu1 %v8381_v15  ;;  %v8418_v40 = vld [vmem:[#allocation5 + $0x234] ss:$28 sps:$4 sm:$0xff]   ;;  %v8420_v41 = vld [vmem:[#allocation5 + $0x23c] ss:$28 sps:$4 sm:$0xff]   ;;  %v8424_v44 = vld [vmem:[#allocation5 + $0x26c] ss:$28 sps:$4 sm:$0xff]  }
  0x8f   :  { %2653 = vmatprep.subr.bf16.mxu0 %v8382_v16  ;;  %2817 = vmatprep.subr.bf16.mxu1 %v8384_v17  ;;  %v8423_v43 = vld [vmem:[#allocation5 + $0x238] ss:$28 sps:$4 sm:$0xff]   ;;  %v115_v46 = vld [vmem:[#allocation2] sm:$0xff]  ;;  %v8429_v49 = vld [vmem:[#allocation5 + $0x270] ss:$28 sps:$4 sm:$0xff]   ;;  %vm9746_vm0 = vmmov 0  }
  0x90   :  { %v8426_v45 = vld [vmem:[#allocation5 + $0x274] ss:$28 sps:$4 sm:$0xff]   ;;  %v8428_v47 = vld [vmem:[#allocation5 + $0x268] ss:$28 sps:$4 sm:$0xff]   ;;  %v9872_v48 = vcombine.high %v115_v46, %v115_v46  ;;  %v8434_v52 = vld [vmem:[#allocation5 + $0x2a0] ss:$28 sps:$4 sm:$0xff]   ;;  %v9876_v5 = vcombine.low %v115_v46, %v115_v46 }
  0x91   :  { %v8430_v50 = vld [vmem:[#allocation5 + $0x2a4] ss:$28 sps:$4 sm:$0xff]   ;;  %v8432_v51 = vld [vmem:[#allocation5 + $0x2ac] ss:$28 sps:$4 sm:$0xff]   ;;  %v8436_v54 = vld [vmem:[#allocation5 + $0x2dc] ss:$28 sps:$4 sm:$0xff]  }
  0x92   :  { %2654 = vmatpush1.bf16.msra.mxu0 %v8386_v18  ;;  %2818 = vmatpush1.bf16.msra.mxu1 %v8387_v19  ;;  %v8435_v53 = vld [vmem:[#allocation5 + $0x2a8] ss:$28 sps:$4 sm:$0xff]   ;;  %v8440_v56 = vld [vmem:[#allocation5 + $0x2d8] ss:$28 sps:$4 sm:$0xff]   ;;  %v8441_v57 = vld [vmem:[#allocation5 + $0x2e0] ss:$28 sps:$4 sm:$0xff]  }
  0x93   :  { %2655 = vmatprep.subr.bf16.mxu0 %v8388_v20  ;;  %2819 = vmatprep.subr.bf16.mxu1 %v8390_v21  ;;  %v8438_v55 = vld [vmem:[#allocation5 + $0x2e4] ss:$28 sps:$4 sm:$0xff]   ;;  %v8442_v58 = vld [vmem:[#allocation5 + $0x314] ss:$28 sps:$4 sm:$0xff]   ;;  %v8444_v59 = vld [vmem:[#allocation5 + $0x31c] ss:$28 sps:$4 sm:$0xff]  }
  0x94   :  { %2677 = vmatprep.mubr.bf16.mxu0 %v9872_v48  ;;  %2841 = vmatprep.mubr.bf16.mxu1 %v9872_v48  ;;  %v8446_v60 = vld [vmem:[#allocation5 + $0x310] ss:$28 sps:$4 sm:$0xff]   ;;  %v8447_v61 = vld [vmem:[#allocation5 + $0x318] ss:$28 sps:$4 sm:$0xff]   ;;  %v8452_v0 = vld [vmem:[#allocation5 + $0x348] ss:$28 sps:$4 sm:$0xff]  }
  0x95   :  { %v8448_v62 = vld [vmem:[#allocation5 + $0x34c] ss:$28 sps:$4 sm:$0xff]   ;;  %v8450_v63 = vld [vmem:[#allocation5 + $0x354] ss:$28 sps:$4 sm:$0xff]   ;;  %v8457_v2 = vld [vmem:[#allocation5 + $0x384] ss:$28 sps:$4 sm:$0xff]  }
  0x96   :  { %2656 = vmatpush1.bf16.msra.mxu0 %v8392_v22  ;;  %2820 = vmatpush1.bf16.msra.mxu1 %v8393_v23  ;;  %v8453_v1 = vld [vmem:[#allocation5 + $0x350] ss:$28 sps:$4 sm:$0xff]   ;;  %v8455_v4 = vld [vmem:[#allocation5 + $0x380] ss:$28 sps:$4 sm:$0xff]   ;;  %v8458_v6 = vld [vmem:[#allocation5 + $0x388] ss:$28 sps:$4 sm:$0xff]  }
  0x97   :  { %2657 = vmatprep.subr.bf16.mxu0 %v8394_v24  ;;  %2821 = vmatprep.subr.bf16.mxu1 %v8396_v25  ;;  %v8460_v3 = vld [vmem:[#allocation5 + $0x38c] ss:$28 sps:$4 sm:$0xff]   ;;  %v8464_v7 = vld [vmem:[#allocation5 + $0x3bc] ss:$28 sps:$4 sm:$0xff]   ;;  %v8467_v8 = vld [vmem:[#allocation5 + $0x3c4] ss:$28 sps:$4 sm:$0xff]  }
  0x98   :  { %v8462_v9 = vld [vmem:[#allocation5 + $0x3b8] ss:$28 sps:$4 sm:$0xff]   ;;  %v8465_v10 = vld [vmem:[#allocation5 + $0x3c0] ss:$28 sps:$4 sm:$0xff]   ;;  %v8468_v13 = vld [vmem:[#allocation5 + $0x3f0] ss:$28 sps:$4 sm:$0xff]  }
  0x99   :  { %v8470_v11 = vld [vmem:[#allocation5 + $0x3f4] ss:$28 sps:$4 sm:$0xff]   ;;  %v8473_v12 = vld [vmem:[#allocation5 + $0x3fc] ss:$28 sps:$4 sm:$0xff]   ;;  %v8476_v15 = vld [vmem:[#allocation5 + $0x42c] ss:$28 sps:$4 sm:$0xff]  }
  0x9a   :  { %2658 = vmatpush1.bf16.msra.mxu0 %v8398_v26  ;;  %2822 = vmatpush1.bf16.msra.mxu1 %v8399_v27  ;;  %v8471_v14 = vld [vmem:[#allocation5 + $0x3f8] ss:$28 sps:$4 sm:$0xff]   ;;  %v8474_v17 = vld [vmem:[#allocation5 + $0x428] ss:$28 sps:$4 sm:$0xff]   ;;  %v8477_v18 = vld [vmem:[#allocation5 + $0x430] ss:$28 sps:$4 sm:$0xff]  }
  0x9b   :  { %2659 = vmatprep.subr.bf16.mxu0 %v8400_v28  ;;  %2823 = vmatprep.subr.bf16.mxu1 %v8402_v29  ;;  %v8479_v16 = vld [vmem:[#allocation5 + $0x434] ss:$28 sps:$4 sm:$0xff]   ;;  %v8482_v19 = vld [vmem:[#allocation5 + $0x464] ss:$28 sps:$4 sm:$0xff]   ;;  %v8485_v20 = vld [vmem:[#allocation5 + $0x46c] ss:$28 sps:$4 sm:$0xff]  }
  0x9c   :  { %v8480_v21 = vld [vmem:[#allocation5 + $0x460] ss:$28 sps:$4 sm:$0xff]   ;;  %v8483_v22 = vld [vmem:[#allocation5 + $0x468] ss:$28 sps:$4 sm:$0xff]   ;;  %v8486_v25 = vld [vmem:[#allocation5 + $0x498] ss:$28 sps:$4 sm:$0xff]  }
  0x9d   :  { %v8488_v23 = vld [vmem:[#allocation5 + $0x49c] ss:$28 sps:$4 sm:$0xff]   ;;  %v8491_v24 = vld [vmem:[#allocation5 + $0x4a4] ss:$28 sps:$4 sm:$0xff]   ;;  %v8494_v27 = vld [vmem:[#allocation5 + $0x4d4] ss:$28 sps:$4 sm:$0xff]  }
  0x9e   :  { %2660 = vmatpush1.bf16.msra.mxu0 %v8404_v30  ;;  %2824 = vmatpush1.bf16.msra.mxu1 %v8405_v31  ;;  %v8489_v26 = vld [vmem:[#allocation5 + $0x4a0] ss:$28 sps:$4 sm:$0xff]   ;;  %v9880_v29 = vld [vmem:[#allocation2 + $0x8] sm:$0xff]  ;;  %s9747_s6 = smov [#allocation14]  }
  0x9f   :  { %2661 = vmatprep.subr.bf16.mxu0 %v8406_v32  ;;  %2825 = vmatprep.subr.bf16.mxu1 %v8408_v33  ;;  %v8497_v28 = vld [vmem:[#allocation5 + $0x4dc] ss:$28 sps:$4 sm:$0xff]   ;;  %v9884_v30 = vcombine.high %v9880_v29, %v9880_v29  ;;  %v8492_v31 = vld [vmem:[#allocation5 + $0x4d0] ss:$28 sps:$4 sm:$0xff]   ;;  %s7114_s3 = sshll.u32 %s9747_s6, 4  ;;  %s7115_s3 = int_to_ptr.vmem [resolvable:$true] %s7114_s3 }
  0xa0   :  { %v8495_v32 = vld [vmem:[#allocation5 + $0x4d8] ss:$28 sps:$4 sm:$0xff]   ;;  %v8500_v33 = vld [vmem:[#allocation5 + $0x50c] ss:$28 sps:$4 sm:$0xff]   ;;  %s9701_s0 = scalar_lea.vmem %s7115_s3, 128  ;;  %p9706_p1 = scmp.lt.s32.totalorder %s7115_s3, %s7115_s3 }
  0xa1   :  { %v8521_v46 = vld [vmem:[#allocation5 + $0x5bc] ss:$28 sps:$4 sm:$0xff]   ;;  %p9702_p0 = scmp.ne.s32.totalorder %s7115_s3, %s9701_s0  ;;  %p9707_p2 = scmp.lt.s32.totalorder %s9701_s0, %s9701_s0 }
  0xa2   :  { %2662 = vmatpush1.bf16.msra.mxu0 %v8410_v34  ;;  %2826 = vmatpush1.bf16.msra.mxu1 %v8411_v35  ;;  %v8503_v34 = vld [vmem:[#allocation5 + $0x514] ss:$28 sps:$4 sm:$0xff]   ;;  %v8498_v35 = vld [vmem:[#allocation5 + $0x508] ss:$28 sps:$4 sm:$0xff]  }
  0xa3   :  { %2663 = vmatprep.subr.bf16.mxu0 %v8412_v36  ;;  %2827 = vmatprep.subr.bf16.mxu1 %v8414_v37  ;;  %v8501_v36 = vld [vmem:[#allocation5 + $0x510] ss:$28 sps:$4 sm:$0xff]   ;;  %v8506_v37 = vld [vmem:[#allocation5 + $0x544] ss:$28 sps:$4 sm:$0xff]   ;;  %p9708_p3 = por %p9707_p2, %p9706_p1 }
  0xa5   :  { %p9709_p4 = pnand %p9708_p3, %p9702_p0 }
  0xa6   :  { %2664 = vmatpush1.bf16.msra.mxu0 %v8416_v38  ;;  %2828 = vmatpush1.bf16.msra.mxu1 %v8417_v39  ;;  %v8509_v38 = vld [vmem:[#allocation5 + $0x54c] ss:$28 sps:$4 sm:$0xff]   ;;  %v8504_v39 = vld [vmem:[#allocation5 + $0x540] ss:$28 sps:$4 sm:$0xff]  }
  0xa7   :  { %2665 = vmatprep.subr.bf16.mxu0 %v8418_v40  ;;  %2829 = vmatprep.subr.bf16.mxu1 %v8420_v41  ;;  %v8507_v40 = vld [vmem:[#allocation5 + $0x548] ss:$28 sps:$4 sm:$0xff]   ;;  %v8512_v41 = vld [vmem:[#allocation5 + $0x57c] ss:$28 sps:$4 sm:$0xff]  }
  0xaa   :  { %2666 = vmatpush1.bf16.msra.mxu0 %v8422_v42  ;;  %2830 = vmatpush1.bf16.msra.mxu1 %v8423_v43  ;;  %v8515_v42 = vld [vmem:[#allocation5 + $0x584] ss:$28 sps:$4 sm:$0xff]   ;;  %v8510_v43 = vld [vmem:[#allocation5 + $0x578] ss:$28 sps:$4 sm:$0xff]  }
  0xab   :  { %2667 = vmatprep.subr.bf16.mxu0 %v8424_v44  ;;  %2831 = vmatprep.subr.bf16.mxu1 %v8426_v45  ;;  %v8513_v44 = vld [vmem:[#allocation5 + $0x580] ss:$28 sps:$4 sm:$0xff]   ;;  %v8518_v45 = vld [vmem:[#allocation5 + $0x5b4] ss:$28 sps:$4 sm:$0xff]  }
  0xae   :  { %2668 = vmatpush1.bf16.msra.mxu0 %v8428_v47  ;;  %2832 = vmatpush1.bf16.msra.mxu1 %v8429_v49  ;;  %v8516_v47 = vld [vmem:[#allocation5 + $0x5b0] ss:$28 sps:$4 sm:$0xff]   ;;  %v8519_v49 = vld [vmem:[#allocation5 + $0x5b8] ss:$28 sps:$4 sm:$0xff]  }
  0xaf   :  { %2669 = vmatprep.subr.bf16.mxu0 %v8430_v50  ;;  %2833 = vmatprep.subr.bf16.mxu1 %v8432_v51  ;;  %v8524_v50 = vld [vmem:[#allocation5 + $0x5ec] ss:$28 sps:$4 sm:$0xff]   ;;  %v8527_v51 = vld [vmem:[#allocation5 + $0x5f4] ss:$28 sps:$4 sm:$0xff]  }
  0xb2   :  { %2670 = vmatpush1.bf16.msra.mxu0 %v8434_v52  ;;  %2834 = vmatpush1.bf16.msra.mxu1 %v8435_v53  ;;  %v8522_v52 = vld [vmem:[#allocation5 + $0x5e8] ss:$28 sps:$4 sm:$0xff]   ;;  %v8525_v53 = vld [vmem:[#allocation5 + $0x5f0] ss:$28 sps:$4 sm:$0xff]  }
  0xb3   :  { %2671 = vmatprep.subr.bf16.mxu0 %v8436_v54  ;;  %2835 = vmatprep.subr.bf16.mxu1 %v8438_v55  ;;  %v8530_v54 = vld [vmem:[#allocation5 + $0x624] ss:$28 sps:$4 sm:$0xff]   ;;  %v8533_v55 = vld [vmem:[#allocation5 + $0x62c] ss:$28 sps:$4 sm:$0xff]  }
  0xb6   :  { %2672 = vmatpush1.bf16.msra.mxu0 %v8440_v56  ;;  %2836 = vmatpush1.bf16.msra.mxu1 %v8441_v57  ;;  %v8528_v56 = vld [vmem:[#allocation5 + $0x620] ss:$28 sps:$4 sm:$0xff]   ;;  %v8531_v57 = vld [vmem:[#allocation5 + $0x628] ss:$28 sps:$4 sm:$0xff]  }
  0xb7   :  { %2673 = vmatprep.subr.bf16.mxu0 %v8442_v58  ;;  %2837 = vmatprep.subr.bf16.mxu1 %v8444_v59  ;;  %v8536_v58 = vld [vmem:[#allocation5 + $0x65c] ss:$28 sps:$4 sm:$0xff]   ;;  %v8539_v59 = vld [vmem:[#allocation5 + $0x664] ss:$28 sps:$4 sm:$0xff]  }
  0xba   :  { %2674 = vmatpush1.bf16.msra.mxu0 %v8446_v60  ;;  %2838 = vmatpush1.bf16.msra.mxu1 %v8447_v61  ;;  %v8534_v60 = vld [vmem:[#allocation5 + $0x658] ss:$28 sps:$4 sm:$0xff]   ;;  %v8537_v61 = vld [vmem:[#allocation5 + $0x660] ss:$28 sps:$4 sm:$0xff]  }
  0xbb   :  { %2675 = vmatprep.subr.bf16.mxu0 %v8448_v62  ;;  %2839 = vmatprep.subr.bf16.mxu1 %v8450_v63  ;;  %v8542_v62 = vld [vmem:[#allocation5 + $0x694] ss:$28 sps:$4 sm:$0xff]   ;;  %v8545_v63 = vld [vmem:[#allocation5 + $0x69c] ss:$28 sps:$4 sm:$0xff]  }
  0xbe   :  { %2676 = vmatpush1.bf16.msra.mxu0 %v8452_v0  ;;  %2840 = vmatpush1.bf16.msra.mxu1 %v8453_v1  ;;  %v8540_v0 = vld [vmem:[#allocation5 + $0x690] ss:$28 sps:$4 sm:$0xff]   ;;  %v8543_v1 = vld [vmem:[#allocation5 + $0x698] ss:$28 sps:$4 sm:$0xff]  }
  0xbf   :  { %2686 = vmatprep.subr.bf16.mxu0 %v8457_v2  ;;  %2850 = vmatprep.subr.bf16.mxu1 %v8460_v3  ;;  %v8548_v2 = vld [vmem:[#allocation5 + $0x6cc] ss:$28 sps:$4 sm:$0xff]   ;;  %v8551_v3 = vld [vmem:[#allocation5 + $0x6d4] ss:$28 sps:$4 sm:$0xff]  }
  0xc1   :  { %2678 = vmatmul.mubr.bf16.vlgmr.msra.gmra.mrb[0].mxu0 %v9876_v5  ;;  %2842 = vmatmul.mubr.bf16.vlgmr.msra.gmra.mrb[0].mxu1 %v9876_v5 }
  0xc2   :  { %2687 = vmatpush1.bf16.msra.mxu0 %v8455_v4  ;;  %2851 = vmatpush1.bf16.msra.mxu1 %v8458_v6  ;;  %v8546_v4 = vld [vmem:[#allocation5 + $0x6c8] ss:$28 sps:$4 sm:$0xff]   ;;  %v8549_v6 = vld [vmem:[#allocation5 + $0x6d0] ss:$28 sps:$4 sm:$0xff]  }
  0xc3   :  { %2688 = vmatprep.subr.bf16.mxu0 %v8464_v7  ;;  %2852 = vmatprep.subr.bf16.mxu1 %v8467_v8  ;;  %v8555_v7 = vld [vmem:[#allocation5 + $0x704] ss:$28 sps:$4 sm:$0xff]   ;;  %v8558_v8 = vld [vmem:[#allocation5 + $0x70c] ss:$28 sps:$4 sm:$0xff]  }
  0xc4   :  { %2718 = vmatprep.mubr.bf16.mxu0 %v9884_v30  ;;  %2882 = vmatprep.mubr.bf16.mxu1 %v9884_v30 }
  0xc6   :  { %2689 = vmatpush1.bf16.msra.mxu0 %v8462_v9  ;;  %2853 = vmatpush1.bf16.msra.mxu1 %v8465_v10  ;;  %v8553_v9 = vld [vmem:[#allocation5 + $0x700] ss:$28 sps:$4 sm:$0xff]   ;;  %v9890_v10 = vcombine.low %v9880_v29, %v9880_v29  ;;  %v8581_v29 = vld [vmem:[#allocation5 + $0x7e8] ss:$28 sps:$4 sm:$0xff]  }
  0xc7   :  { %2690 = vmatprep.subr.bf16.mxu0 %v8470_v11  ;;  %2854 = vmatprep.subr.bf16.mxu1 %v8473_v12  ;;  %v8556_v11 = vld [vmem:[#allocation5 + $0x708] ss:$28 sps:$4 sm:$0xff]   ;;  %v8562_v12 = vld [vmem:[#allocation5 + $0x73c] ss:$28 sps:$4 sm:$0xff]  }
  0xca   :  { %2691 = vmatpush1.bf16.msra.mxu0 %v8468_v13  ;;  %2855 = vmatpush1.bf16.msra.mxu1 %v8471_v14  ;;  %v9892_v13 = vld [vmem:[#allocation2 + $0x10] sm:$0xff]  ;;  %v8565_v14 = vld [vmem:[#allocation5 + $0x744] ss:$28 sps:$4 sm:$0xff]  }
  0xcb   :  { %2692 = vmatprep.subr.bf16.mxu0 %v8476_v15  ;;  %2856 = vmatprep.subr.bf16.mxu1 %v8479_v16  ;;  %v9896_v15 = vcombine.high %v9892_v13, %v9892_v13  ;;  %v8560_v16 = vld [vmem:[#allocation5 + $0x738] ss:$28 sps:$4 sm:$0xff]  }
  0xce   :  { %2693 = vmatpush1.bf16.msra.mxu0 %v8474_v17  ;;  %2857 = vmatpush1.bf16.msra.mxu1 %v8477_v18  ;;  %v8563_v17 = vld [vmem:[#allocation5 + $0x740] ss:$28 sps:$4 sm:$0xff]   ;;  %v8568_v18 = vld [vmem:[#allocation5 + $0x774] ss:$28 sps:$4 sm:$0xff]  }
  0xcf   :  { %2694 = vmatprep.subr.bf16.mxu0 %v8482_v19  ;;  %2858 = vmatprep.subr.bf16.mxu1 %v8485_v20  ;;  %v8571_v19 = vld [vmem:[#allocation5 + $0x77c] ss:$28 sps:$4 sm:$0xff]   ;;  %v8566_v20 = vld [vmem:[#allocation5 + $0x770] ss:$28 sps:$4 sm:$0xff]  }
  0xd2   :  { %2695 = vmatpush1.bf16.msra.mxu0 %v8480_v21  ;;  %2859 = vmatpush1.bf16.msra.mxu1 %v8483_v22  ;;  %v8569_v21 = vld [vmem:[#allocation5 + $0x778] ss:$28 sps:$4 sm:$0xff]   ;;  %v8574_v22 = vld [vmem:[#allocation5 + $0x7ac] ss:$28 sps:$4 sm:$0xff]  }
  0xd3   :  { %2696 = vmatprep.subr.bf16.mxu0 %v8488_v23  ;;  %2860 = vmatprep.subr.bf16.mxu1 %v8491_v24  ;;  %v8577_v23 = vld [vmem:[#allocation5 + $0x7b4] ss:$28 sps:$4 sm:$0xff]   ;;  %v8572_v24 = vld [vmem:[#allocation5 + $0x7a8] ss:$28 sps:$4 sm:$0xff]  }
  0xd6   :  { %2697 = vmatpush1.bf16.msra.mxu0 %v8486_v25  ;;  %2861 = vmatpush1.bf16.msra.mxu1 %v8489_v26  ;;  %v8575_v25 = vld [vmem:[#allocation5 + $0x7b0] ss:$28 sps:$4 sm:$0xff]   ;;  %v8580_v26 = vld [vmem:[#allocation5 + $0x7e4] ss:$28 sps:$4 sm:$0xff]  }
  0xd7   :  { %2698 = vmatprep.subr.bf16.mxu0 %v8494_v27  ;;  %2862 = vmatprep.subr.bf16.mxu1 %v8497_v28  ;;  %v8583_v27 = vld [vmem:[#allocation5 + $0x7ec] ss:$28 sps:$4 sm:$0xff]   ;;  %v8578_v28 = vld [vmem:[#allocation5 + $0x7e0] ss:$28 sps:$4 sm:$0xff]  }
  0xda   :  { %2699 = vmatpush1.bf16.msra.mxu0 %v8492_v31  ;;  %2863 = vmatpush1.bf16.msra.mxu1 %v8495_v32  ;;  %v8586_v31 = vld [vmem:[#allocation5 + $0x81c] ss:$28 sps:$4 sm:$0xff]   ;;  %v8589_v32 = vld [vmem:[#allocation5 + $0x824] ss:$28 sps:$4 sm:$0xff]  }
  0xdb   :  { %2700 = vmatprep.subr.bf16.mxu0 %v8500_v33  ;;  %2864 = vmatprep.subr.bf16.mxu1 %v8503_v34  ;;  %v8584_v33 = vld [vmem:[#allocation5 + $0x818] ss:$28 sps:$4 sm:$0xff]   ;;  %v8587_v34 = vld [vmem:[#allocation5 + $0x820] ss:$28 sps:$4 sm:$0xff]  }
  0xde   :  { %2701 = vmatpush1.bf16.msra.mxu0 %v8498_v35  ;;  %2865 = vmatpush1.bf16.msra.mxu1 %v8501_v36  ;;  %v8592_v35 = vld [vmem:[#allocation5 + $0x854] ss:$28 sps:$4 sm:$0xff]   ;;  %v8595_v36 = vld [vmem:[#allocation5 + $0x85c] ss:$28 sps:$4 sm:$0xff]  }
  0xdf   :  { %2702 = vmatprep.subr.bf16.mxu0 %v8506_v37  ;;  %2866 = vmatprep.subr.bf16.mxu1 %v8509_v38  ;;  %v8590_v37 = vld [vmem:[#allocation5 + $0x850] ss:$28 sps:$4 sm:$0xff]   ;;  %v8593_v38 = vld [vmem:[#allocation5 + $0x858] ss:$28 sps:$4 sm:$0xff]  }
  0xe2   :  { %2703 = vmatpush1.bf16.msra.mxu0 %v8504_v39  ;;  %2867 = vmatpush1.bf16.msra.mxu1 %v8507_v40  ;;  %v8598_v39 = vld [vmem:[#allocation5 + $0x88c] ss:$28 sps:$4 sm:$0xff]   ;;  %v8601_v40 = vld [vmem:[#allocation5 + $0x894] ss:$28 sps:$4 sm:$0xff]  }
  0xe3   :  { %2704 = vmatprep.subr.bf16.mxu0 %v8512_v41  ;;  %2868 = vmatprep.subr.bf16.mxu1 %v8515_v42  ;;  %v8596_v41 = vld [vmem:[#allocation5 + $0x888] ss:$28 sps:$4 sm:$0xff]   ;;  %v8599_v42 = vld [vmem:[#allocation5 + $0x890] ss:$28 sps:$4 sm:$0xff]  }
  0xe6   :  { %2705 = vmatpush1.bf16.msra.mxu0 %v8510_v43  ;;  %2869 = vmatpush1.bf16.msra.mxu1 %v8513_v44  ;;  %v8604_v43 = vld [vmem:[#allocation5 + $0x8c4] ss:$28 sps:$4 sm:$0xff]   ;;  %v8607_v44 = vld [vmem:[#allocation5 + $0x8cc] ss:$28 sps:$4 sm:$0xff]  }
  0xe7   :  { %2706 = vmatprep.subr.bf16.mxu0 %v8518_v45  ;;  %2870 = vmatprep.subr.bf16.mxu1 %v8521_v46  ;;  %v8602_v45 = vld [vmem:[#allocation5 + $0x8c0] ss:$28 sps:$4 sm:$0xff]   ;;  %v8605_v46 = vld [vmem:[#allocation5 + $0x8c8] ss:$28 sps:$4 sm:$0xff]  }
  0xea   :  { %2707 = vmatpush1.bf16.msra.mxu0 %v8516_v47  ;;  %2871 = vmatpush1.bf16.msra.mxu1 %v8519_v49  ;;  %v8610_v47 = vld [vmem:[#allocation5 + $0x8fc] ss:$28 sps:$4 sm:$0xff]   ;;  %v8613_v49 = vld [vmem:[#allocation5 + $0x904] ss:$28 sps:$4 sm:$0xff]  }
  0xeb   :  { %2708 = vmatprep.subr.bf16.mxu0 %v8524_v50  ;;  %2872 = vmatprep.subr.bf16.mxu1 %v8527_v51  ;;  %v8608_v50 = vld [vmem:[#allocation5 + $0x8f8] ss:$28 sps:$4 sm:$0xff]   ;;  %v8611_v51 = vld [vmem:[#allocation5 + $0x900] ss:$28 sps:$4 sm:$0xff]  }
  0xee   :  { %2709 = vmatpush1.bf16.msra.mxu0 %v8522_v52  ;;  %2873 = vmatpush1.bf16.msra.mxu1 %v8525_v53  ;;  %v8616_v52 = vld [vmem:[#allocation5 + $0x934] ss:$28 sps:$4 sm:$0xff]   ;;  %v8619_v53 = vld [vmem:[#allocation5 + $0x93c] ss:$28 sps:$4 sm:$0xff]  }
  0xef   :  { %2710 = vmatprep.subr.bf16.mxu0 %v8530_v54  ;;  %2874 = vmatprep.subr.bf16.mxu1 %v8533_v55  ;;  %v8614_v54 = vld [vmem:[#allocation5 + $0x930] ss:$28 sps:$4 sm:$0xff]   ;;  %v8617_v55 = vld [vmem:[#allocation5 + $0x938] ss:$28 sps:$4 sm:$0xff]  }
  0xf2   :  { %2711 = vmatpush1.bf16.msra.mxu0 %v8528_v56  ;;  %2875 = vmatpush1.bf16.msra.mxu1 %v8531_v57  ;;  %v8622_v56 = vld [vmem:[#allocation5 + $0x96c] ss:$28 sps:$4 sm:$0xff]   ;;  %v8625_v57 = vld [vmem:[#allocation5 + $0x974] ss:$28 sps:$4 sm:$0xff]  }
  0xf3   :  { %2712 = vmatprep.subr.bf16.mxu0 %v8536_v58  ;;  %2876 = vmatprep.subr.bf16.mxu1 %v8539_v59  ;;  %v8620_v58 = vld [vmem:[#allocation5 + $0x968] ss:$28 sps:$4 sm:$0xff]   ;;  %v8623_v59 = vld [vmem:[#allocation5 + $0x970] ss:$28 sps:$4 sm:$0xff]  }
  0xf6   :  { %2713 = vmatpush1.bf16.msra.mxu0 %v8534_v60  ;;  %2877 = vmatpush1.bf16.msra.mxu1 %v8537_v61  ;;  %v8628_v60 = vld [vmem:[#allocation5 + $0x9a4] ss:$28 sps:$4 sm:$0xff]   ;;  %v8631_v61 = vld [vmem:[#allocation5 + $0x9ac] ss:$28 sps:$4 sm:$0xff]  }
  0xf7   :  { %2714 = vmatprep.subr.bf16.mxu0 %v8542_v62  ;;  %2878 = vmatprep.subr.bf16.mxu1 %v8545_v63  ;;  %v8626_v62 = vld [vmem:[#allocation5 + $0x9a0] ss:$28 sps:$4 sm:$0xff]   ;;  %v8629_v63 = vld [vmem:[#allocation5 + $0x9a8] ss:$28 sps:$4 sm:$0xff]  }
  0xfa   :  { %2715 = vmatpush1.bf16.msra.mxu0 %v8540_v0  ;;  %2879 = vmatpush1.bf16.msra.mxu1 %v8543_v1  ;;  %v8634_v0 = vld [vmem:[#allocation5 + $0x9dc] ss:$28 sps:$4 sm:$0xff]   ;;  %v8637_v1 = vld [vmem:[#allocation5 + $0x9e4] ss:$28 sps:$4 sm:$0xff]  }
  0xfb   :  { %2716 = vmatprep.subr.bf16.mxu0 %v8548_v2  ;;  %2880 = vmatprep.subr.bf16.mxu1 %v8551_v3  ;;  %v8632_v2 = vld [vmem:[#allocation5 + $0x9d8] ss:$28 sps:$4 sm:$0xff]   ;;  %v8635_v3 = vld [vmem:[#allocation5 + $0x9e0] ss:$28 sps:$4 sm:$0xff]  }
  0xfe   :  { %2717 = vmatpush1.bf16.msra.mxu0 %v8546_v4  ;;  %2881 = vmatpush1.bf16.msra.mxu1 %v8549_v6  ;;  %v8640_v4 = vld [vmem:[#allocation5 + $0xa14] ss:$28 sps:$4 sm:$0xff]   ;;  %v8643_v6 = vld [vmem:[#allocation5 + $0xa1c] ss:$28 sps:$4 sm:$0xff]  }
  0xff   :  { %2727 = vmatprep.subr.bf16.mxu0 %v8555_v7  ;;  %2891 = vmatprep.subr.bf16.mxu1 %v8558_v8  ;;  %v8638_v7 = vld [vmem:[#allocation5 + $0xa10] ss:$28 sps:$4 sm:$0xff]   ;;  %v8641_v8 = vld [vmem:[#allocation5 + $0xa18] ss:$28 sps:$4 sm:$0xff]  }
 0x101   :  { %2719 = vmatmul.mubr.bf16.vlgmr.msra.gmra.mrb[0].mxu0 %v9890_v10  ;;  %2883 = vmatmul.mubr.bf16.vlgmr.msra.gmra.mrb[0].mxu1 %v9890_v10 }
 0x102   :  { %2728 = vmatpush1.bf16.msra.mxu0 %v8553_v9  ;;  %2892 = vmatpush1.bf16.msra.mxu1 %v8556_v11  ;;  %v8646_v9 = vld [vmem:[#allocation5 + $0xa4c] ss:$28 sps:$4 sm:$0xff]   ;;  %v8649_v11 = vld [vmem:[#allocation5 + $0xa54] ss:$28 sps:$4 sm:$0xff]  }
 0x103   :  { %2729 = vmatprep.subr.bf16.mxu0 %v8562_v12  ;;  %2893 = vmatprep.subr.bf16.mxu1 %v8565_v14  ;;  %v8644_v12 = vld [vmem:[#allocation5 + $0xa48] ss:$28 sps:$4 sm:$0xff]   ;;  %v8647_v14 = vld [vmem:[#allocation5 + $0xa50] ss:$28 sps:$4 sm:$0xff]  }
 0x104   :  { %2759 = vmatprep.mubr.bf16.mxu0 %v9896_v15  ;;  %2923 = vmatprep.mubr.bf16.mxu1 %v9896_v15 }
 0x106   :  { %2730 = vmatpush1.bf16.msra.mxu0 %v8560_v16  ;;  %2894 = vmatpush1.bf16.msra.mxu1 %v8563_v17  ;;  %v8653_v16 = vld [vmem:[#allocation5 + $0xa84] ss:$28 sps:$4 sm:$0xff]   ;;  %v8656_v17 = vld [vmem:[#allocation5 + $0xa8c] ss:$28 sps:$4 sm:$0xff]  }
 0x107   :  { %2731 = vmatprep.subr.bf16.mxu0 %v8568_v18  ;;  %2895 = vmatprep.subr.bf16.mxu1 %v8571_v19  ;;  %v8651_v18 = vld [vmem:[#allocation5 + $0xa80] ss:$28 sps:$4 sm:$0xff]   ;;  %v9904_v19 = vcombine.low %v9892_v13, %v9892_v13 }
 0x108   :  { %v8669_v13 = vld [vmem:[#allocation5 + $0xafc] ss:$28 sps:$4 sm:$0xff]  }
 0x10a   :  { %2732 = vmatpush1.bf16.msra.mxu0 %v8566_v20  ;;  %2896 = vmatpush1.bf16.msra.mxu1 %v8569_v21  ;;  %v8654_v20 = vld [vmem:[#allocation5 + $0xa88] ss:$28 sps:$4 sm:$0xff]   ;;  %v8660_v21 = vld [vmem:[#allocation5 + $0xabc] ss:$28 sps:$4 sm:$0xff]  }
 0x10b   :  { %2733 = vmatprep.subr.bf16.mxu0 %v8574_v22  ;;  %2897 = vmatprep.subr.bf16.mxu1 %v8577_v23  ;;  %v8663_v22 = vld [vmem:[#allocation5 + $0xac4] ss:$28 sps:$4 sm:$0xff]   ;;  %v8658_v23 = vld [vmem:[#allocation5 + $0xab8] ss:$28 sps:$4 sm:$0xff]  }
 0x10e   :  { %2734 = vmatpush1.bf16.msra.mxu0 %v8572_v24  ;;  %2898 = vmatpush1.bf16.msra.mxu1 %v8575_v25  ;;  %v8661_v24 = vld [vmem:[#allocation5 + $0xac0] ss:$28 sps:$4 sm:$0xff]   ;;  %v8666_v25 = vld [vmem:[#allocation5 + $0xaf4] ss:$28 sps:$4 sm:$0xff]  }
 0x10f   :  { %2735 = vmatprep.subr.bf16.mxu0 %v8580_v26  ;;  %2899 = vmatprep.subr.bf16.mxu1 %v8583_v27  ;;  %v8664_v26 = vld [vmem:[#allocation5 + $0xaf0] ss:$28 sps:$4 sm:$0xff]   ;;  %v9744_v27 = vmov 0  }
 0x112   :  { %2736 = vmatpush1.bf16.msra.mxu0 %v8578_v28  ;;  %2900 = vmatpush1.bf16.msra.mxu1 %v8581_v29  ;;  %v8667_v28 = vld [vmem:[#allocation5 + $0xaf8] ss:$28 sps:$4 sm:$0xff]   ;;  %v8672_v29 = vld [vmem:[#allocation5 + $0xb2c] ss:$28 sps:$4 sm:$0xff]  }
 0x113   :  { %2737 = vmatprep.subr.bf16.mxu0 %v8586_v31  ;;  %2901 = vmatprep.subr.bf16.mxu1 %v8589_v32  ;;  %v8675_v31 = vld [vmem:[#allocation5 + $0xb34] ss:$28 sps:$4 sm:$0xff]   ;;  %v8670_v32 = vld [vmem:[#allocation5 + $0xb28] ss:$28 sps:$4 sm:$0xff]  }
 0x116   :  { %2738 = vmatpush1.bf16.msra.mxu0 %v8584_v33  ;;  %2902 = vmatpush1.bf16.msra.mxu1 %v8587_v34  ;;  %v8673_v33 = vld [vmem:[#allocation5 + $0xb30] ss:$28 sps:$4 sm:$0xff]   ;;  %v8678_v34 = vld [vmem:[#allocation5 + $0xb64] ss:$28 sps:$4 sm:$0xff]  }
 0x117   :  { %2739 = vmatprep.subr.bf16.mxu0 %v8592_v35  ;;  %2903 = vmatprep.subr.bf16.mxu1 %v8595_v36  ;;  %v8681_v35 = vld [vmem:[#allocation5 + $0xb6c] ss:$28 sps:$4 sm:$0xff]   ;;  %v8676_v36 = vld [vmem:[#allocation5 + $0xb60] ss:$28 sps:$4 sm:$0xff]  }
 0x11a   :  { %2740 = vmatpush1.bf16.msra.mxu0 %v8590_v37  ;;  %2904 = vmatpush1.bf16.msra.mxu1 %v8593_v38  ;;  %v8679_v37 = vld [vmem:[#allocation5 + $0xb68] ss:$28 sps:$4 sm:$0xff]   ;;  %v8684_v38 = vld [vmem:[#allocation5 + $0xb9c] ss:$28 sps:$4 sm:$0xff]  }
 0x11b   :  { %2741 = vmatprep.subr.bf16.mxu0 %v8598_v39  ;;  %2905 = vmatprep.subr.bf16.mxu1 %v8601_v40  ;;  %v8687_v39 = vld [vmem:[#allocation5 + $0xba4] ss:$28 sps:$4 sm:$0xff]   ;;  %v8682_v40 = vld [vmem:[#allocation5 + $0xb98] ss:$28 sps:$4 sm:$0xff]  }
 0x11e   :  { %2742 = vmatpush1.bf16.msra.mxu0 %v8596_v41  ;;  %2906 = vmatpush1.bf16.msra.mxu1 %v8599_v42  ;;  %v8685_v41 = vld [vmem:[#allocation5 + $0xba0] ss:$28 sps:$4 sm:$0xff]   ;;  %v8690_v42 = vld [vmem:[#allocation5 + $0xbd4] ss:$28 sps:$4 sm:$0xff]  }
 0x11f   :  { %2743 = vmatprep.subr.bf16.mxu0 %v8604_v43  ;;  %2907 = vmatprep.subr.bf16.mxu1 %v8607_v44  ;;  %v8693_v43 = vld [vmem:[#allocation5 + $0xbdc] ss:$28 sps:$4 sm:$0xff]   ;;  %v8688_v44 = vld [vmem:[#allocation5 + $0xbd0] ss:$28 sps:$4 sm:$0xff]  }
 0x122   :  { %2744 = vmatpush1.bf16.msra.mxu0 %v8602_v45  ;;  %2908 = vmatpush1.bf16.msra.mxu1 %v8605_v46  ;;  %v8691_v45 = vld [vmem:[#allocation5 + $0xbd8] ss:$28 sps:$4 sm:$0xff]   ;;  %v8696_v46 = vld [vmem:[#allocation5 + $0xc0c] ss:$28 sps:$4 sm:$0xff]  }
 0x123   :  { %2745 = vmatprep.subr.bf16.mxu0 %v8610_v47  ;;  %2909 = vmatprep.subr.bf16.mxu1 %v8613_v49  ;;  %v8699_v47 = vld [vmem:[#allocation5 + $0xc14] ss:$28 sps:$4 sm:$0xff]   ;;  %v8694_v49 = vld [vmem:[#allocation5 + $0xc08] ss:$28 sps:$4 sm:$0xff]  }
 0x126   :  { %2746 = vmatpush1.bf16.msra.mxu0 %v8608_v50  ;;  %2910 = vmatpush1.bf16.msra.mxu1 %v8611_v51  ;;  %v8697_v50 = vld [vmem:[#allocation5 + $0xc10] ss:$28 sps:$4 sm:$0xff]  }
 0x127   :  { %2747 = vmatprep.subr.bf16.mxu0 %v8616_v52  ;;  %2911 = vmatprep.subr.bf16.mxu1 %v8619_v53  ;;  %v8703_v51 = vld [vmem:[#allocation5 + $0x14] ss:$28 sps:$4 sm:$0xff]   ;;  %v8700_v53 = vld [vmem:[#allocation2 + $0x18] ss:$0 sps:$4 sm:$0xff]  }
 0x128   :  { %v8722_v52 = vld [vmem:[#allocation5 + $0x1d8] ss:$28 sps:$4 sm:$0xff]  }
 0x12a   :  { %2748 = vmatpush1.bf16.msra.mxu0 %v8614_v54  ;;  %2912 = vmatpush1.bf16.msra.mxu1 %v8617_v55  ;;  %v8701_v54 = vld [vmem:[#allocation5 + $0x10] ss:$28 sps:$4 sm:$0xff]   ;;  %v8726_v55 = vld [vmem:[#allocation5 + $0x18] ss:$28 sps:$4 sm:$0xff]  }
 0x12b   :  { %2749 = vmatprep.subr.bf16.mxu0 %v8622_v56  ;;  %2913 = vmatprep.subr.bf16.mxu1 %v8625_v57  ;;  %v8706_v56 = vld [vmem:[#allocation5 + $0x4c] ss:$28 sps:$4 sm:$0xff]  }
 0x12c   :  { %v8727_v57 = vld [vmem:[#allocation5 + $0x210] ss:$28 sps:$4 sm:$0xff]  }
 0x12e   :  { %2750 = vmatpush1.bf16.msra.mxu0 %v8620_v58  ;;  %2914 = vmatpush1.bf16.msra.mxu1 %v8623_v59  ;;  %v8704_v58 = vld [vmem:[#allocation5 + $0x48] ss:$28 sps:$4 sm:$0xff]  }
 0x12f   :  { %2751 = vmatprep.subr.bf16.mxu0 %v8628_v60  ;;  %2915 = vmatprep.subr.bf16.mxu1 %v8631_v61  ;;  %v8709_v59 = vld [vmem:[#allocation5 + $0x84] ss:$28 sps:$4 sm:$0xff]   ;;  %v8731_v60 = vld [vmem:[#allocation5 + $0x50] ss:$28 sps:$4 sm:$0xff]  }
 0x130   :  { %v8732_v61 = vld [vmem:[#allocation5 + $0x248] ss:$28 sps:$4 sm:$0xff]  }
 0x132   :  { %2752 = vmatpush1.bf16.msra.mxu0 %v8626_v62  ;;  %2916 = vmatpush1.bf16.msra.mxu1 %v8629_v63  ;;  %v8707_v62 = vld [vmem:[#allocation5 + $0x80] ss:$28 sps:$4 sm:$0xff]  }
 0x133   :  { %2753 = vmatprep.subr.bf16.mxu0 %v8634_v0  ;;  %2917 = vmatprep.subr.bf16.mxu1 %v8637_v1  ;;  %v8712_v63 = vld [vmem:[#allocation5 + $0xbc] ss:$28 sps:$4 sm:$0xff]   ;;  %v8736_v0 = vld [vmem:[#allocation5 + $0x88] ss:$28 sps:$4 sm:$0xff]  }
 0x134   :  { %v8737_v1 = vld [vmem:[#allocation5 + $0x280] ss:$28 sps:$4 sm:$0xff]  }
 0x136   :  { %2754 = vmatpush1.bf16.msra.mxu0 %v8632_v2  ;;  %2918 = vmatpush1.bf16.msra.mxu1 %v8635_v3  ;;  %v8710_v2 = vld [vmem:[#allocation5 + $0xb8] ss:$28 sps:$4 sm:$0xff]  }
 0x137   :  { %2755 = vmatprep.subr.bf16.mxu0 %v8640_v4  ;;  %2919 = vmatprep.subr.bf16.mxu1 %v8643_v6  ;;  %v8715_v3 = vld [vmem:[#allocation5 + $0xf4] ss:$28 sps:$4 sm:$0xff]   ;;  %v8741_v4 = vld [vmem:[#allocation5 + $0xc0] ss:$28 sps:$4 sm:$0xff]  }
 0x138   :  { %v8742_v6 = vld [vmem:[#allocation5 + $0x2b8] ss:$28 sps:$4 sm:$0xff]  }
 0x13a   :  { %2756 = vmatpush1.bf16.msra.mxu0 %v8638_v7  ;;  %2920 = vmatpush1.bf16.msra.mxu1 %v8641_v8  ;;  %v8713_v7 = vld [vmem:[#allocation5 + $0xf0] ss:$28 sps:$4 sm:$0xff]  }
 0x13b   :  { %2757 = vmatprep.subr.bf16.mxu0 %v8646_v9  ;;  %2921 = vmatprep.subr.bf16.mxu1 %v8649_v11  ;;  %v8718_v8 = vld [vmem:[#allocation5 + $0x12c] ss:$28 sps:$4 sm:$0xff]  }
 0x13c   :  { %v8747_v9 = vld [vmem:[#allocation5 + $0x2f0] ss:$28 sps:$4 sm:$0xff]   ;;  %v8716_v11 = vld [vmem:[#allocation5 + $0x128] ss:$28 sps:$4 sm:$0xff]  }
 0x13e   :  { %2758 = vmatpush1.bf16.msra.mxu0 %v8644_v12  ;;  %2922 = vmatpush1.bf16.msra.mxu1 %v8647_v14  ;;  %v8721_v12 = vld [vmem:[#allocation5 + $0x164] ss:$28 sps:$4 sm:$0xff]   ;;  %v8751_v14 = vld [vmem:[#allocation5 + $0x130] ss:$28 sps:$4 sm:$0xff]  }
 0x13f   :  { %2768 = vmatprep.subr.bf16.mxu0 %v8653_v16  ;;  %2932 = vmatprep.subr.bf16.mxu1 %v8656_v17  ;;  %v8752_v16 = vld [vmem:[#allocation5 + $0x328] ss:$28 sps:$4 sm:$0xff]   ;;  %v8719_v17 = vld [vmem:[#allocation5 + $0x160] ss:$28 sps:$4 sm:$0xff]  }
 0x141   :  { %2760 = vmatmul.mubr.bf16.vlgmr.msra.gmra.mrb[0].mxu0 %v9904_v19  ;;  %2924 = vmatmul.mubr.bf16.vlgmr.msra.gmra.mrb[0].mxu1 %v9904_v19 }
 0x142   :  { %2769 = vmatpush1.bf16.msra.mxu0 %v8651_v18  ;;  %2933 = vmatpush1.bf16.msra.mxu1 %v8654_v20  ;;  %v8725_v18 = vld [vmem:[#allocation5 + $0x19c] ss:$28 sps:$4 sm:$0xff]   ;;  %v8756_v20 = vld [vmem:[#allocation5 + $0x168] ss:$28 sps:$4 sm:$0xff]  }
 0x143   :  { %2770 = vmatprep.subr.bf16.mxu0 %v8660_v21  ;;  %2934 = vmatprep.subr.bf16.mxu1 %v8663_v22  ;;  %v8757_v21 = vld [vmem:[#allocation5 + $0x360] ss:$28 sps:$4 sm:$0xff]   ;;  %v8723_v22 = vld [vmem:[#allocation5 + $0x198] ss:$28 sps:$4 sm:$0xff]  }
 0x144   :  { %2800 = vmatprep.mubr.bf16.mxu0 %v9744_v27  ;;  %2964 = vmatprep.mubr.bf16.mxu1 %v9744_v27 }
 0x146   :  { %2771 = vmatpush1.bf16.msra.mxu0 %v8658_v23  ;;  %2935 = vmatpush1.bf16.msra.mxu1 %v8661_v24  ;;  %v8730_v23 = vld [vmem:[#allocation5 + $0x1d4] ss:$28 sps:$4 sm:$0xff]   ;;  %v8761_v24 = vld [vmem:[#allocation5 + $0x1a0] ss:$28 sps:$4 sm:$0xff]  }
 0x147   :  { %2772 = vmatprep.subr.bf16.mxu0 %v8666_v25  ;;  %2936 = vmatprep.subr.bf16.mxu1 %v8669_v13  ;;  %v8762_v25 = vld [vmem:[#allocation5 + $0x558] ss:$28 sps:$4 sm:$0xff]   ;;  %v8728_v13 = vld [vmem:[#allocation5 + $0x1d0] ss:$28 sps:$4 sm:$0xff]  }
 0x14a   :  { %2773 = vmatpush1.bf16.msra.mxu0 %v8664_v26  ;;  %2937 = vmatpush1.bf16.msra.mxu1 %v8667_v28  ;;  %v8766_v26 = vld [vmem:[#allocation5 + $0x398] ss:$28 sps:$4 sm:$0xff]   ;;  %v8735_v28 = vld [vmem:[#allocation5 + $0x20c] ss:$28 sps:$4 sm:$0xff]  }
 0x14b   :  { %2774 = vmatprep.subr.bf16.mxu0 %v8672_v29  ;;  %2938 = vmatprep.subr.bf16.mxu1 %v8675_v31  ;;  %v8767_v29 = vld [vmem:[#allocation5 + $0x590] ss:$28 sps:$4 sm:$0xff]   ;;  %v8733_v31 = vld [vmem:[#allocation5 + $0x208] ss:$28 sps:$4 sm:$0xff]  }
 0x14e   :  { %2775 = vmatpush1.bf16.msra.mxu0 %v8670_v32  ;;  %2939 = vmatpush1.bf16.msra.mxu1 %v8673_v33  ;;  %v8771_v32 = vld [vmem:[#allocation5 + $0x3d0] ss:$28 sps:$4 sm:$0xff]   ;;  %v8740_v33 = vld [vmem:[#allocation5 + $0x244] ss:$28 sps:$4 sm:$0xff]  }
 0x14f   :  { %2776 = vmatprep.subr.bf16.mxu0 %v8678_v34  ;;  %2940 = vmatprep.subr.bf16.mxu1 %v8681_v35  ;;  %v8772_v34 = vld [vmem:[#allocation5 + $0x5c8] ss:$28 sps:$4 sm:$0xff]   ;;  %v8738_v35 = vld [vmem:[#allocation5 + $0x240] ss:$28 sps:$4 sm:$0xff]  }
 0x152   :  { %2777 = vmatpush1.bf16.msra.mxu0 %v8676_v36  ;;  %2941 = vmatpush1.bf16.msra.mxu1 %v8679_v37  ;;  %v8776_v36 = vld [vmem:[#allocation5 + $0x408] ss:$28 sps:$4 sm:$0xff]   ;;  %v8745_v37 = vld [vmem:[#allocation5 + $0x27c] ss:$28 sps:$4 sm:$0xff]  }
 0x153   :  { %2778 = vmatprep.subr.bf16.mxu0 %v8684_v38  ;;  %2942 = vmatprep.subr.bf16.mxu1 %v8687_v39  ;;  %v8777_v38 = vld [vmem:[#allocation5 + $0x600] ss:$28 sps:$4 sm:$0xff]   ;;  %v8743_v39 = vld [vmem:[#allocation5 + $0x278] ss:$28 sps:$4 sm:$0xff]  }
 0x156   :  { %2779 = vmatpush1.bf16.msra.mxu0 %v8682_v40  ;;  %2943 = vmatpush1.bf16.msra.mxu1 %v8685_v41  ;;  %v8781_v40 = vld [vmem:[#allocation5 + $0x440] ss:$28 sps:$4 sm:$0xff]   ;;  %v8750_v41 = vld [vmem:[#allocation5 + $0x2b4] ss:$28 sps:$4 sm:$0xff]  }
 0x157   :  { %2780 = vmatprep.subr.bf16.mxu0 %v8690_v42  ;;  %2944 = vmatprep.subr.bf16.mxu1 %v8693_v43  ;;  %v8782_v42 = vld [vmem:[#allocation5 + $0x638] ss:$28 sps:$4 sm:$0xff]   ;;  %v8748_v43 = vld [vmem:[#allocation5 + $0x2b0] ss:$28 sps:$4 sm:$0xff]  }
 0x15a   :  { %2781 = vmatpush1.bf16.msra.mxu0 %v8688_v44  ;;  %2945 = vmatpush1.bf16.msra.mxu1 %v8691_v45  ;;  %v8786_v44 = vld [vmem:[#allocation5 + $0x478] ss:$28 sps:$4 sm:$0xff]   ;;  %v8755_v45 = vld [vmem:[#allocation5 + $0x2ec] ss:$28 sps:$4 sm:$0xff]  }
 0x15b   :  { %2782 = vmatprep.subr.bf16.mxu0 %v8696_v46  ;;  %2946 = vmatprep.subr.bf16.mxu1 %v8699_v47  ;;  %v8787_v46 = vld [vmem:[#allocation5 + $0x670] ss:$28 sps:$4 sm:$0xff]   ;;  %v8753_v47 = vld [vmem:[#allocation5 + $0x2e8] ss:$28 sps:$4 sm:$0xff]  }
 0x15e   :  { %2783 = vmatpush1.bf16.msra.mxu0 %v8694_v49  ;;  %2947 = vmatpush1.bf16.msra.mxu1 %v8697_v50  ;;  %v8791_v49 = vld [vmem:[#allocation5 + $0x4b0] ss:$28 sps:$4 sm:$0xff]   ;;  %v8760_v50 = vld [vmem:[#allocation5 + $0x324] ss:$28 sps:$4 sm:$0xff]  }
 0x15f   :  { %2973 = vmatprep.subr.bf16.mxu0 %v8703_v51  ;;  %7974 = vmatprep.subr.bf16.mxu1 %v8722_v52  ;;  %v8792_v51 = vld [vmem:[#allocation5 + $0x6a8] ss:$28 sps:$4 sm:$0xff]   ;;  %v8758_v52 = vld [vmem:[#allocation5 + $0x320] ss:$28 sps:$4 sm:$0xff]  }
 0x161   :  { %2801 = vmatmul.mubr.bf16.vlgmr.msra.gmra.mrb[0].mxu0 %v8700_v53  ;;  %2965 = vmatmul.mubr.bf16.vlgmr.msra.gmra.mrb[0].mxu1 %v8700_v53  ;;  %v8765_v53 = vld [vmem:[#allocation5 + $0x35c] ss:$28 sps:$4 sm:$0xff]  }
 0x162   :  { %2974 = vmatpush1.bf16.msra.mxu0 %v8701_v54  ;;  %7975 = vmatpush3.bf16.msra.mxu1 %v8726_v55  ;;  %v8796_v54 = vld [vmem:[#allocation5 + $0x4e8] ss:$28 sps:$4 sm:$0xff]   ;;  %v8797_v55 = vld [vmem:[#allocation5 + $0x6e0] ss:$28 sps:$4 sm:$0xff]  }
 0x163   :  { %2975 = vmatprep.subr.bf16.mxu0 %v8706_v56  ;;  %7976 = vmatprep.subr.bf16.mxu1 %v8727_v57  ;;  %v8763_v56 = vld [vmem:[#allocation5 + $0x358] ss:$28 sps:$4 sm:$0xff]  }
 0x164   :  { %3169 = vmatprep.mubr.bf16.mxu1 %v9872_v48  ;;  %3005 = vmatprep.mubr.bf16.mxu0 %v9872_v48  ;;  %v8746_v48 = vld [vmem:[#allocation5 + $0xf8] ss:$28 sps:$4 sm:$0xff]  }
 0x165   :  { %v8770_v57 = vld [vmem:[#allocation5 + $0x394] ss:$28 sps:$4 sm:$0xff]  }
 0x166   :  { %2976 = vmatpush1.bf16.msra.mxu0 %v8704_v58  ;;  %7977 = vmatpush3.bf16.msra.mxu1 %v8731_v60  ;;  %v8801_v58 = vld [vmem:[#allocation5 + $0x520] ss:$28 sps:$4 sm:$0xff]   ;;  %v8768_v60 = vld [vmem:[#allocation5 + $0x390] ss:$28 sps:$4 sm:$0xff]  }
 0x167   :  { %2977 = vmatprep.subr.bf16.mxu0 %v8709_v59  ;;  %7978 = vmatprep.subr.bf16.mxu1 %v8732_v61  ;;  %v8802_v59 = vld [vmem:[#allocation5 + $0x8d8] ss:$28 sps:$4 sm:$0xff]   ;;  %v8775_v61 = vld [vmem:[#allocation5 + $0x3cc] ss:$28 sps:$4 sm:$0xff]  }
 0x16a   :  { %2978 = vmatpush1.bf16.msra.mxu0 %v8707_v62  ;;  %7979 = vmatpush3.bf16.msra.mxu1 %v8736_v0  ;;  %v8806_v62 = vld [vmem:[#allocation5 + $0x718] ss:$28 sps:$4 sm:$0xff]   ;;  %v8773_v0 = vld [vmem:[#allocation5 + $0x3c8] ss:$28 sps:$4 sm:$0xff]  }
 0x16b   :  { %2979 = vmatprep.subr.bf16.mxu0 %v8712_v63  ;;  %7980 = vmatprep.subr.bf16.mxu1 %v8737_v1  ;;  %v8807_v63 = vld [vmem:[#allocation5 + $0x910] ss:$28 sps:$4 sm:$0xff]   ;;  %v8780_v1 = vld [vmem:[#allocation5 + $0x404] ss:$28 sps:$4 sm:$0xff]  }
 0x16e   :  { %2980 = vmatpush1.bf16.msra.mxu0 %v8710_v2  ;;  %7981 = vmatpush3.bf16.msra.mxu1 %v8741_v4  ;;  %v8811_v2 = vld [vmem:[#allocation5 + $0x750] ss:$28 sps:$4 sm:$0xff]   ;;  %v8778_v4 = vld [vmem:[#allocation5 + $0x400] ss:$28 sps:$4 sm:$0xff]  }
 0x16f   :  { %2981 = vmatprep.subr.bf16.mxu0 %v8715_v3  ;;  %7982 = vmatprep.subr.bf16.mxu1 %v8742_v6  ;;  %v8812_v3 = vld [vmem:[#allocation5 + $0x948] ss:$28 sps:$4 sm:$0xff]   ;;  %v8785_v6 = vld [vmem:[#allocation5 + $0x43c] ss:$28 sps:$4 sm:$0xff]  }
 0x172   :  { %2982 = vmatpush1.bf16.msra.mxu0 %v8713_v7  ;;  %7983 = vmatpush3.bf16.msra.mxu1 %v8746_v48  ;;  %v8816_v7 = vld [vmem:[#allocation5 + $0x788] ss:$28 sps:$4 sm:$0xff]   ;;  %v8783_v48 = vld [vmem:[#allocation5 + $0x438] ss:$28 sps:$4 sm:$0xff]  }
 0x173   :  { %2983 = vmatprep.subr.bf16.mxu0 %v8718_v8  ;;  %7984 = vmatprep.subr.bf16.mxu1 %v8747_v9  ;;  %v8790_v8 = vld [vmem:[#allocation5 + $0x474] ss:$28 sps:$4 sm:$0xff]   ;;  %v8821_v9 = vld [vmem:[#allocation5 + $0x7c0] ss:$28 sps:$4 sm:$0xff]  }
 0x176   :  { %2984 = vmatpush1.bf16.msra.mxu0 %v8716_v11  ;;  %7985 = vmatpush3.bf16.msra.mxu1 %v8751_v14  ;;  %v8822_v11 = vld [vmem:[#allocation5 + $0x9b8] ss:$28 sps:$4 sm:$0xff]   ;;  %v8795_v14 = vld [vmem:[#allocation5 + $0x4ac] ss:$28 sps:$4 sm:$0xff]  }
 0x177   :  { %2985 = vmatprep.subr.bf16.mxu0 %v8721_v12  ;;  %7986 = vmatprep.subr.bf16.mxu1 %v8752_v16  ;;  %v8788_v12 = vld [vmem:[#allocation5 + $0x470] ss:$28 sps:$4 sm:$0xff]  }
 0x178   :  { %v8827_v16 = vld [vmem:[#allocation5 + $0x9f0] ss:$28 sps:$4 sm:$0xff]  }
 0x17a   :  { %2986 = vmatpush1.bf16.msra.mxu0 %v8719_v17  ;;  %7987 = vmatpush3.bf16.msra.mxu1 %v8756_v20  ;;  %v8793_v17 = vld [vmem:[#allocation5 + $0x4a8] ss:$28 sps:$4 sm:$0xff]  }
 0x17b   :  { %2987 = vmatprep.subr.bf16.mxu0 %v8725_v18  ;;  %7988 = vmatprep.subr.bf16.mxu1 %v8757_v21  ;;  %v8831_v18 = vld [vmem:[#allocation5 + $0x830] ss:$28 sps:$4 sm:$0xff]   ;;  %v8800_v20 = vld [vmem:[#allocation5 + $0x4e4] ss:$28 sps:$4 sm:$0xff]  }
 0x17c   :  { %v8832_v21 = vld [vmem:[#allocation5 + $0xa28] ss:$28 sps:$4 sm:$0xff]  }
 0x17e   :  { %2988 = vmatpush1.bf16.msra.mxu0 %v8723_v22  ;;  %7989 = vmatpush3.bf16.msra.mxu1 %v8761_v24  ;;  %v8798_v22 = vld [vmem:[#allocation5 + $0x4e0] ss:$28 sps:$4 sm:$0xff]  }
 0x17f   :  { %2989 = vmatprep.subr.bf16.mxu0 %v8730_v23  ;;  %7996 = vmatprep.subr.bf16.mxu1 %v8762_v25  ;;  %v8836_v23 = vld [vmem:[#allocation5 + $0x868] ss:$28 sps:$4 sm:$0xff]   ;;  %v8805_v24 = vld [vmem:[#allocation5 + $0x51c] ss:$28 sps:$4 sm:$0xff]  }
 0x180   :  { %v8837_v25 = vld [vmem:[#allocation5 + $0xa60] ss:$28 sps:$4 sm:$0xff]  }
 0x181   :  { %3170 = vmatmul.mubr.bf16.vlgmr.msra.gmra.mrb[4].mxu1 %v9876_v5 }
 0x182   :  { %2990 = vmatpush1.bf16.msra.mxu0 %v8728_v13  ;;  %7997 = vmatpush3.bf16.msra.mxu1 %v8766_v26  ;;  %v8803_v13 = vld [vmem:[#allocation5 + $0x518] ss:$28 sps:$4 sm:$0xff]   ;;  %v8841_v26 = vld [vmem:[#allocation5 + $0x8a0] ss:$28 sps:$4 sm:$0xff]  }
 0x183   :  { %2991 = vmatprep.subr.bf16.mxu0 %v8735_v28  ;;  %7998 = vmatprep.subr.bf16.mxu1 %v8767_v29  ;;  %v8810_v28 = vld [vmem:[#allocation5 + $0x554] ss:$28 sps:$4 sm:$0xff]  }
 0x184   :  { %3209 = vmatprep.mubr.bf16.mxu1 %v9884_v30  ;;  %v8808_v29 = vld [vmem:[#allocation5 + $0x550] ss:$28 sps:$4 sm:$0xff]  }
 0x186   :  { %2992 = vmatpush1.bf16.msra.mxu0 %v8733_v31  ;;  %7999 = vmatpush3.bf16.msra.mxu1 %v8771_v32  ;;  %v8845_v31 = vld [vmem:[#allocation5 + $0xa98] ss:$28 sps:$4 sm:$0xff]   ;;  %v8815_v32 = vld [vmem:[#allocation5 + $0x58c] ss:$28 sps:$4 sm:$0xff]  }
 0x187   :  { %2993 = vmatprep.subr.bf16.mxu0 %v8740_v33  ;;  %8000 = vmatprep.subr.bf16.mxu1 %v8772_v34  ;;  %v9745_v33 = vmov 0.0   ;;  %v8813_v34 = vld [vmem:[#allocation5 + $0x588] ss:$28 sps:$4 sm:$0xff]  }
 0x18a   :  { %2994 = vmatpush1.bf16.msra.mxu0 %v8738_v35  ;;  %8001 = vmatpush3.bf16.msra.mxu1 %v8776_v36  ;;  %v8849_v35 = vld [vmem:[#allocation5 + $0xad0] ss:$28 sps:$4 sm:$0xff]   ;;  %v8820_v36 = vld [vmem:[#allocation5 + $0x5c4] ss:$28 sps:$4 sm:$0xff]  }
 0x18b   :  { %2995 = vmatprep.subr.bf16.mxu0 %v8745_v37  ;;  %8002 = vmatprep.subr.bf16.mxu1 %v8777_v38  ;;  %v8818_v37 = vld [vmem:[#allocation5 + $0x5c0] ss:$28 sps:$4 sm:$0xff]  }
 0x18c   :  { %v8825_v38 = vld [vmem:[#allocation5 + $0x5fc] ss:$28 sps:$4 sm:$0xff]  }
 0x18e   :  { %2996 = vmatpush1.bf16.msra.mxu0 %v8743_v39  ;;  %8003 = vmatpush3.bf16.msra.mxu1 %v8781_v40  ;;  %v8853_v39 = vld [vmem:[#allocation5 + $0xb08] ss:$28 sps:$4 sm:$0xff]   ;;  %v8823_v40 = vld [vmem:[#allocation5 + $0x5f8] ss:$28 sps:$4 sm:$0xff]  }
 0x18f   :  { %2997 = vmatprep.subr.bf16.mxu0 %v8750_v41  ;;  %8004 = vmatprep.subr.bf16.mxu1 %v8782_v42  ;;  %v8830_v41 = vld [vmem:[#allocation5 + $0x634] ss:$28 sps:$4 sm:$0xff]   ;;  %v8857_v42 = vld [vmem:[#allocation5 + $0xb40] ss:$28 sps:$4 sm:$0xff]  }
 0x192   :  { %2998 = vmatpush1.bf16.msra.mxu0 %v8748_v43  ;;  %8005 = vmatpush3.bf16.msra.mxu1 %v8786_v44  ;;  %v8828_v43 = vld [vmem:[#allocation5 + $0x630] ss:$28 sps:$4 sm:$0xff]  }
 0x193   :  { %2999 = vmatprep.subr.bf16.mxu0 %v8755_v45  ;;  %8006 = vmatprep.subr.bf16.mxu1 %v8787_v46  ;;  %v8835_v44 = vld [vmem:[#allocation5 + $0x66c] ss:$28 sps:$4 sm:$0xff]   ;;  %v8861_v45 = vld [vmem:[#allocation5 + $0xb78] ss:$28 sps:$4 sm:$0xff]  }
 0x194   :  { %v8833_v46 = vld [vmem:[#allocation5 + $0x668] ss:$28 sps:$4 sm:$0xff]  }
 0x196   :  { %3000 = vmatpush1.bf16.msra.mxu0 %v8753_v47  ;;  %8007 = vmatpush3.bf16.msra.mxu1 %v8791_v49  ;;  %v8840_v47 = vld [vmem:[#allocation5 + $0x6a4] ss:$28 sps:$4 sm:$0xff]   ;;  %v8865_v49 = vld [vmem:[#allocation5 + $0xbb0] ss:$28 sps:$4 sm:$0xff]  }
 0x197   :  { %3001 = vmatprep.subr.bf16.mxu0 %v8760_v50  ;;  %8008 = vmatprep.subr.bf16.mxu1 %v8792_v51  ;;  %v8838_v50 = vld [vmem:[#allocation5 + $0x6a0] ss:$28 sps:$4 sm:$0xff]  }
 0x198   :  { %v8844_v51 = vld [vmem:[#allocation5 + $0x6dc] ss:$28 sps:$4 sm:$0xff]  }
 0x19a   :  { %3002 = vmatpush1.bf16.msra.mxu0 %v8758_v52  ;;  %8009 = vmatpush3.bf16.msra.mxu1 %v8796_v54  ;;  %v8869_v52 = vld [vmem:[#allocation5 + $0xbe8] ss:$28 sps:$4 sm:$0xff]   ;;  %v8848_v54 = vld [vmem:[#allocation5 + $0x714] ss:$28 sps:$4 sm:$0xff]  }
 0x19b   :  { %3003 = vmatprep.subr.bf16.mxu0 %v8765_v53  ;;  %8010 = vmatprep.subr.bf16.mxu1 %v8797_v55  ;;  %v8842_v53 = vld [vmem:[#allocation5 + $0x6d8] ss:$28 sps:$4 sm:$0xff]   ;;  %v8873_v55 = vld [vmem:[#allocation5 + $0xc20] ss:$28 sps:$4 sm:$0xff]  }
 0x19e   :  { %3004 = vmatpush1.bf16.msra.mxu0 %v8763_v56  ;;  %8011 = vmatpush3.bf16.msra.mxu1 %v8801_v58  ;;  %v8876_v56 = vld [vmem:[#allocation8 + $0x4] ss:$28 sps:$4 sm:$0xff]  }
 0x19f   :  { %3014 = vmatprep.subr.bf16.mxu0 %v8770_v57  ;;  %8018 = vmatprep.subr.bf16.mxu1 %v8802_v59  ;;  %v8846_v57 = vld [vmem:[#allocation5 + $0x710] ss:$28 sps:$4 sm:$0xff]   ;;  %v8874_v59 = vld [vmem:[#allocation8] ss:$28 sps:$4 sm:$0xff]  }
 0x1a0   :  { %v8852_v58 = vld [vmem:[#allocation5 + $0x74c] ss:$28 sps:$4 sm:$0xff]  }
 0x1a1   :  { %3006 = vmatmul.mubr.bf16.vlgmr.msra.gmra.mrb[4].mxu0 %v9876_v5  ;;  %3210 = vmatmul.mubr.bf16.vlgmr.msra.gmra.mrb[8].mxu1 %v9890_v10  ;;  %v8817_v5 = vld [vmem:[#allocation5 + $0x980] ss:$28 sps:$4 sm:$0xff]  }
 0x1a2   :  { %3015 = vmatpush1.bf16.msra.mxu0 %v8768_v60  ;;  %8019 = vmatpush3.bf16.msra.mxu1 %v8806_v62  ;;  %v8882_v60 = vld [vmem:[#allocation8 + $0x3c] ss:$28 sps:$4 sm:$0xff]  }
 0x1a3   :  { %3016 = vmatprep.subr.bf16.mxu0 %v8775_v61  ;;  %8020 = vmatprep.subr.bf16.mxu1 %v8807_v63  ;;  %v8850_v61 = vld [vmem:[#allocation5 + $0x748] ss:$28 sps:$4 sm:$0xff]   ;;  %v9930_v63 = vld [vmem:[#allocation2 + $0x18] ss:$0 sps:$4 sm:$0xff]  }
 0x1a4   :  { %3249 = vmatprep.mubr.bf16.mxu1 %v9896_v15  ;;  %3046 = vmatprep.mubr.bf16.mxu0 %v9884_v30  ;;  %v8826_v30 = vld [vmem:[#allocation5 + $0x7f8] ss:$28 sps:$4 sm:$0xff]   ;;  %v8856_v62 = vld [vmem:[#allocation5 + $0x784] ss:$28 sps:$4 sm:$0xff]  }
 0x1a6   :  { %3017 = vmatpush1.bf16.msra.mxu0 %v8773_v0  ;;  %8021 = vmatpush3.bf16.msra.mxu1 %v8811_v2  ;;  %v8880_v0 = vld [vmem:[#allocation8 + $0x38] ss:$28 sps:$4 sm:$0xff]  }
 0x1a7   :  { %3018 = vmatprep.subr.bf16.mxu0 %v8780_v1  ;;  %8022 = vmatprep.subr.bf16.mxu1 %v8812_v3  ;;  %v8888_v1 = vld [vmem:[#allocation8 + $0x74] ss:$28 sps:$4 sm:$0xff]  }
 0x1a8   :  { %v8854_v2 = vld [vmem:[#allocation5 + $0x780] ss:$28 sps:$4 sm:$0xff]  }
 0x1a9   :  { %v8860_v3 = vld [vmem:[#allocation5 + $0x7bc] ss:$28 sps:$4 sm:$0xff]  }
 0x1aa   :  { %3019 = vmatpush1.bf16.msra.mxu0 %v8778_v4  ;;  %8023 = vmatpush3.bf16.msra.mxu1 %v8816_v7  ;;  %v8886_v4 = vld [vmem:[#allocation8 + $0x70] ss:$28 sps:$4 sm:$0xff]  }
 0x1ab   :  { %3020 = vmatprep.subr.bf16.mxu0 %v8785_v6  ;;  %8024 = vmatprep.subr.bf16.mxu1 %v8817_v5  ;;  %v8894_v6 = vld [vmem:[#allocation8 + $0xac] ss:$28 sps:$4 sm:$0xff]  }
 0x1ac   :  { %v8864_v7 = vld [vmem:[#allocation5 + $0x7f4] ss:$28 sps:$4 sm:$0xff]  }
 0x1ad   :  { %v8892_v5 = vld [vmem:[#allocation8 + $0xa8] ss:$28 sps:$4 sm:$0xff]  }
 0x1ae   :  { %3021 = vmatpush1.bf16.msra.mxu0 %v8783_v48  ;;  %8025 = vmatpush3.bf16.msra.mxu1 %v8821_v9  ;;  %v8900_v48 = vld [vmem:[#allocation8 + $0xe4] ss:$28 sps:$4 sm:$0xff]  }
 0x1af   :  { %3022 = vmatprep.subr.bf16.mxu0 %v8790_v8  ;;  %8026 = vmatprep.subr.bf16.mxu1 %v8822_v11  ;;  %v8862_v8 = vld [vmem:[#allocation5 + $0x7f0] ss:$28 sps:$4 sm:$0xff]   ;;  %v8906_v11 = vld [vmem:[#allocation8 + $0x11c] ss:$28 sps:$4 sm:$0xff]  }
 0x1b0   :  { %v8868_v9 = vld [vmem:[#allocation5 + $0x82c] ss:$28 sps:$4 sm:$0xff]  }
 0x1b2   :  { %3023 = vmatpush1.bf16.msra.mxu0 %v8788_v12  ;;  %8027 = vmatpush3.bf16.msra.mxu1 %v8826_v30  ;;  %v8866_v12 = vld [vmem:[#allocation5 + $0x828] ss:$28 sps:$4 sm:$0xff]   ;;  %v8904_v30 = vld [vmem:[#allocation8 + $0x118] ss:$28 sps:$4 sm:$0xff]  }
 0x1b3   :  { %3024 = vmatprep.subr.bf16.mxu0 %v8795_v14  ;;  %8028 = vmatprep.subr.bf16.mxu1 %v8827_v16  ;;  %v8872_v14 = vld [vmem:[#allocation5 + $0x864] ss:$28 sps:$4 sm:$0xff]   ;;  %v8912_v16 = vld [vmem:[#allocation8 + $0x154] ss:$28 sps:$4 sm:$0xff]  }
 0x1b6   :  { %3025 = vmatpush1.bf16.msra.mxu0 %v8793_v17  ;;  %8029 = vmatpush3.bf16.msra.mxu1 %v8831_v18  ;;  %v8870_v17 = vld [vmem:[#allocation5 + $0x860] ss:$28 sps:$4 sm:$0xff]  }
 0x1b7   :  { %3026 = vmatprep.subr.bf16.mxu0 %v8800_v20  ;;  %8030 = vmatprep.subr.bf16.mxu1 %v8832_v21  ;;  %v8879_v18 = vld [vmem:[#allocation5 + $0x89c] ss:$28 sps:$4 sm:$0xff]   ;;  %v8918_v21 = vld [vmem:[#allocation8 + $0x18c] ss:$28 sps:$4 sm:$0xff]  }
 0x1b8   :  { %v8910_v20 = vld [vmem:[#allocation8 + $0x150] ss:$28 sps:$4 sm:$0xff]  }
 0x1ba   :  { %3027 = vmatpush1.bf16.msra.mxu0 %v8798_v22  ;;  %8031 = vmatpush3.bf16.msra.mxu1 %v8836_v23  ;;  %v8877_v22 = vld [vmem:[#allocation5 + $0x898] ss:$28 sps:$4 sm:$0xff]   ;;  %v8916_v23 = vld [vmem:[#allocation8 + $0x188] ss:$28 sps:$4 sm:$0xff]  }
 0x1bb   :  { %3028 = vmatprep.subr.bf16.mxu0 %v8805_v24  ;;  %8032 = vmatprep.subr.bf16.mxu1 %v8837_v25  ;;  %v8885_v24 = vld [vmem:[#allocation5 + $0x8d4] ss:$28 sps:$4 sm:$0xff]   ;;  %v8924_v25 = vld [vmem:[#allocation8 + $0x1c4] ss:$28 sps:$4 sm:$0xff]  }
 0x1be   :  { %3029 = vmatpush1.bf16.msra.mxu0 %v8803_v13  ;;  %8033 = vmatpush3.bf16.msra.mxu1 %v8841_v26  ;;  %v8883_v13 = vld [vmem:[#allocation5 + $0x8d0] ss:$28 sps:$4 sm:$0xff]   ;;  %v8922_v26 = vld [vmem:[#allocation8 + $0x1c0] ss:$28 sps:$4 sm:$0xff]  }
 0x1bf   :  { %3030 = vmatprep.subr.bf16.mxu0 %v8810_v28  ;;  %8199 = vmatprep.subr.bf16.mxu1 %v9745_v33  ;;  %v8891_v28 = vld [vmem:[#allocation5 + $0x90c] ss:$28 sps:$4 sm:$0xff]  }
 0x1c1   :  { %3250 = vmatmul.mubr.bf16.vlgmr.msra.gmra.mrb[12].mxu1 %v9904_v19 }
 0x1c2   :  { %3031 = vmatpush1.bf16.msra.mxu0 %v8808_v29  ;;  %8200 = vmatpush3.bf16.msra.mxu1 %v8845_v31  ;;  %v8930_v29 = vld [vmem:[#allocation8 + $0x1fc] ss:$28 sps:$4 sm:$0xff]  }
 0x1c3   :  { %3032 = vmatprep.subr.bf16.mxu0 %v8815_v32  ;;  %8201 = vmatprep.subr.bf16.mxu1 %v9745_v33  ;;  %v8889_v31 = vld [vmem:[#allocation5 + $0x908] ss:$28 sps:$4 sm:$0xff]  }
 0x1c4   :  { %8215 = vmatprep.mubr.msk.bf16.mxu1 %vm9746_vm0, %v9745_v33  ;;  %v8897_v32 = vld [vmem:[#allocation5 + $0x944] ss:$28 sps:$4 sm:$0xff]  }
 0x1c6   :  { %3033 = vmatpush1.bf16.msra.mxu0 %v8813_v34  ;;  %8202 = vmatpush3.bf16.msra.mxu1 %v8849_v35  ;;  %v8928_v34 = vld [vmem:[#allocation8 + $0x1f8] ss:$28 sps:$4 sm:$0xff]  }
 0x1c7   :  { %3034 = vmatprep.subr.bf16.mxu0 %v8820_v36  ;;  %8203 = vmatprep.subr.bf16.mxu1 %v9745_v33  ;;  %v8936_v35 = vld [vmem:[#allocation8 + $0x234] ss:$28 sps:$4 sm:$0xff]  }
 0x1c8   :  { %v8895_v36 = vld [vmem:[#allocation5 + $0x940] ss:$28 sps:$4 sm:$0xff]  }
 0x1ca   :  { %3035 = vmatpush1.bf16.msra.mxu0 %v8818_v37  ;;  %8204 = vmatpush3.bf16.msra.mxu1 %v8853_v39  ;;  %v8903_v37 = vld [vmem:[#allocation5 + $0x97c] ss:$28 sps:$4 sm:$0xff]   ;;  %v8942_v39 = vld [vmem:[#allocation8 + $0x26c] ss:$28 sps:$4 sm:$0xff]  }
 0x1cb   :  { %3036 = vmatprep.subr.bf16.mxu0 %v8825_v38  ;;  %8205 = vmatprep.subr.bf16.mxu1 %v9745_v33  ;;  %v8934_v38 = vld [vmem:[#allocation8 + $0x230] ss:$28 sps:$4 sm:$0xff]  }
 0x1ce   :  { %3037 = vmatpush1.bf16.msra.mxu0 %v8823_v40  ;;  %8206 = vmatpush3.bf16.msra.mxu1 %v8857_v42  ;;  %v8901_v40 = vld [vmem:[#allocation5 + $0x978] ss:$28 sps:$4 sm:$0xff]   ;;  %v8940_v42 = vld [vmem:[#allocation8 + $0x268] ss:$28 sps:$4 sm:$0xff]  }
 0x1cf   :  { %3038 = vmatprep.subr.bf16.mxu0 %v8830_v41  ;;  %8207 = vmatprep.subr.bf16.mxu1 %v9745_v33  ;;  %v8909_v41 = vld [vmem:[#allocation5 + $0x9b4] ss:$28 sps:$4 sm:$0xff]  }
 0x1d2   :  { %3039 = vmatpush1.bf16.msra.mxu0 %v8828_v43  ;;  %8208 = vmatpush3.bf16.msra.mxu1 %v8861_v45  ;;  %v8948_v43 = vld [vmem:[#allocation8 + $0x2a4] ss:$28 sps:$4 sm:$0xff]  }
 0x1d3   :  { %3040 = vmatprep.subr.bf16.mxu0 %v8835_v44  ;;  %8209 = vmatprep.subr.bf16.mxu1 %v9745_v33  ;;  %v8907_v44 = vld [vmem:[#allocation5 + $0x9b0] ss:$28 sps:$4 sm:$0xff]  }
 0x1d4   :  { %v8915_v45 = vld [vmem:[#allocation5 + $0x9ec] ss:$28 sps:$4 sm:$0xff]  }
 0x1d6   :  { %3041 = vmatpush1.bf16.msra.mxu0 %v8833_v46  ;;  %8210 = vmatpush3.bf16.msra.mxu1 %v8865_v49  ;;  %v8946_v46 = vld [vmem:[#allocation8 + $0x2a0] ss:$28 sps:$4 sm:$0xff]  }
 0x1d7   :  { %3042 = vmatprep.subr.bf16.mxu0 %v8840_v47  ;;  %8211 = vmatprep.subr.bf16.mxu1 %v9745_v33  ;;  %v8954_v47 = vld [vmem:[#allocation8 + $0x2dc] ss:$28 sps:$4 sm:$0xff]  }
 0x1d8   :  { %v8913_v49 = vld [vmem:[#allocation5 + $0x9e8] ss:$28 sps:$4 sm:$0xff]  }
 0x1da   :  { %3043 = vmatpush1.bf16.msra.mxu0 %v8838_v50  ;;  %8212 = vmatpush3.bf16.msra.mxu1 %v8869_v52  ;;  %v8921_v50 = vld [vmem:[#allocation5 + $0xa24] ss:$28 sps:$4 sm:$0xff]   ;;  %v8960_v52 = vld [vmem:[#allocation8 + $0x314] ss:$28 sps:$4 sm:$0xff]  }
 0x1db   :  { %3044 = vmatprep.subr.bf16.mxu0 %v8844_v51  ;;  %8213 = vmatprep.subr.bf16.mxu1 %v9745_v33  ;;  %v8952_v51 = vld [vmem:[#allocation8 + $0x2d8] ss:$28 sps:$4 sm:$0xff]  }
 0x1de   :  { %3045 = vmatpush1.bf16.msra.mxu0 %v8842_v53  ;;  %8214 = vmatpush3.bf16.msra.mxu1 %v8873_v55  ;;  %v8919_v53 = vld [vmem:[#allocation5 + $0xa20] ss:$28 sps:$4 sm:$0xff]   ;;  %v8958_v55 = vld [vmem:[#allocation8 + $0x310] ss:$28 sps:$4 sm:$0xff]  }
 0x1df   :  { %3055 = vmatprep.subr.bf16.mxu0 %v8848_v54  ;;  %5812 = vmatprep.subr.bf16.mxu1 %v8876_v56  ;;  %v8927_v54 = vld [vmem:[#allocation5 + $0xa5c] ss:$28 sps:$4 sm:$0xff]   ;;  %v8966_v56 = vld [vmem:[#allocation8 + $0x34c] ss:$28 sps:$4 sm:$0xff]  }
 0x1e1   :  { %3047 = vmatmul.mubr.bf16.vlgmr.msra.gmra.mrb[4].mxu0 %v9890_v10  ;;  %8216 = vmatmul.mubr.bf16.vlgmr.msra.gmra.mrb[16].mxu1 %v9930_v63  ;;  %v8858_v10 = vld [vmem:[#allocation5 + $0x7b8] ss:$28 sps:$4 sm:$0xff]  }
 0x1e2   :  { %3056 = vmatpush1.bf16.msra.mxu0 %v8846_v57  ;;  %5813 = vmatpush1.bf16.msra.mxu1 %v8874_v59  ;;  %v8925_v57 = vld [vmem:[#allocation5 + $0xa58] ss:$28 sps:$4 sm:$0xff]   ;;  %v8964_v59 = vld [vmem:[#allocation8 + $0x348] ss:$28 sps:$4 sm:$0xff]  }
 0x1e3   :  { %3057 = vmatprep.subr.bf16.mxu0 %v8852_v58  ;;  %5814 = vmatprep.subr.bf16.mxu1 %v8882_v60  ;;  %v8933_v58 = vld [vmem:[#allocation5 + $0xa94] ss:$28 sps:$4 sm:$0xff]   ;;  %v8972_v60 = vld [vmem:[#allocation8 + $0x384] ss:$28 sps:$4 sm:$0xff]  }
 0x1e4   :  { %3087 = vmatprep.mubr.bf16.mxu0 %v9896_v15  ;;  %v8898_v15 = vld [vmem:[#allocation8 + $0xe0] ss:$28 sps:$4 sm:$0xff]  }
 0x1e6   :  { %3058 = vmatpush1.bf16.msra.mxu0 %v8850_v61  ;;  %5815 = vmatpush1.bf16.msra.mxu1 %v8880_v0  ;;  %v8931_v61 = vld [vmem:[#allocation5 + $0xa90] ss:$28 sps:$4 sm:$0xff]   ;;  %v8937_v0 = vld [vmem:[#allocation5 + $0xac8] ss:$28 sps:$4 sm:$0xff]  }
 0x1e7   :  { %3059 = vmatprep.subr.bf16.mxu0 %v8856_v62  ;;  %5816 = vmatprep.subr.bf16.mxu1 %v8888_v1  ;;  %v8939_v62 = vld [vmem:[#allocation5 + $0xacc] ss:$28 sps:$4 sm:$0xff]   ;;  %v8945_v1 = vld [vmem:[#allocation5 + $0xb04] ss:$28 sps:$4 sm:$0xff]  }
 0x1ea   :  { %3060 = vmatpush1.bf16.msra.mxu0 %v8854_v2  ;;  %5817 = vmatpush1.bf16.msra.mxu1 %v8886_v4  ;;  %v569_v2 = vlaneseq  ;;  %v8951_v4 = vld [vmem:[#allocation5 + $0xb3c] ss:$28 sps:$4 sm:$0xff]  }
 0x1eb   :  { %3061 = vmatprep.subr.bf16.mxu0 %v8860_v3  ;;  %5818 = vmatprep.subr.bf16.mxu1 %v8894_v6  ;;  %v8943_v3 = vld [vmem:[#allocation5 + $0xb00] ss:$28 sps:$4 sm:$0xff]  }
 0x1ec   :  { %v9937_v6 = vshrl.u32 %v569_v2, 7 }
 0x1ee   :  { %3062 = vmatpush1.bf16.msra.mxu0 %v8858_v10  ;;  %5819 = vmatpush1.bf16.msra.mxu1 %v8892_v5  ;;  %v8949_v10 = vld [vmem:[#allocation5 + $0xb38] ss:$28 sps:$4 sm:$0xff]   ;;  %v8955_v5 = vld [vmem:[#allocation5 + $0xb70] ss:$28 sps:$4 sm:$0xff]  }
 0x1ef   :  { %3063 = vmatprep.subr.bf16.mxu0 %v8864_v7  ;;  %5820 = vmatprep.subr.bf16.mxu1 %v8900_v48  ;;  %v8957_v7 = vld [vmem:[#allocation5 + $0xb74] ss:$28 sps:$4 sm:$0xff]   ;;  %v571_v48 = vsub.s32 0, %v9937_v6 }
 0x1f2   :  { %3064 = vmatpush1.bf16.msra.mxu0 %v8862_v8  ;;  %5821 = vmatpush1.bf16.msra.mxu1 %v8898_v15  ;;  %v575_v8 = vsub.s32 1, %v9937_v6  ;;  %v8963_v15 = vld [vmem:[#allocation5 + $0xbac] ss:$28 sps:$4 sm:$0xff]  }
 0x1f3   :  { %3065 = vmatprep.subr.bf16.mxu0 %v8868_v9  ;;  %5822 = vmatprep.subr.bf16.mxu1 %v8906_v11  ;;  %v583_v9 = vsub.s32 3, %v9937_v6 }
 0x1f6   :  { %3066 = vmatpush1.bf16.msra.mxu0 %v8866_v12  ;;  %5823 = vmatpush1.bf16.msra.mxu1 %v8904_v30  ;;  %v8961_v30 = vld [vmem:[#allocation5 + $0xba8] ss:$28 sps:$4 sm:$0xff]  }
 0x1f7   :  { %3067 = vmatprep.subr.bf16.mxu0 %v8872_v14  ;;  %5824 = vmatprep.subr.bf16.mxu1 %v8912_v16  ;;  %v8969_v16 = vld [vmem:[#allocation5 + $0xbe4] ss:$28 sps:$4 sm:$0xff]  }
 0x1fa   :  { %3068 = vmatpush1.bf16.msra.mxu0 %v8870_v17  ;;  %5825 = vmatpush1.bf16.msra.mxu1 %v8910_v20 }
 0x1fb   :  { %3069 = vmatprep.subr.bf16.mxu0 %v8879_v18  ;;  %5826 = vmatprep.subr.bf16.mxu1 %v8918_v21 }
 0x1fe   :  { %3070 = vmatpush1.bf16.msra.mxu0 %v8877_v22  ;;  %5827 = vmatpush1.bf16.msra.mxu1 %v8916_v23 }
 0x1ff   :  { %3071 = vmatprep.subr.bf16.mxu0 %v8885_v24  ;;  %5828 = vmatprep.subr.bf16.mxu1 %v8924_v25 }
 0x202   :  { %3072 = vmatpush1.bf16.msra.mxu0 %v8883_v13  ;;  %5829 = vmatpush1.bf16.msra.mxu1 %v8922_v26  ;;  %v8967_v26 = vld [vmem:[#allocation5 + $0xbe0] ss:$28 sps:$4 sm:$0xff]  }
 0x203   :  { %3073 = vmatprep.subr.bf16.mxu0 %v8891_v28  ;;  %5830 = vmatprep.subr.bf16.mxu1 %v8930_v29  ;;  %v8975_v28 = vld [vmem:[#allocation5 + $0xc1c] ss:$28 sps:$4 sm:$0xff]  }
 0x206   :  { %3074 = vmatpush1.bf16.msra.mxu0 %v8889_v31  ;;  %5831 = vmatpush1.bf16.msra.mxu1 %v8928_v34 }
 0x207   :  { %3075 = vmatprep.subr.bf16.mxu0 %v8897_v32  ;;  %5832 = vmatprep.subr.bf16.mxu1 %v8936_v35 }
 0x20a   :  { %3076 = vmatpush1.bf16.msra.mxu0 %v8895_v36  ;;  %5833 = vmatpush1.bf16.msra.mxu1 %v8934_v38  ;;  %v8970_v36 = vld [vmem:[#allocation8 + $0x380] ss:$28 sps:$4 sm:$0xff]  }
 0x20b   :  { %3077 = vmatprep.subr.bf16.mxu0 %v8903_v37  ;;  %5834 = vmatprep.subr.bf16.mxu1 %v8942_v39  ;;  %v8973_v37 = vld [vmem:[#allocation5 + $0xc18] ss:$28 sps:$4 sm:$0xff]   ;;  %v8978_v39 = vld [vmem:[#allocation8 + $0x3bc] ss:$28 sps:$4 sm:$0xff]  }
 0x20e   :  { %3078 = vmatpush1.bf16.msra.mxu0 %v8901_v40  ;;  %5835 = vmatpush1.bf16.msra.mxu1 %v8940_v42  ;;  %v8981_v40 = vld [vmem:[#allocation8 + $0xc] ss:$28 sps:$4 sm:$0xff]   ;;  %v8976_v42 = vld [vmem:[#allocation8 + $0x3b8] ss:$28 sps:$4 sm:$0xff]  }
 0x20f   :  { %3079 = vmatprep.subr.bf16.mxu0 %v8909_v41  ;;  %5836 = vmatprep.subr.bf16.mxu1 %v8948_v43  ;;  %v8979_v43 = vld [vmem:[#allocation8 + $0x8] ss:$28 sps:$4 sm:$0xff]  }
 0x212   :  { %3080 = vmatpush1.bf16.msra.mxu0 %v8907_v44  ;;  %5837 = vmatpush1.bf16.msra.mxu1 %v8946_v46  ;;  %v8987_v46 = vld [vmem:[#allocation8 + $0x44] ss:$28 sps:$4 sm:$0xff]  }
 0x213   :  { %3081 = vmatprep.subr.bf16.mxu0 %v8915_v45  ;;  %5838 = vmatprep.subr.bf16.mxu1 %v8954_v47  ;;  %v8984_v45 = vld [vmem:[#allocation8 + $0x3f4] ss:$28 sps:$4 sm:$0xff]  }
 0x214   :  { %v8982_v47 = vld [vmem:[#allocation8 + $0x3f0] ss:$28 sps:$4 sm:$0xff]  }
 0x216   :  { %3082 = vmatpush1.bf16.msra.mxu0 %v8913_v49  ;;  %5839 = vmatpush1.bf16.msra.mxu1 %v8952_v51  ;;  %v8985_v49 = vld [vmem:[#allocation8 + $0x40] ss:$28 sps:$4 sm:$0xff]  }
 0x217   :  { %3083 = vmatprep.subr.bf16.mxu0 %v8921_v50  ;;  %5840 = vmatprep.subr.bf16.mxu1 %v8960_v52  ;;  %v8990_v50 = vld [vmem:[#allocation8 + $0x42c] ss:$28 sps:$4 sm:$0xff]   ;;  %v8993_v51 = vld [vmem:[#allocation8 + $0x7c] ss:$28 sps:$4 sm:$0xff]  }
 0x218   :  { %v8988_v52 = vld [vmem:[#allocation8 + $0x428] ss:$28 sps:$4 sm:$0xff]  }
 0x21a   :  { %3084 = vmatpush1.bf16.msra.mxu0 %v8919_v53  ;;  %5841 = vmatpush1.bf16.msra.mxu1 %v8958_v55  ;;  %v8991_v53 = vld [vmem:[#allocation8 + $0x78] ss:$28 sps:$4 sm:$0xff]  }
 0x21b   :  { %3085 = vmatprep.subr.bf16.mxu0 %v8927_v54  ;;  %5842 = vmatprep.subr.bf16.mxu1 %v8966_v56  ;;  %v8996_v54 = vld [vmem:[#allocation8 + $0x464] ss:$28 sps:$4 sm:$0xff]   ;;  %v8999_v55 = vld [vmem:[#allocation8 + $0xb4] ss:$28 sps:$4 sm:$0xff]  }
 0x21c   :  { %v8997_v56 = vld [vmem:[#allocation8 + $0xb0] ss:$28 sps:$4 sm:$0xff]  }
 0x21e   :  { %3086 = vmatpush1.bf16.msra.mxu0 %v8925_v57  ;;  %5843 = vmatpush1.bf16.msra.mxu1 %v8964_v59  ;;  %v9002_v57 = vld [vmem:[#allocation8 + $0x49c] ss:$28 sps:$4 sm:$0xff]  }
 0x21f   :  { %3096 = vmatprep.subr.bf16.mxu0 %v8933_v58  ;;  %5853 = vmatprep.subr.bf16.mxu1 %v8972_v60  ;;  %v9005_v58 = vld [vmem:[#allocation8 + $0xec] ss:$28 sps:$4 sm:$0xff]   ;;  %v9000_v59 = vld [vmem:[#allocation8 + $0x498] ss:$28 sps:$4 sm:$0xff]  }
 0x220   :  { %v9003_v60 = vld [vmem:[#allocation8 + $0xe8] ss:$28 sps:$4 sm:$0xff]  }
 0x221   :  { %3088 = vmatmul.mubr.bf16.vlgmr.msra.gmra.mrb[4].mxu0 %v9904_v19  ;;  %v9939_v19 = vld [vmem:[#allocation7] sm:$0xff] }
 0x222   :  { %3097 = vmatpush1.bf16.msra.mxu0 %v8931_v61  ;;  %3128 = vmatprep.mubr.bf16.mxu0 %v9744_v27  ;;  %v572_v11 = vrot.slane %v9939_v19, %v571_v48  ;;  %v576_v12 = vrot.slane %v9939_v19, %v575_v8  ;;  %v584_v14 = vrot.slane %v9939_v19, %v583_v9  ;;  %v9008_v61 = vld [vmem:[#allocation8 + $0x4d4] ss:$28 sps:$4 sm:$0xff]  }
 0x223   :  { %3098 = vmatprep.subr.bf16.mxu0 %v8939_v62  ;;  %v9011_v62 = vld [vmem:[#allocation8 + $0x124] ss:$28 sps:$4 sm:$0xff]  }
 0x226   :  { %3099 = vmatpush1.bf16.msra.mxu0 %v8937_v0  ;;  %v9006_v0 = vld [vmem:[#allocation8 + $0x4d0] ss:$28 sps:$4 sm:$0xff]  }
 0x227   :  { %3100 = vmatprep.subr.bf16.mxu0 %v8945_v1  ;;  %v9009_v1 = vld [vmem:[#allocation8 + $0x120] ss:$28 sps:$4 sm:$0xff]  }
 0x22a   :  { %3101 = vmatpush1.bf16.msra.mxu0 %v8943_v3  ;;  %v9014_v3 = vld [vmem:[#allocation8 + $0x50c] ss:$28 sps:$4 sm:$0xff]  }
 0x22b   :  { %3102 = vmatprep.subr.bf16.mxu0 %v8951_v4  ;;  %v9017_v4 = vld [vmem:[#allocation8 + $0x15c] ss:$28 sps:$4 sm:$0xff]  }
 0x22e   :  { %3103 = vmatpush1.bf16.msra.mxu0 %v8949_v10 }
 0x22f   :  { %3104 = vmatprep.subr.bf16.mxu0 %v8957_v7 }
 0x232   :  { %3105 = vmatpush1.bf16.msra.mxu0 %v8955_v5  ;;  %v9012_v5 = vld [vmem:[#allocation8 + $0x508] ss:$28 sps:$4 sm:$0xff]  }
 0x233   :  { %3106 = vmatprep.subr.bf16.mxu0 %v8963_v15  ;;  %v9015_v15 = vld [vmem:[#allocation8 + $0x158] ss:$28 sps:$4 sm:$0xff]  }
 0x234   :  { %v2802_v17 = vpop.f32.mrb[0].mxu0  ;;  %v9953_v18 = vpop.f32.mrb[0].mxu1 }
 0x235   :  { %v8259_v20 = vadd.f32 %v2802_v17, %v572_v11  ;;  %v2804_v21 = vpop.f32.mrb[1].mxu0  ;;  %v2968_v22 = vpop.f32.mrb[1].mxu1  ;;  %v9018_v17 = vld [vmem:[#allocation8 + $0x540] ss:$28 sps:$4 sm:$0xff]  }
 0x236   :  { %v8260_v23 = vadd.f32 %v2804_v21, %v576_v12  ;;  %v8262_v24 = vadd.f32 %v2968_v22, %v584_v14  ;;  %v2806_v25 = vpop.f32.mrb[2].mxu0  ;;  %v2970_v13 = vpop.f32.mrb[2].mxu1  ;;  %3107 = vmatpush1.bf16.msra.mxu0 %v8961_v30  ;;  %v9020_v14 = vld [vmem:[#allocation8 + $0x544] ss:$28 sps:$4 sm:$0xff]   ;;  %v9023_v30 = vld [vmem:[#allocation8 + $0x194] ss:$28 sps:$4 sm:$0xff]  }
 0x237   :  { %v3297_v29 = vmax.f32 %v8259_v20, 0.0  ;;  %v2807_v31 = vpop.f32.mrb[3].mxu0  ;;  %v2971_v32 = vpop.f32.mrb[3].mxu1  ;;  %3108 = vmatprep.subr.bf16.mxu0 %v8969_v16  ;;  %v9021_v20 = vld [vmem:[#allocation8 + $0x190] ss:$28 sps:$4 sm:$0xff]  }
 0x238   :  { %v3298_v34 = vmax.f32 %v8260_v23, 0.0  ;;  %v3300_v35 = vmax.f32 %v8262_v24, 0.0  ;;  %v9026_v21 = vld [vmem:[#allocation8 + $0x57c] ss:$28 sps:$4 sm:$0xff]   ;;  %v9029_v22 = vld [vmem:[#allocation8 + $0x1cc] ss:$28 sps:$4 sm:$0xff]  }
 0x239   :  { %v9957_v41 = vpack.c.bf16 %v3297_v29, %v3297_v29  ;;  %v9024_v23 = vld [vmem:[#allocation8 + $0x578] ss:$28 sps:$4 sm:$0xff]   ;;  %v9027_v24 = vld [vmem:[#allocation8 + $0x1c8] ss:$28 sps:$4 sm:$0xff]  }
 0x23a   :  { %v9955_v38 = vpack.c.bf16 %v3298_v34, %v3298_v34  ;;  %3109 = vmatpush1.bf16.msra.mxu0 %v8967_v26  ;;  %v9960_v44 = vpack.c.bf16 %v3300_v35, %v3300_v35  ;;  %v9032_v25 = vld [vmem:[#allocation8 + $0x5b4] ss:$28 sps:$4 sm:$0xff]   ;;  %v9035_v13 = vld [vmem:[#allocation8 + $0x204] ss:$28 sps:$4 sm:$0xff]   ;;  %v9038_v29 = vld [vmem:[#allocation8 + $0x5ec] ss:$28 sps:$4 sm:$0xff]  }
 0x23b   :  { %3110 = vmatprep.subr.bf16.mxu0 %v8975_v28  ;;  %v9030_v26 = vld [vmem:[#allocation8 + $0x5b0] ss:$28 sps:$4 sm:$0xff]   ;;  %v9033_v28 = vld [vmem:[#allocation8 + $0x200] ss:$28 sps:$4 sm:$0xff]   ;;  %v9036_v32 = vld [vmem:[#allocation8 + $0x5e8] ss:$28 sps:$4 sm:$0xff]  }
 0x23c   :  { %5844 = vmatprep.mubr.bf16.mxu1 %v9955_v38  ;;  %v9041_v31 = vld [vmem:[#allocation8 + $0x23c] ss:$28 sps:$4 sm:$0xff]   ;;  %v9044_v35 = vld [vmem:[#allocation8 + $0x624] ss:$28 sps:$4 sm:$0xff]  }
 0x23d   :  { %5845 = vmatmul.mubr.bf16.vlgmr.msra.gmra.mrb[20].mxu1 %v9957_v41  ;;  %v9039_v34 = vld [vmem:[#allocation8 + $0x238] ss:$28 sps:$4 sm:$0xff]  }
 0x23e   :  { %5854 = vmatpush1.bf16.msra.mxu1 %v8970_v36  ;;  %3111 = vmatpush1.bf16.msra.mxu0 %v8973_v37  ;;  %v9047_v36 = vld [vmem:[#allocation8 + $0x274] ss:$28 sps:$4 sm:$0xff]   ;;  %v9042_v37 = vld [vmem:[#allocation8 + $0x620] ss:$28 sps:$4 sm:$0xff]  }
 0x23f   :  { %5885 = vmatprep.mubr.bf16.mxu1 %v9960_v44  ;;  %5855 = vmatprep.subr.bf16.mxu1 %v8978_v39  ;;  %v9045_v39 = vld [vmem:[#allocation8 + $0x270] ss:$28 sps:$4 sm:$0xff]  }
 0x240   :  { %5976 = vmatprep.subr.bf16.mxu0 %v8981_v40  ;;  %v9050_v40 = vld [vmem:[#allocation8 + $0x65c] ss:$28 sps:$4 sm:$0xff]  }
 0x241   :  { %3129 = vmatmul.mubr.bf16.vlgmr.msra.gmra.mrb[4].mxu0 %v9930_v63  ;;  %v8994_v63 = vld [vmem:[#allocation8 + $0x460] ss:$28 sps:$4 sm:$0xff]  }
 0x242   :  { %5856 = vmatpush1.bf16.msra.mxu1 %v8976_v42  ;;  %5977 = vmatpush1.bf16.msra.mxu0 %v8979_v43  ;;  %v579_v42 = vsub.s32 2, %v9937_v6  ;;  %v9053_v43 = vld [vmem:[#allocation8 + $0x2ac] ss:$28 sps:$4 sm:$0xff]  }
 0x243   :  { %6008 = vmatprep.mubr.bf16.mxu0 %v9955_v38  ;;  %5857 = vmatprep.subr.bf16.mxu1 %v8984_v45  ;;  %v595_v45 = vsub.s32 6, %v9937_v6 }
 0x244   :  { %5978 = vmatprep.subr.bf16.mxu0 %v8987_v46  ;;  %v9048_v46 = vld [vmem:[#allocation8 + $0x658] ss:$28 sps:$4 sm:$0xff]  }
 0x246   :  { %5858 = vmatpush1.bf16.msra.mxu1 %v8982_v47  ;;  %5979 = vmatpush1.bf16.msra.mxu0 %v8985_v49  ;;  %v9051_v47 = vld [vmem:[#allocation8 + $0x2a8] ss:$28 sps:$4 sm:$0xff]   ;;  %v9056_v49 = vld [vmem:[#allocation8 + $0x694] ss:$28 sps:$4 sm:$0xff]  }
 0x247   :  { %5859 = vmatprep.subr.bf16.mxu1 %v8990_v50  ;;  %5980 = vmatprep.subr.bf16.mxu0 %v8993_v51  ;;  %v580_v50 = vrot.slane %v9939_v19, %v579_v42  ;;  %v9059_v51 = vld [vmem:[#allocation8 + $0x2e4] ss:$28 sps:$4 sm:$0xff]  }
 0x24a   :  { %5860 = vmatpush1.bf16.msra.mxu1 %v8988_v52  ;;  %5981 = vmatpush1.bf16.msra.mxu0 %v8991_v53  ;;  %v596_v52 = vrot.slane %v9939_v19, %v595_v45  ;;  %v9054_v53 = vld [vmem:[#allocation8 + $0x690] ss:$28 sps:$4 sm:$0xff]  }
 0x24b   :  { %5861 = vmatprep.subr.bf16.mxu1 %v8996_v54  ;;  %5982 = vmatprep.subr.bf16.mxu0 %v8999_v55  ;;  %v9057_v54 = vld [vmem:[#allocation8 + $0x2e0] ss:$28 sps:$4 sm:$0xff]   ;;  %v9062_v55 = vld [vmem:[#allocation8 + $0x6cc] ss:$28 sps:$4 sm:$0xff]  }
 0x24e   :  { %5862 = vmatpush1.bf16.msra.mxu1 %v8994_v63  ;;  %5983 = vmatpush1.bf16.msra.mxu0 %v8997_v56  ;;  %v8261_v63 = vadd.f32 %v9953_v18, %v580_v50  ;;  %v9065_v56 = vld [vmem:[#allocation8 + $0x31c] ss:$28 sps:$4 sm:$0xff]   ;;  %v9066_v18 = vld [vmem:[#allocation8 + $0x350] ss:$28 sps:$4 sm:$0xff]  }
 0x24f   :  { %5863 = vmatprep.subr.bf16.mxu1 %v9002_v57  ;;  %5984 = vmatprep.subr.bf16.mxu0 %v9005_v58  ;;  %v9060_v57 = vld [vmem:[#allocation8 + $0x6c8] ss:$28 sps:$4 sm:$0xff]   ;;  %v9063_v58 = vld [vmem:[#allocation8 + $0x318] ss:$28 sps:$4 sm:$0xff]  }
 0x252   :  { %5864 = vmatpush1.bf16.msra.mxu1 %v9000_v59  ;;  %5985 = vmatpush1.bf16.msra.mxu0 %v9003_v60 }
 0x253   :  { %5865 = vmatprep.subr.bf16.mxu1 %v9008_v61  ;;  %5986 = vmatprep.subr.bf16.mxu0 %v9011_v62  ;;  %v9068_v61 = vld [vmem:[#allocation8 + $0x354] ss:$28 sps:$4 sm:$0xff]  }
 0x254   :  { %v7990_v10 = vpop.f32.mrb[4].mxu1 }
 0x255   :  { %v7991_v7 = vpop.f32.mrb[5].mxu1 }
 0x256   :  { %5866 = vmatpush1.bf16.msra.mxu1 %v9006_v0  ;;  %5987 = vmatpush1.bf16.msra.mxu0 %v9009_v1  ;;  %v9966_v11 = vadd.f32 %v7991_v7, %v7990_v10  ;;  %v7993_v12 = vpop.f32.mrb[6].mxu1  ;;  %v9119_v1 = vld [vmem:[#allocation8 + $0x704] ss:$28 sps:$4 sm:$0xff]  }
 0x257   :  { %5867 = vmatprep.subr.bf16.mxu1 %v9014_v3  ;;  %5988 = vmatprep.subr.bf16.mxu0 %v9017_v4  ;;  %v7994_v16 = vpop.f32.mrb[7].mxu1  ;;  %v3299_v3 = vmax.f32 %v8261_v63, 0.0  ;;  %v9117_v7 = vld [vmem:[#allocation8 + $0x700] ss:$28 sps:$4 sm:$0xff]   ;;  %v9069_v12 = vld [vmem:[#allocation8 + $0x388] ss:$28 sps:$4 sm:$0xff]  }
 0x258   :  { %v3172_v59 = vadd.f32 %v9966_v11, %v596_v52  ;;  %v9131_v16 = vld [vmem:[#allocation8 + $0x774] ss:$28 sps:$4 sm:$0xff]   ;;  %v9167_v63 = vld [vmem:[#allocation8 + $0x8c4] ss:$28 sps:$4 sm:$0xff]  }
 0x259   :  { %v9980_v11 = vpack.c.bf16 %v3299_v3, %v3299_v3  ;;  %v9092_v52 = vld [vmem:[#allocation8 + $0x514] ss:$28 sps:$4 sm:$0xff]  }
 0x25a   :  { %5868 = vmatpush1.bf16.msra.mxu1 %v9012_v5  ;;  %5989 = vmatpush1.bf16.msra.mxu0 %v9015_v15  ;;  %v9071_v5 = vld [vmem:[#allocation8 + $0x38c] ss:$28 sps:$4 sm:$0xff]   ;;  %v9125_v15 = vld [vmem:[#allocation8 + $0x73c] ss:$28 sps:$4 sm:$0xff]  }
 0x25b   :  { %5869 = vmatprep.subr.bf16.mxu1 %v9020_v14  ;;  %5990 = vmatprep.subr.bf16.mxu0 %v9023_v30  ;;  %v9074_v14 = vld [vmem:[#allocation8 + $0x3c4] ss:$28 sps:$4 sm:$0xff]   ;;  %v9123_v30 = vld [vmem:[#allocation8 + $0x738] ss:$28 sps:$4 sm:$0xff]   ;;  %v9177_v3 = vld [vmem:[#allocation8 + $0x930] ss:$28 sps:$4 sm:$0xff]  }
 0x25e   :  { %5870 = vmatpush1.bf16.msra.mxu1 %v9018_v17  ;;  %5991 = vmatpush1.bf16.msra.mxu0 %v9021_v20  ;;  %v9072_v17 = vld [vmem:[#allocation8 + $0x3c0] ss:$28 sps:$4 sm:$0xff]  }
 0x25f   :  { %5871 = vmatprep.subr.bf16.mxu1 %v9026_v21  ;;  %5992 = vmatprep.subr.bf16.mxu0 %v9029_v22  ;;  %v9077_v20 = vld [vmem:[#allocation8 + $0x3fc] ss:$28 sps:$4 sm:$0xff]   ;;  %v9129_v21 = vld [vmem:[#allocation8 + $0x770] ss:$28 sps:$4 sm:$0xff]  }
 0x260   :  { %v9137_v22 = vld [vmem:[#allocation8 + $0x7ac] ss:$28 sps:$4 sm:$0xff]  }
 0x262   :  { %5872 = vmatpush1.bf16.msra.mxu1 %v9024_v23  ;;  %5993 = vmatpush1.bf16.msra.mxu0 %v9027_v24  ;;  %v9075_v23 = vld [vmem:[#allocation8 + $0x3f8] ss:$28 sps:$4 sm:$0xff]  }
 0x263   :  { %5873 = vmatprep.subr.bf16.mxu1 %v9032_v25  ;;  %5994 = vmatprep.subr.bf16.mxu0 %v9035_v13  ;;  %v9080_v24 = vld [vmem:[#allocation8 + $0x434] ss:$28 sps:$4 sm:$0xff]   ;;  %v9135_v25 = vld [vmem:[#allocation8 + $0x7a8] ss:$28 sps:$4 sm:$0xff]  }
 0x264   :  { %v9143_v13 = vld [vmem:[#allocation8 + $0x7e4] ss:$28 sps:$4 sm:$0xff]  }
 0x266   :  { %5874 = vmatpush1.bf16.msra.mxu1 %v9030_v26  ;;  %5995 = vmatpush1.bf16.msra.mxu0 %v9033_v28  ;;  %v9078_v26 = vld [vmem:[#allocation8 + $0x430] ss:$28 sps:$4 sm:$0xff]  }
 0x267   :  { %5875 = vmatprep.subr.bf16.mxu1 %v9038_v29  ;;  %5996 = vmatprep.subr.bf16.mxu0 %v9041_v31  ;;  %v9083_v28 = vld [vmem:[#allocation8 + $0x46c] ss:$28 sps:$4 sm:$0xff]   ;;  %v9141_v29 = vld [vmem:[#allocation8 + $0x7e0] ss:$28 sps:$4 sm:$0xff]  }
 0x268   :  { %v9149_v31 = vld [vmem:[#allocation8 + $0x81c] ss:$28 sps:$4 sm:$0xff]  }
 0x26a   :  { %5876 = vmatpush1.bf16.msra.mxu1 %v9036_v32  ;;  %5997 = vmatpush1.bf16.msra.mxu0 %v9039_v34  ;;  %v9081_v32 = vld [vmem:[#allocation8 + $0x468] ss:$28 sps:$4 sm:$0xff]  }
 0x26b   :  { %5877 = vmatprep.subr.bf16.mxu1 %v9044_v35  ;;  %5998 = vmatprep.subr.bf16.mxu0 %v9047_v36  ;;  %v9086_v34 = vld [vmem:[#allocation8 + $0x4a4] ss:$28 sps:$4 sm:$0xff]   ;;  %v9147_v35 = vld [vmem:[#allocation8 + $0x818] ss:$28 sps:$4 sm:$0xff]  }
 0x26c   :  { %v9155_v36 = vld [vmem:[#allocation8 + $0x854] ss:$28 sps:$4 sm:$0xff]  }
 0x26e   :  { %5878 = vmatpush1.bf16.msra.mxu1 %v9042_v37  ;;  %5999 = vmatpush1.bf16.msra.mxu0 %v9045_v39  ;;  %v9084_v37 = vld [vmem:[#allocation8 + $0x4a0] ss:$28 sps:$4 sm:$0xff]  }
 0x26f   :  { %5879 = vmatprep.subr.bf16.mxu1 %v9050_v40  ;;  %6000 = vmatprep.subr.bf16.mxu0 %v9053_v43  ;;  %v9089_v39 = vld [vmem:[#allocation8 + $0x4dc] ss:$28 sps:$4 sm:$0xff]   ;;  %v9153_v40 = vld [vmem:[#allocation8 + $0x850] ss:$28 sps:$4 sm:$0xff]  }
 0x272   :  { %5880 = vmatpush1.bf16.msra.mxu1 %v9048_v46  ;;  %6001 = vmatpush1.bf16.msra.mxu0 %v9051_v47  ;;  %v9161_v46 = vld [vmem:[#allocation8 + $0x88c] ss:$28 sps:$4 sm:$0xff]  }
 0x273   :  { %5881 = vmatprep.subr.bf16.mxu1 %v9056_v49  ;;  %6002 = vmatprep.subr.bf16.mxu0 %v9059_v51  ;;  %v9087_v49 = vld [vmem:[#allocation8 + $0x4d8] ss:$28 sps:$4 sm:$0xff]  }
 0x274   :  { %v8012_v60 = vpop.f32.mrb[8].mxu1 }
 0x275   :  { %v8013_v62 = vpop.f32.mrb[9].mxu1 }
 0x276   :  { %5882 = vmatpush1.bf16.msra.mxu1 %v9054_v53  ;;  %6003 = vmatpush1.bf16.msra.mxu0 %v9057_v54  ;;  %v8014_v19 = vadd.f32 %v8013_v62, %v8012_v60  ;;  %v8015_v0 = vpop.f32.mrb[10].mxu1  ;;  %v9159_v54 = vld [vmem:[#allocation8 + $0x888] ss:$28 sps:$4 sm:$0xff]   ;;  %v9171_v62 = vld [vmem:[#allocation8 + $0x8f8] ss:$28 sps:$4 sm:$0xff]  }
 0x277   :  { %5883 = vmatprep.subr.bf16.mxu1 %v9062_v55  ;;  %6004 = vmatprep.subr.bf16.mxu0 %v9065_v56  ;;  %v8016_v4 = vpop.f32.mrb[11].mxu1  ;;  %v9090_v56 = vld [vmem:[#allocation8 + $0x510] ss:$28 sps:$4 sm:$0xff]   ;;  %v9093_v60 = vld [vmem:[#allocation8 + $0x548] ss:$28 sps:$4 sm:$0xff]  }
 0x278   :  { %v9978_v10 = vadd.f32 %v8014_v19, %v3172_v59  ;;  %v9173_v59 = vld [vmem:[#allocation8 + $0x8fc] ss:$28 sps:$4 sm:$0xff]   ;;  %v9179_v19 = vld [vmem:[#allocation8 + $0x934] ss:$28 sps:$4 sm:$0xff]   ;;  %v9185_v4 = vld [vmem:[#allocation8 + $0x96c] ss:$28 sps:$4 sm:$0xff]  }
 0x279   :  { %v9096_v0 = vld [vmem:[#allocation8 + $0x580] ss:$28 sps:$4 sm:$0xff]  }
 0x27a   :  { %5884 = vmatpush1.bf16.msra.mxu1 %v9060_v57  ;;  %6005 = vmatpush1.bf16.msra.mxu0 %v9063_v58  ;;  %v9095_v57 = vld [vmem:[#allocation8 + $0x54c] ss:$28 sps:$4 sm:$0xff]   ;;  %v9165_v58 = vld [vmem:[#allocation8 + $0x8c0] ss:$28 sps:$4 sm:$0xff]  }
 0x27b   :  { %6006 = vmatprep.subr.bf16.mxu0 %v9068_v61  ;;  %5894 = vmatprep.subr.bf16.mxu1 %v9119_v1  ;;  %v9098_v61 = vld [vmem:[#allocation8 + $0x584] ss:$28 sps:$4 sm:$0xff]   ;;  %v9101_v1 = vld [vmem:[#allocation8 + $0x5bc] ss:$28 sps:$4 sm:$0xff]  }
 0x27d   :  { %5886 = vmatmul.mubr.bf16.vlgmr.msra.gmra.mrb[20].mxu1 %v9980_v11 }
 0x27e   :  { %6007 = vmatpush1.bf16.msra.mxu0 %v9066_v18  ;;  %5895 = vmatpush1.bf16.msra.mxu1 %v9117_v7  ;;  %v9099_v18 = vld [vmem:[#allocation8 + $0x5b8] ss:$28 sps:$4 sm:$0xff]   ;;  %v9183_v7 = vld [vmem:[#allocation8 + $0x968] ss:$28 sps:$4 sm:$0xff]  }
 0x27f   :  { %6017 = vmatprep.subr.bf16.mxu0 %v9071_v5  ;;  %5896 = vmatprep.subr.bf16.mxu1 %v9125_v15  ;;  %v9191_v5 = vld [vmem:[#allocation8 + $0x9a4] ss:$28 sps:$4 sm:$0xff]   ;;  %v9102_v15 = vld [vmem:[#allocation8 + $0x5f0] ss:$28 sps:$4 sm:$0xff]  }
 0x281   :  { %6009 = vmatmul.mubr.bf16.vlgmr.msra.gmra.mrb[8].mxu0 %v9957_v41 }
 0x282   :  { %6018 = vmatpush1.bf16.msra.mxu0 %v9069_v12  ;;  %6049 = vmatprep.mubr.bf16.mxu0 %v9960_v44  ;;  %v9107_v12 = vld [vmem:[#allocation8 + $0x62c] ss:$28 sps:$4 sm:$0xff]  }
 0x283   :  { %6019 = vmatprep.subr.bf16.mxu0 %v9074_v14  ;;  %5897 = vmatpush1.bf16.msra.mxu1 %v9123_v30  ;;  %v9189_v14 = vld [vmem:[#allocation8 + $0x9a0] ss:$28 sps:$4 sm:$0xff]  }
 0x284   :  { %5898 = vmatprep.subr.bf16.mxu1 %v9131_v16  ;;  %v9197_v30 = vld [vmem:[#allocation8 + $0x9dc] ss:$28 sps:$4 sm:$0xff]   ;;  %v9105_v16 = vld [vmem:[#allocation8 + $0x628] ss:$28 sps:$4 sm:$0xff]  }
 0x286   :  { %6020 = vmatpush1.bf16.msra.mxu0 %v9072_v17  ;;  %v9110_v17 = vld [vmem:[#allocation8 + $0x664] ss:$28 sps:$4 sm:$0xff]  }
 0x287   :  { %6021 = vmatprep.subr.bf16.mxu0 %v9077_v20  ;;  %5899 = vmatpush1.bf16.msra.mxu1 %v9129_v21  ;;  %v9195_v20 = vld [vmem:[#allocation8 + $0x9d8] ss:$28 sps:$4 sm:$0xff]  }
 0x288   :  { %5900 = vmatprep.subr.bf16.mxu1 %v9137_v22  ;;  %v9203_v21 = vld [vmem:[#allocation8 + $0xa14] ss:$28 sps:$4 sm:$0xff]   ;;  %v9108_v22 = vld [vmem:[#allocation8 + $0x660] ss:$28 sps:$4 sm:$0xff]  }
 0x28a   :  { %6022 = vmatpush1.bf16.msra.mxu0 %v9075_v23  ;;  %v9113_v23 = vld [vmem:[#allocation8 + $0x69c] ss:$28 sps:$4 sm:$0xff]  }
 0x28b   :  { %6023 = vmatprep.subr.bf16.mxu0 %v9080_v24  ;;  %5901 = vmatpush1.bf16.msra.mxu1 %v9135_v25  ;;  %v9201_v24 = vld [vmem:[#allocation8 + $0xa10] ss:$28 sps:$4 sm:$0xff]  }
 0x28c   :  { %5902 = vmatprep.subr.bf16.mxu1 %v9143_v13  ;;  %v9209_v13 = vld [vmem:[#allocation8 + $0xa4c] ss:$28 sps:$4 sm:$0xff]  }
 0x28e   :  { %6024 = vmatpush1.bf16.msra.mxu0 %v9078_v26 }
 0x28f   :  { %6025 = vmatprep.subr.bf16.mxu0 %v9083_v28  ;;  %5903 = vmatpush1.bf16.msra.mxu1 %v9141_v29  ;;  %v9111_v29 = vld [vmem:[#allocation8 + $0x698] ss:$28 sps:$4 sm:$0xff]  }
 0x290   :  { %5904 = vmatprep.subr.bf16.mxu1 %v9149_v31 }
 0x292   :  { %6026 = vmatpush1.bf16.msra.mxu0 %v9081_v32  ;;  %v9116_v32 = vld [vmem:[#allocation8 + $0x6d4] ss:$28 sps:$4 sm:$0xff]  }
 0x293   :  { %6027 = vmatprep.subr.bf16.mxu0 %v9086_v34  ;;  %5905 = vmatpush1.bf16.msra.mxu1 %v9147_v35  ;;  %v9207_v34 = vld [vmem:[#allocation8 + $0xa48] ss:$28 sps:$4 sm:$0xff]  }
 0x294   :  { %v8034_v43 = vpop.f32.mrb[12].mxu1  ;;  %5906 = vmatprep.subr.bf16.mxu1 %v9155_v36  ;;  %v9215_v36 = vld [vmem:[#allocation8 + $0xa84] ss:$28 sps:$4 sm:$0xff]  }
 0x295   :  { %v8035_v47 = vpop.f32.mrb[13].mxu1 }
 0x296   :  { %6028 = vmatpush1.bf16.msra.mxu0 %v9084_v37  ;;  %v8036_v50 = vadd.f32 %v8035_v47, %v8034_v43  ;;  %v8037_v51 = vpop.f32.mrb[14].mxu1  ;;  %v9114_v37 = vld [vmem:[#allocation8 + $0x6d0] ss:$28 sps:$4 sm:$0xff]   ;;  %v9128_v43 = vld [vmem:[#allocation8 + $0x744] ss:$28 sps:$4 sm:$0xff]  }
 0x297   :  { %6029 = vmatprep.subr.bf16.mxu0 %v9089_v39  ;;  %v8038_v53 = vpop.f32.mrb[15].mxu1  ;;  %5907 = vmatpush1.bf16.msra.mxu1 %v9153_v40  ;;  %v9122_v39 = vld [vmem:[#allocation8 + $0x70c] ss:$28 sps:$4 sm:$0xff]   ;;  %v9134_v47 = vld [vmem:[#allocation8 + $0x77c] ss:$28 sps:$4 sm:$0xff]  }
 0x298   :  { %v3252_v55 = vadd.f32 %v8036_v50, %v9978_v10  ;;  %5908 = vmatprep.subr.bf16.mxu1 %v9161_v46  ;;  %v9104_v10 = vld [vmem:[#allocation8 + $0x5f4] ss:$28 sps:$4 sm:$0xff]   ;;  %v9120_v40 = vld [vmem:[#allocation8 + $0x708] ss:$28 sps:$4 sm:$0xff]   ;;  %v9126_v46 = vld [vmem:[#allocation8 + $0x740] ss:$28 sps:$4 sm:$0xff]  }
 0x299   :  { %v9140_v50 = vld [vmem:[#allocation8 + $0x7b4] ss:$28 sps:$4 sm:$0xff]   ;;  %v9144_v53 = vld [vmem:[#allocation8 + $0x7e8] ss:$28 sps:$4 sm:$0xff]  }
 0x29a   :  { %6030 = vmatpush1.bf16.msra.mxu0 %v9087_v49  ;;  %v9132_v49 = vld [vmem:[#allocation8 + $0x778] ss:$28 sps:$4 sm:$0xff]   ;;  %v9138_v51 = vld [vmem:[#allocation8 + $0x7b0] ss:$28 sps:$4 sm:$0xff]  }
 0x29b   :  { %6031 = vmatprep.subr.bf16.mxu0 %v9092_v52  ;;  %5909 = vmatpush1.bf16.msra.mxu1 %v9159_v54  ;;  %v9146_v52 = vld [vmem:[#allocation8 + $0x7ec] ss:$28 sps:$4 sm:$0xff]   ;;  %v9152_v54 = vld [vmem:[#allocation8 + $0x824] ss:$28 sps:$4 sm:$0xff]  }
 0x29c   :  { %5910 = vmatprep.subr.bf16.mxu1 %v9167_v63  ;;  %v9158_v63 = vld [vmem:[#allocation8 + $0x85c] ss:$28 sps:$4 sm:$0xff]  }
 0x29e   :  { %6032 = vmatpush1.bf16.msra.mxu0 %v9090_v56  ;;  %v9156_v56 = vld [vmem:[#allocation8 + $0x858] ss:$28 sps:$4 sm:$0xff]  }
 0x29f   :  { %6033 = vmatprep.subr.bf16.mxu0 %v9095_v57  ;;  %5911 = vmatpush1.bf16.msra.mxu1 %v9165_v58  ;;  %v9164_v57 = vld [vmem:[#allocation8 + $0x894] ss:$28 sps:$4 sm:$0xff]  }
 0x2a0   :  { %5912 = vmatprep.subr.bf16.mxu1 %v9173_v59  ;;  %v9162_v58 = vld [vmem:[#allocation8 + $0x890] ss:$28 sps:$4 sm:$0xff]  }
 0x2a1   :  { %v9170_v59 = vld [vmem:[#allocation8 + $0x8cc] ss:$28 sps:$4 sm:$0xff]  }
 0x2a2   :  { %6034 = vmatpush1.bf16.msra.mxu0 %v9093_v60  ;;  %v9168_v60 = vld [vmem:[#allocation8 + $0x8c8] ss:$28 sps:$4 sm:$0xff]  }
 0x2a3   :  { %6035 = vmatprep.subr.bf16.mxu0 %v9098_v61  ;;  %5913 = vmatpush1.bf16.msra.mxu1 %v9171_v62  ;;  %v9176_v61 = vld [vmem:[#allocation8 + $0x904] ss:$28 sps:$4 sm:$0xff]  }
 0x2a4   :  { %5914 = vmatprep.subr.bf16.mxu1 %v9179_v19  ;;  %v9174_v62 = vld [vmem:[#allocation8 + $0x900] ss:$28 sps:$4 sm:$0xff]  }
 0x2a5   :  { %v9182_v19 = vld [vmem:[#allocation8 + $0x93c] ss:$28 sps:$4 sm:$0xff]  }
 0x2a6   :  { %6036 = vmatpush1.bf16.msra.mxu0 %v9096_v0  ;;  %v9180_v0 = vld [vmem:[#allocation8 + $0x938] ss:$28 sps:$4 sm:$0xff]  }
 0x2a7   :  { %6037 = vmatprep.subr.bf16.mxu0 %v9101_v1  ;;  %5915 = vmatpush1.bf16.msra.mxu1 %v9177_v3  ;;  %v9188_v1 = vld [vmem:[#allocation8 + $0x974] ss:$28 sps:$4 sm:$0xff]  }
 0x2a8   :  { %5916 = vmatprep.subr.bf16.mxu1 %v9185_v4  ;;  %v9186_v3 = vld [vmem:[#allocation8 + $0x970] ss:$28 sps:$4 sm:$0xff]  }
 0x2a9   :  { %v9194_v4 = vld [vmem:[#allocation8 + $0x9ac] ss:$28 sps:$4 sm:$0xff]  }
 0x2aa   :  { %6038 = vmatpush1.bf16.msra.mxu0 %v9099_v18  ;;  %v9192_v18 = vld [vmem:[#allocation8 + $0x9a8] ss:$28 sps:$4 sm:$0xff]  }
 0x2ab   :  { %6039 = vmatprep.subr.bf16.mxu0 %v9104_v10  ;;  %5917 = vmatpush1.bf16.msra.mxu1 %v9183_v7  ;;  %v9200_v10 = vld [vmem:[#allocation8 + $0x9e4] ss:$28 sps:$4 sm:$0xff]  }
 0x2ac   :  { %5918 = vmatprep.subr.bf16.mxu1 %v9191_v5  ;;  %v9198_v7 = vld [vmem:[#allocation8 + $0x9e0] ss:$28 sps:$4 sm:$0xff]  }
 0x2ad   :  { %v9206_v5 = vld [vmem:[#allocation8 + $0xa1c] ss:$28 sps:$4 sm:$0xff]  }
 0x2ae   :  { %6040 = vmatpush1.bf16.msra.mxu0 %v9102_v15  ;;  %v9204_v15 = vld [vmem:[#allocation8 + $0xa18] ss:$28 sps:$4 sm:$0xff]  }
 0x2af   :  { %6041 = vmatprep.subr.bf16.mxu0 %v9107_v12  ;;  %5919 = vmatpush1.bf16.msra.mxu1 %v9189_v14  ;;  %v9212_v12 = vld [vmem:[#allocation8 + $0xa54] ss:$28 sps:$4 sm:$0xff]  }
 0x2b0   :  { %5920 = vmatprep.subr.bf16.mxu1 %v9197_v30  ;;  %v9210_v14 = vld [vmem:[#allocation8 + $0xa50] ss:$28 sps:$4 sm:$0xff]  }
 0x2b1   :  { %v9218_v30 = vld [vmem:[#allocation8 + $0xa8c] ss:$28 sps:$4 sm:$0xff]  }
 0x2b2   :  { %6042 = vmatpush1.bf16.msra.mxu0 %v9105_v16  ;;  %v587_v16 = vsub.s32 4, %v9937_v6 }
 0x2b3   :  { %6043 = vmatprep.subr.bf16.mxu0 %v9110_v17  ;;  %5921 = vmatpush1.bf16.msra.mxu1 %v9195_v20  ;;  %v591_v17 = vsub.s32 5, %v9937_v6  ;;  %v9546_v20 = vld [vmem:[#allocation7] sm:$0xff] }
 0x2b4   :  { %v3291_v25 = vpop.f32.mrb[16].mxu1  ;;  %5922 = vmatprep.subr.bf16.mxu1 %v9203_v21  ;;  %v588_v21 = vrot.slane %v9546_v20, %v587_v16 }
 0x2b5   :  { %v9986_v26 = vadd.f32 %v3291_v25, %v3252_v55  ;;  %v8217_v28 = vpop.f32.mrb[17].mxu1  ;;  %v9150_v55 = vld [vmem:[#allocation8 + $0x820] ss:$28 sps:$4 sm:$0xff]  }
 0x2b6   :  { %6044 = vmatpush1.bf16.msra.mxu0 %v9108_v22  ;;  %v3294_v31 = vpop.f32.mrb[18].mxu1  ;;  %v592_v22 = vrot.slane %v9546_v20, %v591_v17  ;;  %v9265_v20 = vld [vmem:[#allocation8 + $0x18] ss:$28 sps:$4 sm:$0xff]  }
 0x2b7   :  { %6045 = vmatprep.subr.bf16.mxu0 %v9113_v23  ;;  %5923 = vmatpush1.bf16.msra.mxu1 %v9201_v24  ;;  %v8218_v35 = vpop.f32.mrb[19].mxu1 }
 0x2b8   :  { %5924 = vmatprep.subr.bf16.mxu1 %v9209_v13  ;;  %v9213_v35 = vld [vmem:[#allocation8 + $0xa80] ss:$28 sps:$4 sm:$0xff]  }
 0x2ba   :  { %6046 = vmatpush1.bf16.msra.mxu0 %v9111_v29 }
 0x2bb   :  { %6047 = vmatprep.subr.bf16.mxu0 %v9116_v32  ;;  %5925 = vmatpush1.bf16.msra.mxu1 %v9207_v34 }
 0x2bc   :  { %5935 = vmatprep.subr.bf16.mxu1 %v9215_v36  ;;  %v9216_v36 = vld [vmem:[#allocation8 + $0xa88] ss:$28 sps:$4 sm:$0xff]  }
 0x2be   :  { %6048 = vmatpush1.bf16.msra.mxu0 %v9114_v37 }
 0x2bf   :  { %6058 = vmatprep.subr.bf16.mxu0 %v9122_v39  ;;  %v9221_v39 = vld [vmem:[#allocation8 + $0xabc] ss:$28 sps:$4 sm:$0xff]  }
 0x2c1   :  { %6050 = vmatmul.mubr.bf16.vlgmr.msra.gmra.mrb[8].mxu0 %v9980_v11 }
 0x2c2   :  { %6059 = vmatpush1.bf16.msra.mxu0 %v9120_v40  ;;  %v9224_v40 = vld [vmem:[#allocation8 + $0xac4] ss:$28 sps:$4 sm:$0xff]  }
 0x2c3   :  { %6060 = vmatprep.subr.bf16.mxu0 %v9128_v43  ;;  %v9219_v43 = vld [vmem:[#allocation8 + $0xab8] ss:$28 sps:$4 sm:$0xff]  }
 0x2c6   :  { %6061 = vmatpush1.bf16.msra.mxu0 %v9126_v46  ;;  %v9222_v46 = vld [vmem:[#allocation8 + $0xac0] ss:$28 sps:$4 sm:$0xff]  }
 0x2c7   :  { %6062 = vmatprep.subr.bf16.mxu0 %v9134_v47  ;;  %v9227_v47 = vld [vmem:[#allocation8 + $0xaf4] ss:$28 sps:$4 sm:$0xff]  }
 0x2ca   :  { %6063 = vmatpush1.bf16.msra.mxu0 %v9132_v49  ;;  %v9230_v49 = vld [vmem:[#allocation8 + $0xafc] ss:$28 sps:$4 sm:$0xff]  }
 0x2cb   :  { %6064 = vmatprep.subr.bf16.mxu0 %v9140_v50  ;;  %v9225_v50 = vld [vmem:[#allocation8 + $0xaf0] ss:$28 sps:$4 sm:$0xff]  }
 0x2ce   :  { %6065 = vmatpush1.bf16.msra.mxu0 %v9138_v51  ;;  %v9228_v51 = vld [vmem:[#allocation8 + $0xaf8] ss:$28 sps:$4 sm:$0xff]  }
 0x2cf   :  { %6066 = vmatprep.subr.bf16.mxu0 %v9146_v52  ;;  %v9233_v52 = vld [vmem:[#allocation8 + $0xb2c] ss:$28 sps:$4 sm:$0xff]  }
 0x2d2   :  { %6067 = vmatpush1.bf16.msra.mxu0 %v9144_v53  ;;  %v9236_v53 = vld [vmem:[#allocation8 + $0xb34] ss:$28 sps:$4 sm:$0xff]  }
 0x2d3   :  { %6068 = vmatprep.subr.bf16.mxu0 %v9152_v54  ;;  %v9231_v54 = vld [vmem:[#allocation8 + $0xb28] ss:$28 sps:$4 sm:$0xff]  }
 0x2d6   :  { %6069 = vmatpush1.bf16.msra.mxu0 %v9150_v55  ;;  %v9234_v55 = vld [vmem:[#allocation8 + $0xb30] ss:$28 sps:$4 sm:$0xff]  }
 0x2d7   :  { %6070 = vmatprep.subr.bf16.mxu0 %v9158_v63  ;;  %v9239_v63 = vld [vmem:[#allocation8 + $0xb64] ss:$28 sps:$4 sm:$0xff]  }
 0x2da   :  { %6071 = vmatpush1.bf16.msra.mxu0 %v9156_v56  ;;  %v9242_v56 = vld [vmem:[#allocation8 + $0xb6c] ss:$28 sps:$4 sm:$0xff]  }
 0x2db   :  { %6072 = vmatprep.subr.bf16.mxu0 %v9164_v57  ;;  %v9237_v57 = vld [vmem:[#allocation8 + $0xb60] ss:$28 sps:$4 sm:$0xff]  }
 0x2de   :  { %6073 = vmatpush1.bf16.msra.mxu0 %v9162_v58  ;;  %v9240_v58 = vld [vmem:[#allocation8 + $0xb68] ss:$28 sps:$4 sm:$0xff]  }
 0x2df   :  { %6074 = vmatprep.subr.bf16.mxu0 %v9170_v59  ;;  %v9245_v59 = vld [vmem:[#allocation8 + $0xb9c] ss:$28 sps:$4 sm:$0xff]  }
 0x2e2   :  { %6075 = vmatpush1.bf16.msra.mxu0 %v9168_v60  ;;  %v9248_v60 = vld [vmem:[#allocation8 + $0xba4] ss:$28 sps:$4 sm:$0xff]  }
 0x2e3   :  { %6076 = vmatprep.subr.bf16.mxu0 %v9176_v61  ;;  %v9243_v61 = vld [vmem:[#allocation8 + $0xb98] ss:$28 sps:$4 sm:$0xff]  }
 0x2e6   :  { %6077 = vmatpush1.bf16.msra.mxu0 %v9174_v62  ;;  %v9246_v62 = vld [vmem:[#allocation8 + $0xba0] ss:$28 sps:$4 sm:$0xff]  }
 0x2e7   :  { %6078 = vmatprep.subr.bf16.mxu0 %v9182_v19  ;;  %v9251_v19 = vld [vmem:[#allocation8 + $0xbd4] ss:$28 sps:$4 sm:$0xff]  }
 0x2ea   :  { %6079 = vmatpush1.bf16.msra.mxu0 %v9180_v0  ;;  %v9254_v0 = vld [vmem:[#allocation8 + $0xbdc] ss:$28 sps:$4 sm:$0xff]  }
 0x2eb   :  { %6080 = vmatprep.subr.bf16.mxu0 %v9188_v1  ;;  %v9249_v1 = vld [vmem:[#allocation8 + $0xbd0] ss:$28 sps:$4 sm:$0xff]  }
 0x2ee   :  { %6081 = vmatpush1.bf16.msra.mxu0 %v9186_v3  ;;  %v9252_v3 = vld [vmem:[#allocation8 + $0xbd8] ss:$28 sps:$4 sm:$0xff]  }
 0x2ef   :  { %6082 = vmatprep.subr.bf16.mxu0 %v9194_v4  ;;  %v9257_v4 = vld [vmem:[#allocation8 + $0xc0c] ss:$28 sps:$4 sm:$0xff]  }
 0x2f2   :  { %6083 = vmatpush1.bf16.msra.mxu0 %v9192_v18  ;;  %v9260_v18 = vld [vmem:[#allocation8 + $0xc14] ss:$28 sps:$4 sm:$0xff]  }
 0x2f3   :  { %6084 = vmatprep.subr.bf16.mxu0 %v9200_v10  ;;  %v9255_v10 = vld [vmem:[#allocation8 + $0xc08] ss:$28 sps:$4 sm:$0xff]  }
 0x2f6   :  { %6085 = vmatpush1.bf16.msra.mxu0 %v9198_v7  ;;  %v9258_v7 = vld [vmem:[#allocation8 + $0xc10] ss:$28 sps:$4 sm:$0xff]  }
 0x2f7   :  { %6086 = vmatprep.subr.bf16.mxu0 %v9206_v5  ;;  %v3303_v5 = vmax.f32 %v9986_v26, 0.0  ;;  %v9266_v26 = vld [vmem:[#allocation8 + $0x48] ss:$28 sps:$4 sm:$0xff]  }
 0x2fa   :  { %6087 = vmatpush1.bf16.msra.mxu0 %v9204_v15  ;;  %v9263_v15 = vld [vmem:[#allocation8 + $0x14] ss:$28 sps:$4 sm:$0xff]  }
 0x2fb   :  { %6088 = vmatprep.subr.bf16.mxu0 %v9212_v12  ;;  %v9264_v12 = vld [vmem:[#allocation8 + $0x1d8] ss:$28 sps:$4 sm:$0xff]  }
 0x2fe   :  { %6089 = vmatpush1.bf16.msra.mxu0 %v9210_v14  ;;  %v9261_v14 = vld [vmem:[#allocation8 + $0x10] ss:$28 sps:$4 sm:$0xff]  }
 0x2ff   :  { %6099 = vmatprep.subr.bf16.mxu0 %v9218_v30  ;;  %v10006_v30 = vpack.c.bf16 %v3303_v5, %v3303_v5  ;;  %v9316_v5 = vld [vmem:[#allocation8 + $0x278] ss:$28 sps:$4 sm:$0xff]  }
 0x314   :  { %v3130_v23 = vpop.f32.mrb[4].mxu0 }
 0x315   :  { %v8263_v24 = vadd.f32 %v3130_v23, %v588_v21  ;;  %v3132_v25 = vpop.f32.mrb[5].mxu0  ;;  %v9268_v21 = vld [vmem:[#allocation8 + $0x4c] ss:$28 sps:$4 sm:$0xff]  }
 0x316   :  { %v8264_v13 = vadd.f32 %v3132_v25, %v592_v22  ;;  %v3134_v28 = vpop.f32.mrb[6].mxu0  ;;  %v9269_v22 = vld [vmem:[#allocation8 + $0x210] ss:$28 sps:$4 sm:$0xff]   ;;  %v9274_v25 = vld [vmem:[#allocation8 + $0x248] ss:$28 sps:$4 sm:$0xff]  }
 0x317   :  { %v3301_v29 = vmax.f32 %v8263_v24, 0.0  ;;  %v3135_v31 = vpop.f32.mrb[7].mxu0  ;;  %v9270_v23 = vld [vmem:[#allocation8 + $0x50] ss:$28 sps:$4 sm:$0xff]   ;;  %v9273_v24 = vld [vmem:[#allocation8 + $0x84] ss:$28 sps:$4 sm:$0xff]  }
 0x318   :  { %v3302_v32 = vmax.f32 %v8264_v13, 0.0  ;;  %v9271_v13 = vld [vmem:[#allocation8 + $0x80] ss:$28 sps:$4 sm:$0xff]   ;;  %v9275_v28 = vld [vmem:[#allocation8 + $0x88] ss:$28 sps:$4 sm:$0xff]  }
 0x319   :  { %v9997_v37 = vpack.c.bf16 %v3301_v29, %v3301_v29  ;;  %v9278_v29 = vld [vmem:[#allocation8 + $0xbc] ss:$28 sps:$4 sm:$0xff]  }
 0x31a   :  { %v9995_v34 = vpack.c.bf16 %v3302_v32, %v3302_v32  ;;  %v9279_v31 = vld [vmem:[#allocation8 + $0x280] ss:$28 sps:$4 sm:$0xff]   ;;  %v9276_v32 = vld [vmem:[#allocation8 + $0xb8] ss:$28 sps:$4 sm:$0xff]  }
 0x31c   :  { %5926 = vmatprep.mubr.bf16.mxu1 %v9995_v34  ;;  %6090 = vmatprep.mubr.bf16.mxu0 %v9995_v34 }
 0x31d   :  { %5927 = vmatmul.mubr.bf16.vlgmr.msra.gmra.mrb[20].mxu1 %v9997_v37  ;;  %6091 = vmatmul.mubr.bf16.vlgmr.msra.gmra.mrb[8].mxu0 %v9997_v37 }
 0x31e   :  { %5936 = vmatpush1.bf16.msra.mxu1 %v9213_v35  ;;  %6100 = vmatpush1.bf16.msra.mxu0 %v9216_v36  ;;  %v9280_v35 = vld [vmem:[#allocation8 + $0xc0] ss:$28 sps:$4 sm:$0xff]   ;;  %v9283_v36 = vld [vmem:[#allocation8 + $0xf4] ss:$28 sps:$4 sm:$0xff]  }
 0x31f   :  { %5937 = vmatprep.subr.bf16.mxu1 %v9221_v39  ;;  %6101 = vmatprep.subr.bf16.mxu0 %v9224_v40  ;;  %v9281_v39 = vld [vmem:[#allocation8 + $0xf0] ss:$28 sps:$4 sm:$0xff]   ;;  %v9285_v40 = vld [vmem:[#allocation8 + $0xf8] ss:$28 sps:$4 sm:$0xff]  }
 0x320   :  { %5967 = vmatprep.mubr.bf16.mxu1 %v9744_v27  ;;  %6131 = vmatprep.mubr.bf16.mxu0 %v9744_v27 }
 0x322   :  { %5938 = vmatpush1.bf16.msra.mxu1 %v9219_v43  ;;  %6102 = vmatpush1.bf16.msra.mxu0 %v9222_v46  ;;  %v9288_v43 = vld [vmem:[#allocation8 + $0x12c] ss:$28 sps:$4 sm:$0xff]  }
 0x323   :  { %5939 = vmatprep.subr.bf16.mxu1 %v9227_v47  ;;  %6103 = vmatprep.subr.bf16.mxu0 %v9230_v49  ;;  %v9289_v46 = vld [vmem:[#allocation8 + $0x2f0] ss:$28 sps:$4 sm:$0xff]   ;;  %v9286_v47 = vld [vmem:[#allocation8 + $0x128] ss:$28 sps:$4 sm:$0xff]  }
 0x324   :  { %v9290_v49 = vld [vmem:[#allocation8 + $0x130] ss:$28 sps:$4 sm:$0xff]  }
 0x326   :  { %5940 = vmatpush1.bf16.msra.mxu1 %v9225_v50  ;;  %6104 = vmatpush1.bf16.msra.mxu0 %v9228_v51  ;;  %v9293_v50 = vld [vmem:[#allocation8 + $0x164] ss:$28 sps:$4 sm:$0xff]  }
 0x327   :  { %5941 = vmatprep.subr.bf16.mxu1 %v9233_v52  ;;  %6105 = vmatprep.subr.bf16.mxu0 %v9236_v53  ;;  %v9294_v51 = vld [vmem:[#allocation8 + $0x328] ss:$28 sps:$4 sm:$0xff]   ;;  %v9291_v52 = vld [vmem:[#allocation8 + $0x160] ss:$28 sps:$4 sm:$0xff]  }
 0x328   :  { %v9295_v53 = vld [vmem:[#allocation8 + $0x168] ss:$28 sps:$4 sm:$0xff]  }
 0x32a   :  { %5942 = vmatpush1.bf16.msra.mxu1 %v9231_v54  ;;  %6106 = vmatpush1.bf16.msra.mxu0 %v9234_v55  ;;  %v9298_v54 = vld [vmem:[#allocation8 + $0x19c] ss:$28 sps:$4 sm:$0xff]  }
 0x32b   :  { %5943 = vmatprep.subr.bf16.mxu1 %v9239_v63  ;;  %6107 = vmatprep.subr.bf16.mxu0 %v9242_v56  ;;  %v9299_v55 = vld [vmem:[#allocation8 + $0x360] ss:$28 sps:$4 sm:$0xff]   ;;  %v9296_v63 = vld [vmem:[#allocation8 + $0x198] ss:$28 sps:$4 sm:$0xff]  }
 0x32c   :  { %v9300_v56 = vld [vmem:[#allocation8 + $0x1a0] ss:$28 sps:$4 sm:$0xff]  }
 0x32e   :  { %5944 = vmatpush1.bf16.msra.mxu1 %v9237_v57  ;;  %6108 = vmatpush1.bf16.msra.mxu0 %v9240_v58  ;;  %v9303_v57 = vld [vmem:[#allocation8 + $0x1d4] ss:$28 sps:$4 sm:$0xff]  }
 0x32f   :  { %5945 = vmatprep.subr.bf16.mxu1 %v9245_v59  ;;  %6109 = vmatprep.subr.bf16.mxu0 %v9248_v60  ;;  %v9304_v58 = vld [vmem:[#allocation8 + $0x558] ss:$28 sps:$4 sm:$0xff]   ;;  %v9301_v59 = vld [vmem:[#allocation8 + $0x1d0] ss:$28 sps:$4 sm:$0xff]  }
 0x330   :  { %v9305_v60 = vld [vmem:[#allocation8 + $0x398] ss:$28 sps:$4 sm:$0xff]  }
 0x332   :  { %5946 = vmatpush1.bf16.msra.mxu1 %v9243_v61  ;;  %6110 = vmatpush1.bf16.msra.mxu0 %v9246_v62  ;;  %v9308_v61 = vld [vmem:[#allocation8 + $0x20c] ss:$28 sps:$4 sm:$0xff]  }
 0x333   :  { %5947 = vmatprep.subr.bf16.mxu1 %v9251_v19  ;;  %6111 = vmatprep.subr.bf16.mxu0 %v9254_v0  ;;  %v9309_v62 = vld [vmem:[#allocation8 + $0x590] ss:$28 sps:$4 sm:$0xff]   ;;  %v9306_v19 = vld [vmem:[#allocation8 + $0x208] ss:$28 sps:$4 sm:$0xff]  }
 0x334   :  { %v9310_v0 = vld [vmem:[#allocation8 + $0x3d0] ss:$28 sps:$4 sm:$0xff]  }
 0x336   :  { %5948 = vmatpush1.bf16.msra.mxu1 %v9249_v1  ;;  %6112 = vmatpush1.bf16.msra.mxu0 %v9252_v3  ;;  %v9313_v1 = vld [vmem:[#allocation8 + $0x244] ss:$28 sps:$4 sm:$0xff]  }
 0x337   :  { %5949 = vmatprep.subr.bf16.mxu1 %v9257_v4  ;;  %6113 = vmatprep.subr.bf16.mxu0 %v9260_v18  ;;  %v9314_v3 = vld [vmem:[#allocation8 + $0x5c8] ss:$28 sps:$4 sm:$0xff]   ;;  %v9311_v4 = vld [vmem:[#allocation8 + $0x240] ss:$28 sps:$4 sm:$0xff]  }
 0x338   :  { %v9315_v18 = vld [vmem:[#allocation8 + $0x408] ss:$28 sps:$4 sm:$0xff]  }
 0x33a   :  { %5950 = vmatpush1.bf16.msra.mxu1 %v9255_v10  ;;  %6114 = vmatpush1.bf16.msra.mxu0 %v9258_v7  ;;  %v9318_v10 = vld [vmem:[#allocation8 + $0x27c] ss:$28 sps:$4 sm:$0xff]  }
 0x33b   :  { %6140 = vmatprep.subr.bf16.mxu1 %v9263_v15  ;;  %8049 = vmatprep.subr.bf16.mxu0 %v9264_v12  ;;  %v9319_v7 = vld [vmem:[#allocation8 + $0x600] ss:$28 sps:$4 sm:$0xff]   ;;  %v9323_v12 = vld [vmem:[#allocation8 + $0x2b4] ss:$28 sps:$4 sm:$0xff]  }
 0x33c   :  { %v9320_v15 = vld [vmem:[#allocation8 + $0x440] ss:$28 sps:$4 sm:$0xff]  }
 0x33d   :  { %5968 = vmatmul.mubr.bf16.vlgmr.msra.gmra.mrb[20].mxu1 %v10006_v30  ;;  %6132 = vmatmul.mubr.bf16.vlgmr.msra.gmra.mrb[8].mxu0 %v10006_v30 }
 0x33e   :  { %6141 = vmatpush1.bf16.msra.mxu1 %v9261_v14  ;;  %6172 = vmatprep.mubr.bf16.mxu1 %v9955_v38  ;;  %v9324_v14 = vld [vmem:[#allocation8 + $0x638] ss:$28 sps:$4 sm:$0xff]  }
 0x33f   :  { %8050 = vmatpush3.bf16.msra.mxu0 %v9265_v20  ;;  %6336 = vmatprep.mubr.bf16.mxu0 %v9955_v38  ;;  %v9284_v38 = vld [vmem:[#allocation8 + $0x2b8] ss:$28 sps:$4 sm:$0xff]   ;;  %v9321_v20 = vld [vmem:[#allocation8 + $0x2b0] ss:$28 sps:$4 sm:$0xff]  }
 0x340   :  { %6142 = vmatprep.subr.bf16.mxu1 %v9268_v21  ;;  %8051 = vmatprep.subr.bf16.mxu0 %v9269_v22  ;;  %v9325_v21 = vld [vmem:[#allocation8 + $0x478] ss:$28 sps:$4 sm:$0xff]   ;;  %v9328_v22 = vld [vmem:[#allocation8 + $0x2ec] ss:$28 sps:$4 sm:$0xff]  }
 0x342   :  { %6143 = vmatpush1.bf16.msra.mxu1 %v9266_v26  ;;  %v9329_v26 = vld [vmem:[#allocation8 + $0x670] ss:$28 sps:$4 sm:$0xff]  }
 0x343   :  { %8052 = vmatpush3.bf16.msra.mxu0 %v9270_v23  ;;  %6144 = vmatprep.subr.bf16.mxu1 %v9273_v24  ;;  %v9326_v23 = vld [vmem:[#allocation8 + $0x2e8] ss:$28 sps:$4 sm:$0xff]   ;;  %v9330_v24 = vld [vmem:[#allocation8 + $0x4b0] ss:$28 sps:$4 sm:$0xff]  }
 0x344   :  { %8053 = vmatprep.subr.bf16.mxu0 %v9274_v25  ;;  %v9333_v25 = vld [vmem:[#allocation8 + $0x324] ss:$28 sps:$4 sm:$0xff]  }
 0x346   :  { %6145 = vmatpush1.bf16.msra.mxu1 %v9271_v13  ;;  %v9334_v13 = vld [vmem:[#allocation8 + $0x6a8] ss:$28 sps:$4 sm:$0xff]  }
 0x347   :  { %8054 = vmatpush3.bf16.msra.mxu0 %v9275_v28  ;;  %6146 = vmatprep.subr.bf16.mxu1 %v9278_v29  ;;  %v9331_v28 = vld [vmem:[#allocation8 + $0x320] ss:$28 sps:$4 sm:$0xff]   ;;  %v9335_v29 = vld [vmem:[#allocation8 + $0x4e8] ss:$28 sps:$4 sm:$0xff]  }
 0x348   :  { %8055 = vmatprep.subr.bf16.mxu0 %v9279_v31  ;;  %v9338_v31 = vld [vmem:[#allocation8 + $0x35c] ss:$28 sps:$4 sm:$0xff]  }
 0x34a   :  { %6147 = vmatpush1.bf16.msra.mxu1 %v9276_v32  ;;  %v9339_v32 = vld [vmem:[#allocation8 + $0x6e0] ss:$28 sps:$4 sm:$0xff]  }
 0x34b   :  { %8056 = vmatpush3.bf16.msra.mxu0 %v9280_v35  ;;  %6148 = vmatprep.subr.bf16.mxu1 %v9283_v36  ;;  %v9336_v35 = vld [vmem:[#allocation8 + $0x358] ss:$28 sps:$4 sm:$0xff]   ;;  %v9340_v36 = vld [vmem:[#allocation8 + $0x520] ss:$28 sps:$4 sm:$0xff]  }
 0x34c   :  { %8057 = vmatprep.subr.bf16.mxu0 %v9284_v38  ;;  %v9343_v38 = vld [vmem:[#allocation8 + $0x394] ss:$28 sps:$4 sm:$0xff]  }
 0x34e   :  { %6149 = vmatpush1.bf16.msra.mxu1 %v9281_v39  ;;  %v9344_v39 = vld [vmem:[#allocation8 + $0x8d8] ss:$28 sps:$4 sm:$0xff]  }
 0x34f   :  { %8058 = vmatpush3.bf16.msra.mxu0 %v9285_v40  ;;  %6150 = vmatprep.subr.bf16.mxu1 %v9288_v43  ;;  %v9341_v40 = vld [vmem:[#allocation8 + $0x390] ss:$28 sps:$4 sm:$0xff]   ;;  %v9345_v43 = vld [vmem:[#allocation8 + $0x718] ss:$28 sps:$4 sm:$0xff]  }
 0x350   :  { %8059 = vmatprep.subr.bf16.mxu0 %v9289_v46  ;;  %v9348_v46 = vld [vmem:[#allocation8 + $0x3cc] ss:$28 sps:$4 sm:$0xff]  }
 0x352   :  { %6151 = vmatpush1.bf16.msra.mxu1 %v9286_v47  ;;  %v9349_v47 = vld [vmem:[#allocation8 + $0x910] ss:$28 sps:$4 sm:$0xff]  }
 0x353   :  { %8060 = vmatpush3.bf16.msra.mxu0 %v9290_v49  ;;  %6152 = vmatprep.subr.bf16.mxu1 %v9293_v50  ;;  %v9346_v49 = vld [vmem:[#allocation8 + $0x3c8] ss:$28 sps:$4 sm:$0xff]   ;;  %v9350_v50 = vld [vmem:[#allocation8 + $0x750] ss:$28 sps:$4 sm:$0xff]  }
 0x354   :  { %8061 = vmatprep.subr.bf16.mxu0 %v9294_v51  ;;  %v9353_v51 = vld [vmem:[#allocation8 + $0x404] ss:$28 sps:$4 sm:$0xff]  }
 0x356   :  { %6153 = vmatpush1.bf16.msra.mxu1 %v9291_v52  ;;  %v9354_v52 = vld [vmem:[#allocation8 + $0x948] ss:$28 sps:$4 sm:$0xff]  }
 0x357   :  { %8062 = vmatpush3.bf16.msra.mxu0 %v9295_v53  ;;  %6154 = vmatprep.subr.bf16.mxu1 %v9298_v54  ;;  %v9351_v53 = vld [vmem:[#allocation8 + $0x400] ss:$28 sps:$4 sm:$0xff]  }
 0x358   :  { %8063 = vmatprep.subr.bf16.mxu0 %v9299_v55  ;;  %v9358_v54 = vld [vmem:[#allocation8 + $0x43c] ss:$28 sps:$4 sm:$0xff]  }
 0x359   :  { %v9359_v55 = vld [vmem:[#allocation8 + $0x980] ss:$28 sps:$4 sm:$0xff]  }
 0x35a   :  { %6155 = vmatpush1.bf16.msra.mxu1 %v9296_v63  ;;  %v9356_v63 = vld [vmem:[#allocation8 + $0x438] ss:$28 sps:$4 sm:$0xff]  }
 0x35b   :  { %8064 = vmatpush3.bf16.msra.mxu0 %v9300_v56  ;;  %6156 = vmatprep.subr.bf16.mxu1 %v9303_v57  ;;  %v9363_v56 = vld [vmem:[#allocation8 + $0x474] ss:$28 sps:$4 sm:$0xff]  }
 0x35c   :  { %8071 = vmatprep.subr.bf16.mxu0 %v9304_v58  ;;  %v9364_v57 = vld [vmem:[#allocation8 + $0x9b8] ss:$28 sps:$4 sm:$0xff]   ;;  %v9361_v58 = vld [vmem:[#allocation8 + $0x470] ss:$28 sps:$4 sm:$0xff]  }
 0x35e   :  { %6337 = vmatmul.mubr.bf16.vlgmr.msra.gmra.mrb[12].mxu0 %v9957_v41  ;;  %6157 = vmatpush1.bf16.msra.mxu1 %v9301_v59  ;;  %v9365_v59 = vld [vmem:[#allocation8 + $0x7f8] ss:$28 sps:$4 sm:$0xff]  }
 0x35f   :  { %8072 = vmatpush3.bf16.msra.mxu0 %v9305_v60  ;;  %6376 = vmatprep.mubr.bf16.mxu0 %v9960_v44  ;;  %v9368_v60 = vld [vmem:[#allocation8 + $0x4ac] ss:$28 sps:$4 sm:$0xff]  }
 0x360   :  { %6158 = vmatprep.subr.bf16.mxu1 %v9308_v61  ;;  %8073 = vmatprep.subr.bf16.mxu0 %v9309_v62  ;;  %v9369_v61 = vld [vmem:[#allocation8 + $0x9f0] ss:$28 sps:$4 sm:$0xff]   ;;  %v9366_v62 = vld [vmem:[#allocation8 + $0x4a8] ss:$28 sps:$4 sm:$0xff]  }
 0x362   :  { %6159 = vmatpush1.bf16.msra.mxu1 %v9306_v19  ;;  %v9370_v19 = vld [vmem:[#allocation8 + $0x830] ss:$28 sps:$4 sm:$0xff]  }
 0x363   :  { %8074 = vmatpush3.bf16.msra.mxu0 %v9310_v0  ;;  %6160 = vmatprep.subr.bf16.mxu1 %v9313_v1  ;;  %v9373_v0 = vld [vmem:[#allocation8 + $0x4e4] ss:$28 sps:$4 sm:$0xff]  }
 0x364   :  { %8075 = vmatprep.subr.bf16.mxu0 %v9314_v3  ;;  %v9374_v1 = vld [vmem:[#allocation8 + $0xa28] ss:$28 sps:$4 sm:$0xff]   ;;  %v9371_v3 = vld [vmem:[#allocation8 + $0x4e0] ss:$28 sps:$4 sm:$0xff]  }
 0x366   :  { %6161 = vmatpush1.bf16.msra.mxu1 %v9311_v4  ;;  %v9375_v4 = vld [vmem:[#allocation8 + $0x868] ss:$28 sps:$4 sm:$0xff]  }
 0x367   :  { %8076 = vmatpush3.bf16.msra.mxu0 %v9315_v18  ;;  %6162 = vmatprep.subr.bf16.mxu1 %v9318_v10  ;;  %v9378_v18 = vld [vmem:[#allocation8 + $0x51c] ss:$28 sps:$4 sm:$0xff]  }
 0x368   :  { %8077 = vmatprep.subr.bf16.mxu0 %v9319_v7  ;;  %v9379_v10 = vld [vmem:[#allocation8 + $0xa60] ss:$28 sps:$4 sm:$0xff]   ;;  %v9376_v7 = vld [vmem:[#allocation8 + $0x518] ss:$28 sps:$4 sm:$0xff]  }
 0x36a   :  { %6163 = vmatpush1.bf16.msra.mxu1 %v9316_v5  ;;  %v9380_v5 = vld [vmem:[#allocation8 + $0x8a0] ss:$28 sps:$4 sm:$0xff]  }
 0x36b   :  { %8078 = vmatpush3.bf16.msra.mxu0 %v9320_v15  ;;  %6164 = vmatprep.subr.bf16.mxu1 %v9323_v12  ;;  %v9383_v15 = vld [vmem:[#allocation8 + $0x554] ss:$28 sps:$4 sm:$0xff]  }
 0x36c   :  { %8079 = vmatprep.subr.bf16.mxu0 %v9324_v14  ;;  %v9381_v12 = vld [vmem:[#allocation8 + $0x550] ss:$28 sps:$4 sm:$0xff]   ;;  %v9384_v14 = vld [vmem:[#allocation8 + $0xa98] ss:$28 sps:$4 sm:$0xff]  }
 0x36e   :  { %6165 = vmatpush1.bf16.msra.mxu1 %v9321_v20  ;;  %v9387_v20 = vld [vmem:[#allocation8 + $0x58c] ss:$28 sps:$4 sm:$0xff]  }
 0x36f   :  { %8080 = vmatpush3.bf16.msra.mxu0 %v9325_v21  ;;  %6166 = vmatprep.subr.bf16.mxu1 %v9328_v22  ;;  %v9385_v21 = vld [vmem:[#allocation8 + $0x588] ss:$28 sps:$4 sm:$0xff]   ;;  %v9388_v22 = vld [vmem:[#allocation8 + $0xad0] ss:$28 sps:$4 sm:$0xff]  }
 0x370   :  { %8081 = vmatprep.subr.bf16.mxu0 %v9329_v26  ;;  %v9391_v26 = vld [vmem:[#allocation8 + $0x5c4] ss:$28 sps:$4 sm:$0xff]  }
 0x372   :  { %6167 = vmatpush1.bf16.msra.mxu1 %v9326_v23  ;;  %v9389_v23 = vld [vmem:[#allocation8 + $0x5c0] ss:$28 sps:$4 sm:$0xff]  }
 0x373   :  { %8082 = vmatpush3.bf16.msra.mxu0 %v9330_v24  ;;  %6168 = vmatprep.subr.bf16.mxu1 %v9333_v25  ;;  %v9392_v24 = vld [vmem:[#allocation8 + $0xb08] ss:$28 sps:$4 sm:$0xff]   ;;  %v9395_v25 = vld [vmem:[#allocation8 + $0x5fc] ss:$28 sps:$4 sm:$0xff]  }
 0x374   :  { %8083 = vmatprep.subr.bf16.mxu0 %v9334_v13  ;;  %v9393_v13 = vld [vmem:[#allocation8 + $0x5f8] ss:$28 sps:$4 sm:$0xff]  }
 0x376   :  { %6169 = vmatpush1.bf16.msra.mxu1 %v9331_v28  ;;  %v9396_v28 = vld [vmem:[#allocation8 + $0xb40] ss:$28 sps:$4 sm:$0xff]  }
 0x377   :  { %8084 = vmatpush3.bf16.msra.mxu0 %v9335_v29  ;;  %6170 = vmatprep.subr.bf16.mxu1 %v9338_v31  ;;  %v9399_v29 = vld [vmem:[#allocation8 + $0x634] ss:$28 sps:$4 sm:$0xff]  }
 0x378   :  { %8085 = vmatprep.subr.bf16.mxu0 %v9339_v32  ;;  %v9397_v31 = vld [vmem:[#allocation8 + $0x630] ss:$28 sps:$4 sm:$0xff]   ;;  %v9400_v32 = vld [vmem:[#allocation8 + $0xb78] ss:$28 sps:$4 sm:$0xff]  }
 0x37a   :  { %6171 = vmatpush1.bf16.msra.mxu1 %v9336_v35  ;;  %v9403_v35 = vld [vmem:[#allocation8 + $0x66c] ss:$28 sps:$4 sm:$0xff]  }
 0x37b   :  { %8086 = vmatpush3.bf16.msra.mxu0 %v9340_v36  ;;  %6181 = vmatprep.subr.bf16.mxu1 %v9343_v38  ;;  %v9401_v36 = vld [vmem:[#allocation8 + $0x668] ss:$28 sps:$4 sm:$0xff]   ;;  %v9404_v38 = vld [vmem:[#allocation8 + $0xbb0] ss:$28 sps:$4 sm:$0xff]  }
 0x37c   :  { %8093 = vmatprep.subr.bf16.mxu0 %v9344_v39  ;;  %v9407_v39 = vld [vmem:[#allocation8 + $0x6a4] ss:$28 sps:$4 sm:$0xff]  }
 0x37d   :  { %6173 = vmatmul.mubr.bf16.vlgmr.msra.gmra.mrb[24].mxu1 %v9957_v41  ;;  %v9355_v41 = vld [vmem:[#allocation8 + $0x788] ss:$28 sps:$4 sm:$0xff]  }
 0x37e   :  { %6377 = vmatmul.mubr.bf16.vlgmr.msra.gmra.mrb[16].mxu0 %v9980_v11  ;;  %6182 = vmatpush1.bf16.msra.mxu1 %v9341_v40  ;;  %v9405_v40 = vld [vmem:[#allocation8 + $0x6a0] ss:$28 sps:$4 sm:$0xff]  }
 0x37f   :  { %6213 = vmatprep.mubr.bf16.mxu1 %v9960_v44  ;;  %8094 = vmatpush3.bf16.msra.mxu0 %v9345_v43  ;;  %v9360_v44 = vld [vmem:[#allocation8 + $0x7c0] ss:$28 sps:$4 sm:$0xff]   ;;  %v9408_v43 = vld [vmem:[#allocation8 + $0xbe8] ss:$28 sps:$4 sm:$0xff]  }
 0x380   :  { %6416 = vmatprep.mubr.bf16.mxu0 %v9995_v34  ;;  %6183 = vmatprep.subr.bf16.mxu1 %v9348_v46  ;;  %v9411_v46 = vld [vmem:[#allocation8 + $0x6dc] ss:$28 sps:$4 sm:$0xff]  }
 0x381   :  { %8095 = vmatprep.subr.bf16.mxu0 %v9349_v47  ;;  %v9409_v47 = vld [vmem:[#allocation8 + $0x6d8] ss:$28 sps:$4 sm:$0xff]  }
 0x382   :  { %6184 = vmatpush1.bf16.msra.mxu1 %v9346_v49  ;;  %v9412_v49 = vld [vmem:[#allocation8 + $0xc20] ss:$28 sps:$4 sm:$0xff]  }
 0x383   :  { %8096 = vmatpush3.bf16.msra.mxu0 %v9350_v50  ;;  %6185 = vmatprep.subr.bf16.mxu1 %v9353_v51  ;;  %v9415_v50 = vld [vmem:[#allocation8 + $0x714] ss:$28 sps:$4 sm:$0xff]   ;;  %v9461_v51 = vld [vmem:[#allocation11 + $0x40] sm:$0xff]  }
 0x384   :  { %8097 = vmatprep.subr.bf16.mxu0 %v9354_v52  ;;  %v9413_v52 = vld [vmem:[#allocation8 + $0x710] ss:$28 sps:$4 sm:$0xff]  }
 0x386   :  { %6186 = vmatpush1.bf16.msra.mxu1 %v9351_v53  ;;  %v9418_v53 = vld [vmem:[#allocation8 + $0x74c] ss:$28 sps:$4 sm:$0xff]  }
 0x387   :  { %8098 = vmatpush3.bf16.msra.mxu0 %v9355_v41  ;;  %6187 = vmatprep.subr.bf16.mxu1 %v9358_v54  ;;  %v9462_v41 = vld [vmem:[#allocation11] sm:$0xff]   ;;  %v9466_v54 = vld [vmem:[#allocation11 + $0x48] sm:$0xff]  }
 0x388   :  { %8099 = vmatprep.subr.bf16.mxu0 %v9359_v55  ;;  %v9416_v55 = vld [vmem:[#allocation8 + $0x748] ss:$28 sps:$4 sm:$0xff]  }
 0x38a   :  { %6188 = vmatpush1.bf16.msra.mxu1 %v9356_v63  ;;  %v9421_v63 = vld [vmem:[#allocation8 + $0x784] ss:$28 sps:$4 sm:$0xff]  }
 0x38b   :  { %8100 = vmatpush3.bf16.msra.mxu0 %v9360_v44  ;;  %6189 = vmatprep.subr.bf16.mxu1 %v9363_v56  ;;  %v9467_v44 = vld [vmem:[#allocation11 + $0x8] sm:$0xff]   ;;  %v9471_v56 = vld [vmem:[#allocation11 + $0x50] sm:$0xff]  }
 0x38c   :  { %8101 = vmatprep.subr.bf16.mxu0 %v9364_v57  ;;  %v9419_v57 = vld [vmem:[#allocation8 + $0x780] ss:$28 sps:$4 sm:$0xff]  }
 0x38e   :  { %6190 = vmatpush1.bf16.msra.mxu1 %v9361_v58  ;;  %v9424_v58 = vld [vmem:[#allocation8 + $0x7bc] ss:$28 sps:$4 sm:$0xff]  }
 0x38f   :  { %8102 = vmatpush3.bf16.msra.mxu0 %v9365_v59  ;;  %6191 = vmatprep.subr.bf16.mxu1 %v9368_v60  ;;  %v9472_v59 = vld [vmem:[#allocation11 + $0x10] sm:$0xff]  }
 0x390   :  { %8103 = vmatprep.subr.bf16.mxu0 %v9369_v61  ;;  %v9422_v60 = vld [vmem:[#allocation8 + $0x7b8] ss:$28 sps:$4 sm:$0xff]  }
 0x391   :  { %v9427_v61 = vld [vmem:[#allocation8 + $0x7f4] ss:$28 sps:$4 sm:$0xff]  }
 0x392   :  { %6192 = vmatpush1.bf16.msra.mxu1 %v9366_v62  ;;  %v9481_v62 = vld [vmem:[#allocation11 + $0x60] sm:$0xff]  }
 0x393   :  { %8104 = vmatpush3.bf16.msra.mxu0 %v9370_v19  ;;  %6193 = vmatprep.subr.bf16.mxu1 %v9373_v0  ;;  %v9425_v19 = vld [vmem:[#allocation8 + $0x7f0] ss:$28 sps:$4 sm:$0xff]  }
 0x394   :  { %8105 = vmatprep.subr.bf16.mxu0 %v9374_v1  ;;  %v9430_v0 = vld [vmem:[#allocation8 + $0x82c] ss:$28 sps:$4 sm:$0xff]  }
 0x395   :  { %v9482_v1 = vld [vmem:[#allocation11 + $0x20] sm:$0xff]  }
 0x396   :  { %6194 = vmatpush1.bf16.msra.mxu1 %v9371_v3  ;;  %v9486_v3 = vld [vmem:[#allocation11 + $0x68] sm:$0xff]  }
 0x397   :  { %8106 = vmatpush3.bf16.msra.mxu0 %v9375_v4  ;;  %6195 = vmatprep.subr.bf16.mxu1 %v9378_v18  ;;  %v9428_v4 = vld [vmem:[#allocation8 + $0x828] ss:$28 sps:$4 sm:$0xff]  }
 0x398   :  { %8107 = vmatprep.subr.bf16.mxu0 %v9379_v10  ;;  %v9433_v18 = vld [vmem:[#allocation8 + $0x864] ss:$28 sps:$4 sm:$0xff]   ;;  %v9487_v10 = vld [vmem:[#allocation11 + $0x28] sm:$0xff]  }
 0x39a   :  { %6196 = vmatpush1.bf16.msra.mxu1 %v9376_v7  ;;  %v9491_v7 = vld [vmem:[#allocation11 + $0x70] sm:$0xff]  }
 0x39b   :  { %8108 = vmatpush3.bf16.msra.mxu0 %v9380_v5  ;;  %6197 = vmatprep.subr.bf16.mxu1 %v9383_v15  ;;  %v9431_v5 = vld [vmem:[#allocation8 + $0x860] ss:$28 sps:$4 sm:$0xff]  }
 0x39c   :  { %8219 = vmatprep.subr.bf16.mxu0 %v9745_v33  ;;  %v9436_v15 = vld [vmem:[#allocation8 + $0x89c] ss:$28 sps:$4 sm:$0xff]  }
 0x39e   :  { %6417 = vmatmul.mubr.bf16.vlgmr.msra.gmra.mrb[20].mxu0 %v9997_v37  ;;  %6198 = vmatpush1.bf16.msra.mxu1 %v9381_v12  ;;  %v9492_v12 = vld [vmem:[#allocation11 + $0x30] sm:$0xff]  }
 0x39f   :  { %8220 = vmatpush3.bf16.msra.mxu0 %v9384_v14  ;;  %6199 = vmatprep.subr.bf16.mxu1 %v9387_v20  ;;  %v9496_v14 = vld [vmem:[#allocation11 + $0x78] sm:$0xff]   ;;  %v9434_v20 = vld [vmem:[#allocation8 + $0x898] ss:$28 sps:$4 sm:$0xff]  }
 0x3a0   :  { %8221 = vmatprep.subr.bf16.mxu0 %v9745_v33  ;;  %8235 = vmatprep.mubr.msk.bf16.mxu0 %vm9746_vm0, %v9745_v33 }
 0x3a2   :  { %6200 = vmatpush1.bf16.msra.mxu1 %v9385_v21  ;;  %v9439_v21 = vld [vmem:[#allocation8 + $0x8d4] ss:$28 sps:$4 sm:$0xff]  }
 0x3a3   :  { %8222 = vmatpush3.bf16.msra.mxu0 %v9388_v22  ;;  %6201 = vmatprep.subr.bf16.mxu1 %v9391_v26  ;;  %v9497_v22 = vld [vmem:[#allocation11 + $0x38] sm:$0xff]   ;;  %v9437_v26 = vld [vmem:[#allocation8 + $0x8d0] ss:$28 sps:$4 sm:$0xff]  }
 0x3a4   :  { %8223 = vmatprep.subr.bf16.mxu0 %v9745_v33 }
 0x3a6   :  { %6202 = vmatpush1.bf16.msra.mxu1 %v9389_v23  ;;  %v9442_v23 = vld [vmem:[#allocation8 + $0x90c] ss:$28 sps:$4 sm:$0xff]  }
 0x3a7   :  { %8224 = vmatpush3.bf16.msra.mxu0 %v9392_v24  ;;  %6203 = vmatprep.subr.bf16.mxu1 %v9395_v25  ;;  %v9440_v24 = vld [vmem:[#allocation8 + $0x908] ss:$28 sps:$4 sm:$0xff]  }
 0x3a8   :  { %8225 = vmatprep.subr.bf16.mxu0 %v9745_v33  ;;  %v9445_v25 = vld [vmem:[#allocation8 + $0x944] ss:$28 sps:$4 sm:$0xff]  }
 0x3aa   :  { %6204 = vmatpush1.bf16.msra.mxu1 %v9393_v13  ;;  %v9443_v13 = vld [vmem:[#allocation8 + $0x940] ss:$28 sps:$4 sm:$0xff]  }
 0x3ab   :  { %8226 = vmatpush3.bf16.msra.mxu0 %v9396_v28  ;;  %6205 = vmatprep.subr.bf16.mxu1 %v9399_v29  ;;  %v9448_v28 = vld [vmem:[#allocation8 + $0x97c] ss:$28 sps:$4 sm:$0xff]  }
 0x3ac   :  { %8227 = vmatprep.subr.bf16.mxu0 %v9745_v33  ;;  %v9446_v29 = vld [vmem:[#allocation8 + $0x978] ss:$28 sps:$4 sm:$0xff]  }
 0x3ae   :  { %6206 = vmatpush1.bf16.msra.mxu1 %v9397_v31  ;;  %v9451_v31 = vld [vmem:[#allocation8 + $0x9b4] ss:$28 sps:$4 sm:$0xff]  }
 0x3af   :  { %8228 = vmatpush3.bf16.msra.mxu0 %v9400_v32  ;;  %6207 = vmatprep.subr.bf16.mxu1 %v9403_v35  ;;  %v9449_v32 = vld [vmem:[#allocation8 + $0x9b0] ss:$28 sps:$4 sm:$0xff]  }
 0x3b0   :  { %8229 = vmatprep.subr.bf16.mxu0 %v9745_v33  ;;  %v9454_v35 = vld [vmem:[#allocation8 + $0x9ec] ss:$28 sps:$4 sm:$0xff]  }
 0x3b2   :  { %6208 = vmatpush1.bf16.msra.mxu1 %v9401_v36  ;;  %v9452_v36 = vld [vmem:[#allocation8 + $0x9e8] ss:$28 sps:$4 sm:$0xff]  }
 0x3b3   :  { %8230 = vmatpush3.bf16.msra.mxu0 %v9404_v38  ;;  %6209 = vmatprep.subr.bf16.mxu1 %v9407_v39  ;;  %v9457_v38 = vld [vmem:[#allocation8 + $0xa24] ss:$28 sps:$4 sm:$0xff]  }
 0x3b4   :  { %8231 = vmatprep.subr.bf16.mxu0 %v9745_v33  ;;  %v9455_v39 = vld [vmem:[#allocation8 + $0xa20] ss:$28 sps:$4 sm:$0xff]  }
 0x3b6   :  { %6210 = vmatpush1.bf16.msra.mxu1 %v9405_v40  ;;  %v9460_v40 = vld [vmem:[#allocation8 + $0xa5c] ss:$28 sps:$4 sm:$0xff]  }
 0x3b7   :  { %8232 = vmatpush3.bf16.msra.mxu0 %v9408_v43  ;;  %6211 = vmatprep.subr.bf16.mxu1 %v9411_v46  ;;  %v9458_v43 = vld [vmem:[#allocation8 + $0xa58] ss:$28 sps:$4 sm:$0xff]  }
 0x3b8   :  { %8233 = vmatprep.subr.bf16.mxu0 %v9745_v33  ;;  %v9465_v46 = vld [vmem:[#allocation8 + $0xa94] ss:$28 sps:$4 sm:$0xff]  }
 0x3ba   :  { %6212 = vmatpush1.bf16.msra.mxu1 %v9409_v47  ;;  %v9463_v47 = vld [vmem:[#allocation8 + $0xa90] ss:$28 sps:$4 sm:$0xff]  }
 0x3bb   :  { %8234 = vmatpush3.bf16.msra.mxu0 %v9412_v49  ;;  %6222 = vmatprep.subr.bf16.mxu1 %v9415_v50  ;;  %v9470_v49 = vld [vmem:[#allocation8 + $0xacc] ss:$28 sps:$4 sm:$0xff]  }
 0x3bc   :  { %8124 = vmatprep.subr.bf16.mxu0 %v9461_v51  ;;  %v9468_v50 = vld [vmem:[#allocation8 + $0xac8] ss:$28 sps:$4 sm:$0xff]  }
 0x3bd   :  { %6214 = vmatmul.mubr.bf16.vlgmr.msra.gmra.mrb[24].mxu1 %v9980_v11  ;;  %v9476_v11 = vld [vmem:[#allocation11 + $0x58] sm:$0xff]  }
 0x3be   :  { %8236 = vmatmul.mubr.bf16.vlgmr.msra.gmra.mrb[24].mxu0 %v10006_v30  ;;  %6223 = vmatpush1.bf16.msra.mxu1 %v9413_v52  ;;  %v9475_v51 = vld [vmem:[#allocation8 + $0xb04] ss:$28 sps:$4 sm:$0xff]  }
 0x3bf   :  { %6254 = vmatprep.mubr.bf16.mxu1 %v9995_v34  ;;  %6224 = vmatprep.subr.bf16.mxu1 %v9418_v53  ;;  %v9477_v34 = vld [vmem:[#allocation11 + $0x18] sm:$0xff]   ;;  %v9480_v53 = vld [vmem:[#allocation8 + $0xb3c] ss:$28 sps:$4 sm:$0xff]  }
 0x3c0   :  { %8125 = vmatpush3.bf16.msra.mxu0 %v9462_v41  ;;  %v9473_v52 = vld [vmem:[#allocation8 + $0xb00] ss:$28 sps:$4 sm:$0xff]   ;;  %v9478_v41 = vld [vmem:[#allocation8 + $0xb38] ss:$28 sps:$4 sm:$0xff]  }
 0x3c1   :  { %8126 = vmatprep.subr.bf16.mxu0 %v9466_v54  ;;  %v9485_v54 = vld [vmem:[#allocation8 + $0xb74] ss:$28 sps:$4 sm:$0xff]  }
 0x3c2   :  { %6225 = vmatpush1.bf16.msra.mxu1 %v9416_v55  ;;  %v9483_v55 = vld [vmem:[#allocation8 + $0xb70] ss:$28 sps:$4 sm:$0xff]  }
 0x3c3   :  { %6226 = vmatprep.subr.bf16.mxu1 %v9421_v63  ;;  %v10034_v63 = vld [vmem:[#allocation10] sm:$0xff] }
 0x3c4   :  { %8127 = vmatpush3.bf16.msra.mxu0 %v9467_v44  ;;  %v3768_v44 = vrot.slane %v10034_v63, %v575_v8 }
 0x3c5   :  { %8128 = vmatprep.subr.bf16.mxu0 %v9471_v56  ;;  %v9488_v56 = vld [vmem:[#allocation8 + $0xba8] ss:$28 sps:$4 sm:$0xff]  }
 0x3c6   :  { %6227 = vmatpush1.bf16.msra.mxu1 %v9419_v57  ;;  %v9495_v57 = vld [vmem:[#allocation8 + $0xbe4] ss:$28 sps:$4 sm:$0xff]  }
 0x3c7   :  { %6228 = vmatprep.subr.bf16.mxu1 %v9424_v58 }
 0x3c8   :  { %8129 = vmatpush3.bf16.msra.mxu0 %v9472_v59 }
 0x3c9   :  { %8130 = vmatprep.subr.bf16.mxu0 %v9476_v11  ;;  %v3776_v11 = vrot.slane %v10034_v63, %v583_v9  ;;  %v9501_v9 = vld [vmem:[#allocation11 + $0xc0] sm:$0xff]  }
 0x3ca   :  { %6229 = vmatpush1.bf16.msra.mxu1 %v9422_v60 }
 0x3cb   :  { %6230 = vmatprep.subr.bf16.mxu1 %v9427_v61 }
 0x3cc   :  { %8131 = vmatpush3.bf16.msra.mxu0 %v9477_v34 }
 0x3cd   :  { %8132 = vmatprep.subr.bf16.mxu0 %v9481_v62 }
 0x3ce   :  { %6231 = vmatpush1.bf16.msra.mxu1 %v9425_v19 }
 0x3cf   :  { %6232 = vmatprep.subr.bf16.mxu1 %v9430_v0  ;;  %v9493_v0 = vld [vmem:[#allocation8 + $0xbe0] ss:$28 sps:$4 sm:$0xff]  }
 0x3d0   :  { %8133 = vmatpush3.bf16.msra.mxu0 %v9482_v1 }
 0x3d1   :  { %8134 = vmatprep.subr.bf16.mxu0 %v9486_v3 }
 0x3d2   :  { %6233 = vmatpush1.bf16.msra.mxu1 %v9428_v4  ;;  %v9500_v4 = vld [vmem:[#allocation8 + $0xc1c] ss:$28 sps:$4 sm:$0xff]  }
 0x3d3   :  { %6234 = vmatprep.subr.bf16.mxu1 %v9433_v18 }
 0x3d4   :  { %8135 = vmatpush3.bf16.msra.mxu0 %v9487_v10 }
 0x3d5   :  { %8136 = vmatprep.subr.bf16.mxu0 %v9491_v7 }
 0x3d6   :  { %6235 = vmatpush1.bf16.msra.mxu1 %v9431_v5  ;;  %v9498_v5 = vld [vmem:[#allocation8 + $0xc18] ss:$28 sps:$4 sm:$0xff]  }
 0x3d7   :  { %6236 = vmatprep.subr.bf16.mxu1 %v9436_v15 }
 0x3d8   :  { %8137 = vmatpush3.bf16.msra.mxu0 %v9492_v12 }
 0x3d9   :  { %8138 = vmatprep.subr.bf16.mxu0 %v9496_v14  ;;  %v9525_v14 = vld [vmem:[#allocation11 + $0x140] sm:$0xff]  }
 0x3da   :  { %6237 = vmatpush1.bf16.msra.mxu1 %v9434_v20  ;;  %v9526_v20 = vld [vmem:[#allocation11 + $0x100] sm:$0xff]  }
 0x3db   :  { %6238 = vmatprep.subr.bf16.mxu1 %v9439_v21  ;;  %v9527_v21 = vld [vmem:[#allocation11 + $0x148] sm:$0xff]  }
 0x3dc   :  { %8139 = vmatpush3.bf16.msra.mxu0 %v9497_v22  ;;  %v9502_v22 = vld [vmem:[#allocation11 + $0x80] sm:$0xff]  }
 0x3dd   :  { %8168 = vmatprep.subr.bf16.mxu0 %v9525_v14 }
 0x3de   :  { %6239 = vmatpush1.bf16.msra.mxu1 %v9437_v26  ;;  %v9503_v26 = vld [vmem:[#allocation11 + $0xc8] sm:$0xff]  }
 0x3df   :  { %6240 = vmatprep.subr.bf16.mxu1 %v9442_v23  ;;  %v9528_v23 = vld [vmem:[#allocation11 + $0x108] sm:$0xff]  }
 0x3e2   :  { %6241 = vmatpush1.bf16.msra.mxu1 %v9440_v24 }
 0x3e3   :  { %6242 = vmatprep.subr.bf16.mxu1 %v9445_v25  ;;  %v9529_v25 = vld [vmem:[#allocation11 + $0x150] sm:$0xff]  }
 0x3e6   :  { %6243 = vmatpush1.bf16.msra.mxu1 %v9443_v13  ;;  %v9504_v13 = vld [vmem:[#allocation11 + $0x88] sm:$0xff]  }
 0x3e7   :  { %6244 = vmatprep.subr.bf16.mxu1 %v9448_v28  ;;  %v9505_v28 = vld [vmem:[#allocation11 + $0xd0] sm:$0xff]  }
 0x3ea   :  { %6245 = vmatpush1.bf16.msra.mxu1 %v9446_v29  ;;  %v9530_v29 = vld [vmem:[#allocation11 + $0x110] sm:$0xff]  }
 0x3eb   :  { %6246 = vmatprep.subr.bf16.mxu1 %v9451_v31  ;;  %v9531_v31 = vld [vmem:[#allocation11 + $0x158] sm:$0xff]  }
 0x3ee   :  { %6247 = vmatpush1.bf16.msra.mxu1 %v9449_v32  ;;  %v9506_v32 = vld [vmem:[#allocation11 + $0x90] sm:$0xff]  }
 0x3ef   :  { %6248 = vmatprep.subr.bf16.mxu1 %v9454_v35  ;;  %v9507_v35 = vld [vmem:[#allocation11 + $0xd8] sm:$0xff]  }
 0x3f2   :  { %6249 = vmatpush1.bf16.msra.mxu1 %v9452_v36  ;;  %v9532_v36 = vld [vmem:[#allocation11 + $0x118] sm:$0xff]  }
 0x3f3   :  { %6250 = vmatprep.subr.bf16.mxu1 %v9457_v38  ;;  %v9533_v38 = vld [vmem:[#allocation11 + $0x160] sm:$0xff]  }
 0x3f6   :  { %6251 = vmatpush1.bf16.msra.mxu1 %v9455_v39  ;;  %v9508_v39 = vld [vmem:[#allocation11 + $0x98] sm:$0xff]  }
 0x3f7   :  { %6252 = vmatprep.subr.bf16.mxu1 %v9460_v40  ;;  %v9534_v40 = vld [vmem:[#allocation11 + $0x120] sm:$0xff]  }
 0x3fa   :  { %6253 = vmatpush1.bf16.msra.mxu1 %v9458_v43  ;;  %v9510_v43 = vld [vmem:[#allocation11 + $0xa0] sm:$0xff]  }
 0x3fb   :  { %6263 = vmatprep.subr.bf16.mxu1 %v9465_v46  ;;  %v9511_v46 = vld [vmem:[#allocation11 + $0xe8] sm:$0xff]  }
 0x3fd   :  { %6255 = vmatmul.mubr.bf16.vlgmr.msra.gmra.mrb[24].mxu1 %v9997_v37  ;;  %v9490_v37 = vld [vmem:[#allocation8 + $0xbac] ss:$28 sps:$4 sm:$0xff]  }
 0x3fe   :  { %6264 = vmatpush1.bf16.msra.mxu1 %v9463_v47  ;;  %6295 = vmatprep.mubr.bf16.mxu1 %v9744_v27  ;;  %v3764_v27 = vrot.slane %v10034_v63, %v571_v48  ;;  %v9512_v47 = vld [vmem:[#allocation11 + $0xa8] sm:$0xff]  }
 0x3ff   :  { %6265 = vmatprep.subr.bf16.mxu1 %v9470_v49  ;;  %v3772_v49 = vrot.slane %v10034_v63, %v579_v42 }
 0x402   :  { %6266 = vmatpush1.bf16.msra.mxu1 %v9468_v50  ;;  %v9513_v50 = vld [vmem:[#allocation11 + $0xf0] sm:$0xff]  }
 0x403   :  { %6267 = vmatprep.subr.bf16.mxu1 %v9475_v51 }
 0x406   :  { %6268 = vmatpush1.bf16.msra.mxu1 %v9473_v52 }
 0x407   :  { %6269 = vmatprep.subr.bf16.mxu1 %v9480_v53  ;;  %v9514_v53 = vld [vmem:[#allocation11 + $0xb0] sm:$0xff]  }
 0x40a   :  { %6270 = vmatpush1.bf16.msra.mxu1 %v9478_v41 }
 0x40b   :  { %6271 = vmatprep.subr.bf16.mxu1 %v9485_v54 }
 0x40e   :  { %6272 = vmatpush1.bf16.msra.mxu1 %v9483_v55 }
 0x40f   :  { %6273 = vmatprep.subr.bf16.mxu1 %v9490_v37  ;;  %v9515_v37 = vld [vmem:[#allocation11 + $0xf8] sm:$0xff]  }
 0x410   :  { %v5969_v58 = vpop.f32.mrb[20].mxu1  ;;  %v10042_v59 = vpop.f32.mrb[8].mxu0 }
 0x411   :  { %v8265_v60 = vadd.f32 %v5969_v58, %v3764_v27  ;;  %v5971_v61 = vpop.f32.mrb[21].mxu1  ;;  %v6135_v34 = vpop.f32.mrb[9].mxu0  ;;  %v8267_v41 = vadd.f32 %v10042_v59, %v3772_v49  ;;  %v9518_v58 = vld [vmem:[#allocation11 + $0x188] sm:$0xff]   ;;  %v9519_v59 = vld [vmem:[#allocation11 + $0x190] sm:$0xff]  }
 0x412   :  { %v8266_v62 = vadd.f32 %v5971_v61, %v3768_v44  ;;  %v5973_v48 = vpop.f32.mrb[22].mxu1  ;;  %v6137_v19 = vpop.f32.mrb[10].mxu0  ;;  %6274 = vmatpush1.bf16.msra.mxu1 %v9488_v56  ;;  %v8268_v10 = vadd.f32 %v6135_v34, %v3776_v11  ;;  %v9516_v44 = vld [vmem:[#allocation11 + $0xb8] sm:$0xff]   ;;  %v9522_v61 = vld [vmem:[#allocation11 + $0x1a8] sm:$0xff]   ;;  %v3788_v34 = vrot.slane %v10034_v63, %v595_v45 }
 0x413   :  { %v6464_v1 = vmax.f32 %v8265_v60, 0.0  ;;  %v5974_v8 = vpop.f32.mrb[23].mxu1  ;;  %v6138_v3 = vpop.f32.mrb[11].mxu0  ;;  %6275 = vmatprep.subr.bf16.mxu1 %v9495_v57  ;;  %v6466_v56 = vmax.f32 %v8267_v41, 0.0  ;;  %v9517_v57 = vld [vmem:[#allocation11 + $0x180] sm:$0xff]   ;;  %v9520_v11 = vld [vmem:[#allocation11 + $0x198] sm:$0xff]  }
 0x414   :  { %v6465_v18 = vmax.f32 %v8266_v62, 0.0  ;;  %v6467_v12 = vmax.f32 %v8268_v10, 0.0  ;;  %v9521_v60 = vld [vmem:[#allocation11 + $0x1a0] sm:$0xff]   ;;  %v9523_v19 = vld [vmem:[#allocation11 + $0x1b0] sm:$0xff]   ;;  %v9535_v10 = vld [vmem:[#allocation11 + $0x168] sm:$0xff]  }
 0x415   :  { %v6471_v15 = vpack.c.bf16 %v6464_v1, %v6464_v1  ;;  %v6473_v42 = vpack.c.bf16 %v6466_v56, %v6466_v56  ;;  %v9536_v45 = vld [vmem:[#allocation11 + $0x128] sm:$0xff]  }
 0x416   :  { %v6472_v7 = vpack.c.bf16 %v6465_v18, %v6465_v18  ;;  %6276 = vmatpush1.bf16.msra.mxu1 %v9493_v0  ;;  %v6474_v24 = vpack.c.bf16 %v6467_v12, %v6467_v12  ;;  %v9524_v18 = vld [vmem:[#allocation11 + $0x1b8] sm:$0xff]  }
 0x417   :  { %6277 = vmatprep.subr.bf16.mxu1 %v9500_v4 }
 0x418   :  { %6965 = vmatprep.mubr.bf16.mxu0 %v6472_v7 }
 0x419   :  { %6966 = vmatmul.mubr.bf16.vlgmr.msra.gmra.mrb[28].mxu0 %v6471_v15 }
 0x41a   :  { %6278 = vmatpush1.bf16.msra.mxu1 %v9498_v5  ;;  %8169 = vmatpush3.bf16.msra.mxu0 %v9526_v20  ;;  %v9537_v5 = vld [vmem:[#allocation11 + $0x170] sm:$0xff]  }
 0x41b   :  { %8146 = vmatprep.subr.bf16.mxu1 %v9501_v9  ;;  %8170 = vmatprep.subr.bf16.mxu0 %v9527_v21  ;;  %v9538_v9 = vld [vmem:[#allocation11 + $0x130] sm:$0xff]  }
 0x41d   :  { %6296 = vmatmul.mubr.bf16.vlgmr.msra.gmra.mrb[24].mxu1 %v10006_v30  ;;  %v9509_v30 = vld [vmem:[#allocation11 + $0xe0] sm:$0xff]  }
 0x41e   :  { %8147 = vmatpush3.bf16.msra.mxu1 %v9502_v22  ;;  %7005 = vmatprep.mubr.bf16.mxu1 %v6474_v24  ;;  %v9539_v22 = vld [vmem:[#allocation11 + $0x178] sm:$0xff]  }
 0x41f   :  { %8148 = vmatprep.subr.bf16.mxu1 %v9503_v26  ;;  %8171 = vmatpush3.bf16.msra.mxu0 %v9528_v23  ;;  %v9540_v26 = vld [vmem:[#allocation11 + $0x138] sm:$0xff]  }
 0x420   :  { %8172 = vmatprep.subr.bf16.mxu0 %v9529_v25 }
 0x422   :  { %8149 = vmatpush3.bf16.msra.mxu1 %v9504_v13 }
 0x423   :  { %8150 = vmatprep.subr.bf16.mxu1 %v9505_v28  ;;  %8173 = vmatpush3.bf16.msra.mxu0 %v9530_v29 }
 0x424   :  { %8174 = vmatprep.subr.bf16.mxu0 %v9531_v31 }
 0x426   :  { %8151 = vmatpush3.bf16.msra.mxu1 %v9506_v32 }
 0x427   :  { %8152 = vmatprep.subr.bf16.mxu1 %v9507_v35  ;;  %8175 = vmatpush3.bf16.msra.mxu0 %v9532_v36  ;;  %v3780_v35 = vrot.slane %v10034_v63, %v587_v16  ;;  %v7917_v16 = vld [vmem:[#allocation13] ss:$0 sm:$0xff] }
 0x428   :  { %8176 = vmatprep.subr.bf16.mxu0 %v9533_v38 }
 0x42a   :  { %8153 = vmatpush3.bf16.msra.mxu1 %v9508_v39  ;;  %v3784_v39 = vrot.slane %v10034_v63, %v591_v17 }
 0x42b   :  { %8154 = vmatprep.subr.bf16.mxu1 %v9509_v30  ;;  %8177 = vmatpush3.bf16.msra.mxu0 %v9534_v40 }
 0x42c   :  { %8178 = vmatprep.subr.bf16.mxu0 %v9535_v10 }
 0x42e   :  { %8155 = vmatpush3.bf16.msra.mxu1 %v9510_v43 }
 0x42f   :  { %8156 = vmatprep.subr.bf16.mxu1 %v9511_v46  ;;  %8179 = vmatpush3.bf16.msra.mxu0 %v9536_v45 }
 0x430   :  { %8180 = vmatprep.subr.bf16.mxu0 %v9537_v5 }
 0x431   :  { %v8065_v51 = vpop.f32.mrb[12].mxu0 }
 0x432   :  { %v8066_v52 = vpop.f32.mrb[13].mxu0  ;;  %8157 = vmatpush3.bf16.msra.mxu1 %v9512_v47 }
 0x433   :  { %v8067_v54 = vadd.f32 %v8066_v52, %v8065_v51  ;;  %v8068_v55 = vpop.f32.mrb[14].mxu0  ;;  %8158 = vmatprep.subr.bf16.mxu1 %v9513_v50  ;;  %8181 = vmatpush3.bf16.msra.mxu0 %v9538_v9 }
 0x434   :  { %v8069_v27 = vpop.f32.mrb[15].mxu0  ;;  %8182 = vmatprep.subr.bf16.mxu0 %v9539_v22 }
 0x435   :  { %v6339_v0 = vadd.f32 %v8067_v54, %v3788_v34 }
 0x436   :  { %8159 = vmatpush3.bf16.msra.mxu1 %v9514_v53 }
 0x437   :  { %8160 = vmatprep.subr.bf16.mxu1 %v9515_v37  ;;  %8183 = vmatpush3.bf16.msra.mxu0 %v9540_v26 }
 0x43a   :  { %8161 = vmatpush3.bf16.msra.mxu1 %v9516_v44 }
 0x43b   :  { %8239 = vmatprep.subr.bf16.mxu1 %v9745_v33 }
 0x43d   :  { %7006 = vmatmul.mubr.bf16.vlgmr.msra.gmra.mrb[28].mxu1 %v6473_v42 }
 0x43e   :  { %8240 = vmatpush3.bf16.msra.mxu1 %v9517_v57  ;;  %8255 = vmatprep.mubr.msk.bf16.mxu1 %vm9746_vm0, %v9745_v33 }
 0x43f   :  { %8241 = vmatprep.subr.bf16.mxu1 %v9745_v33 }
 0x442   :  { %8242 = vmatpush3.bf16.msra.mxu1 %v9518_v58 }
 0x443   :  { %8243 = vmatprep.subr.bf16.mxu1 %v9745_v33 }
 0x446   :  { %8244 = vmatpush3.bf16.msra.mxu1 %v9519_v59 }
 0x447   :  { %8245 = vmatprep.subr.bf16.mxu1 %v9745_v33 }
 0x44a   :  { %8246 = vmatpush3.bf16.msra.mxu1 %v9520_v11  ;;  %v7094_v11 = vand.u32 127, %v569_v2 }
 0x44b   :  { %8247 = vmatprep.subr.bf16.mxu1 %v9745_v33 }
 0x44c   :  { %vm7095_vm1 = vcmp.lt.s32.totalorder %v7094_v11, 10 }
 0x44e   :  { %8248 = vmatpush3.bf16.msra.mxu1 %v9521_v60 }
 0x44f   :  { %8249 = vmatprep.subr.bf16.mxu1 %v9745_v33 }
 0x451   :  { %v8087_v62 = vpop.f32.mrb[16].mxu0 }
 0x452   :  { %v8088_v48 = vpop.f32.mrb[17].mxu0  ;;  %8250 = vmatpush3.bf16.msra.mxu1 %v9522_v61 }
 0x453   :  { %v8089_v1 = vadd.f32 %v8088_v48, %v8087_v62  ;;  %v8090_v8 = vpop.f32.mrb[18].mxu0  ;;  %8251 = vmatprep.subr.bf16.mxu1 %v9745_v33 }
 0x454   :  { %v8091_v3 = vpop.f32.mrb[19].mxu0 }
 0x455   :  { %v6379_v4 = vadd.f32 %v8089_v1, %v6339_v0 }
 0x456   :  { %8252 = vmatpush3.bf16.msra.mxu1 %v9523_v19 }
 0x457   :  { %8253 = vmatprep.subr.bf16.mxu1 %v9745_v33 }
 0x45a   :  { %8254 = vmatpush3.bf16.msra.mxu1 %v9524_v18 }
 0x471   :  { %v8109_v7 = vpop.f32.mrb[20].mxu0 }
 0x472   :  { %v8110_v15 = vpop.f32.mrb[21].mxu0 }
 0x473   :  { %v8111_v12 = vadd.f32 %v8110_v15, %v8109_v7  ;;  %v8112_v14 = vpop.f32.mrb[22].mxu0 }
 0x474   :  { %v8113_v20 = vpop.f32.mrb[23].mxu0 }
 0x475   :  { %v6419_v21 = vadd.f32 %v8111_v12, %v6379_v4 }
 0x491   :  { %v6458_v33 = vpop.f32.mrb[24].mxu0 }
 0x492   :  { %v6459_v23 = vadd.f32 %v6458_v33, %v6419_v21  ;;  %v8237_v24 = vpop.f32.mrb[25].mxu0 }
 0x493   :  { %v6461_v25 = vpop.f32.mrb[26].mxu0 }
 0x494   :  { %v6470_v13 = vmax.f32 %v6459_v23, 0.0  ;;  %v8238_v28 = vpop.f32.mrb[27].mxu0 }
 0x496   :  { %v6477_v29 = vpack.c.bf16 %v6470_v13, %v6470_v13 }
 0x498   :  { %8256 = vmatmul.mubr.bf16.vlgmr.msra.gmra.mrb[32].mxu1 %v6477_v29 }
 0x4ec   :  { %v8140_v31 = vpop.f32.mrb[28].mxu0 }
 0x4ed   :  { %v8141_v32 = vpop.f32.mrb[29].mxu0 }
 0x4ee   :  { %v8142_v36 = vadd.f32 %v8141_v32, %v8140_v31  ;;  %v8143_v38 = vpop.f32.mrb[30].mxu0 }
 0x4ef   :  { %v8144_v30 = vpop.f32.mrb[31].mxu0 }
 0x4f0   :  { %v6297_v40 = vpop.f32.mrb[24].mxu1  ;;  %v6968_v37 = vadd.f32 %v8142_v36, %v7917_v16 }
 0x4f1   :  { %v8269_v43 = vadd.f32 %v6297_v40, %v3780_v35  ;;  %v6299_v46 = vpop.f32.mrb[25].mxu1 }
 0x4f2   :  { %v8270_v47 = vadd.f32 %v6299_v46, %v3784_v39  ;;  %v6301_v49 = vpop.f32.mrb[26].mxu1 }
 0x4f3   :  { %v6468_v50 = vmax.f32 %v8269_v43, 0.0  ;;  %v6302_v51 = vpop.f32.mrb[27].mxu1 }
 0x4f4   :  { %v6469_v52 = vmax.f32 %v8270_v47, 0.0 }
 0x4f5   :  { %v6475_v41 = vpack.c.bf16 %v6468_v50, %v6468_v50 }
 0x4f6   :  { %v6476_v53 = vpack.c.bf16 %v6469_v52, %v6469_v52 }
 0x4f8   :  { %7045 = vmatprep.mubr.bf16.mxu0 %v6476_v53 }
 0x4f9   :  { %7046 = vmatmul.mubr.bf16.vlgmr.msra.gmra.mrb[32].mxu0 %v6475_v41 }
 0x510   :  { %v8162_v54 = vpop.f32.mrb[28].mxu1 }
 0x511   :  { %v8163_v55 = vpop.f32.mrb[29].mxu1 }
 0x512   :  { %v8164_v6 = vadd.f32 %v8163_v55, %v8162_v54  ;;  %v8165_v27 = vpop.f32.mrb[30].mxu1 }
 0x513   :  { %v8166_v17 = vpop.f32.mrb[31].mxu1 }
 0x514   :  { %v7008_v63 = vadd.f32 %v8164_v6, %v6968_v37 }
 0x56b   :  { %v7087_v44 = vpop.f32.mrb[32].mxu1 }
 0x56c   :  { %v8257_v56 = vpop.f32.mrb[33].mxu1 }
 0x56d   :  { %v7090_v57 = vpop.f32.mrb[34].mxu1 }
 0x56e   :  { %v8258_v42 = vpop.f32.mrb[35].mxu1 }
 0x5cc   :  { %v8184_v58 = vpop.f32.mrb[32].mxu0 }
 0x5cd   :  { %v8185_v59 = vpop.f32.mrb[33].mxu0 }
 0x5ce   :  { %v8186_v60 = vadd.f32 %v8185_v59, %v8184_v58  ;;  %v8187_v61 = vpop.f32.mrb[34].mxu0 }
 0x5cf   :  { %v8188_v34 = vpop.f32.mrb[35].mxu0 }
 0x5d0   :  { %v7048_v62 = vadd.f32 %v8186_v60, %v7008_v63 }
 0x5d2   :  { %v7088_v48 = vadd.f32 %v7087_v44, %v7048_v62 }
 0x5d4   :  { %v7096_v19 = vsel %vm7095_vm1, %v7088_v48, -1e+30 }
 0x5d5   :  { %7097 = vmax.xlane.f32.xlu0 %v7096_v19 }
 0x662   :  { %v7098_v0 = vpop.xlane.xlu0 %7097 }
 0x663   :  { %v7099_v1 = vsub.f32 %v7096_v19, %v7098_v0 }
 0x665   :  { %v7100_v8 = vmul.f32 1.442695, %v7099_v1 }
 0x667   :  { %9541 = vpow2.f32 %v7100_v8 }
 0x671   :  { %v9542_v3 = vpop.eup %9541 }
 0x672   :  { %7102 = vadd.xlane.f32.xlu0 %v9542_v3 }
 0x6ff   :  { %v7103_v4 = vpop.xlane.xlu0 %7102 }
 0x700   :  { %9543 = vlog2.f32 %v7103_v4 }
 0x70a   :  { %v9544_v18 = vpop.eup %9543 }
 0x70b   :  { %v7105_v2 = vmul.f32 0.6931472, %v9544_v18 }
 0x70d   :  { %v7106_v10 = vsub.f32 %v7099_v1, %v7105_v2 }
 0x70f   :  { %7107 = vst [vmem:[#allocation14] sm:$0xff] %v7106_v10 }
 0x710   :  { %9712 = shalt.err (!%p9709_p4)
}
 0x711   :  { %s9713_s15 = scalar_lea.hbm %s10091_s7, 128 }
 0x712   :  { %p9714_p5 = scmp.ne.s32.totalorder %s10091_s7, %s9713_s15  ;;  %p9717_p6 = scmp.lt.u32.totalorder %s9713_s15, %s10091_s7 }
 0x714   :  { %p9719_p7 = pnand %p9717_p6, %p9714_p5 }
 0x716   :  { %9722 = shalt.err (!%p9719_p7)
}
 0x717   :  { %7117 = dma.vmem_to_hbm [thread:$0]  %s7115_s3, 128, %s10091_s7, [#allocation4]  }
 0x718   :  { %9731 = dma.done.wait [#allocation4], 128  }
 0x719   :  { %9732 = vsyncadd [#allocation4], 4294967168 }
 0x71a   :  { %7121 = vsyncpa [#allocation3], 1 }
 0x71b   :  { %7122 = vsyncpa [#allocation6], 1 }
 0x71c   :  { %7123 = vsyncpa [#allocation9], 1 }
 0x71d   :  { %7124 = vsyncpa [#allocation12], 1 }
 0x71e   :  { %7125 = vsyncpa [#allocation4], 1 }

</bundles_post_ra>
